<compile_context>
chip_gen: v5e
topology: v5e:2x2
jax: 0.10.0
libtpu: 0.0.40
codegen_flags: <defaults>
</compile_context>

<pallas_src>
import numpy as np
import jax
import jax.numpy as jnp
from jax.experimental import pallas as pl
from jax.experimental.pallas import tpu as pltpu


RP = 8  # per-time-step row pitch (sublane tile height); B <= RP rows are valid


def _gate_pitch(h):
    """Smallest power-of-two lane pitch >= h (min 32) so gate slices never overlap."""
    gp = 32
    while gp < h:
        gp *= 2
    return gp


# ---------------------------------------------------------------------------
# Fused Pallas kernel (all 3 LSTM layers, wavefront-pipelined, + quantile heads)
# ---------------------------------------------------------------------------
def _make_fused_kernel(T):
    """Build the fused kernel with static T (seq len)."""

    def kernel(x_ref,                       # (T*RP, F)   rows [t*RP, t*RP+B) valid
               wih1_r, whh1_r, b1_r,        # (F,  4*gp1), (H1, 4*gp1), (1, 4*gp1)
               wih2_r, whh2_r, b2_r,        # (H1, 4*gp2), (H2, 4*gp2), (1, 4*gp2)
               wih3_r, whh3_r, b3_r,        # (H2, 4*gp3), (H3, 4*gp3), (1, 4*gp3)
               wq_r, bq_r,                  # (H3, Q), (1, Q)
               out_ref,                     # (T*RP, Q)
               hs3_sc):                     # (T*RP, H3) f32 VMEM scratch
        f32 = jnp.float32

        # Hoist all weight loads out of the unrolled recurrence.
        x = x_ref[...].astype(f32)
        wih1, whh1, b1 = wih1_r[...], whh1_r[...], b1_r[...]
        wih2, whh2, b2 = wih2_r[...], whh2_r[...], b2_r[...]
        wih3, whh3, b3 = wih3_r[...], whh3_r[...], b3_r[...]

        H1, H2, H3 = whh1.shape[0], whh2.shape[0], whh3.shape[0]
        gp1, gp2, gp3 = whh1.shape[1] // 4, whh2.shape[1] // 4, whh3.shape[1] // 4

        def lstm_step(xg, h, c, whh, H, gp):
            """One LSTM cell update.  xg already contains x@W_ih + (b_ih+b_hh)."""
            gates = xg + jnp.dot(h, whh, preferred_element_type=f32)  # (RP, 4*gp)
            # PyTorch gate order: i, f, g, o.  Slices read exactly [k*gp, k*gp+H),
            # so zero-padded columns between gates are never read.
            i_g = jax.nn.sigmoid(gates[:, 0 * gp:0 * gp + H])
            f_g = jax.nn.sigmoid(gates[:, 1 * gp:1 * gp + H])
            g_g = jnp.tanh(gates[:, 2 * gp:2 * gp + H])
            o_g = jax.nn.sigmoid(gates[:, 3 * gp:3 * gp + H])
            c_new = f_g * c + i_g * g_g
            h_new = o_g * jnp.tanh(c_new)
            return h_new, c_new

        # Layer-1 input projection for all steps as one batched MXU matmul
        # (independent of the recurrence; bias folded in).
        xp1 = jnp.dot(x, wih1, preferred_element_type=f32) + b1      # (T*RP, 4*gp1)

        z = lambda H: jnp.zeros((RP, H), f32)
        h1, c1 = z(H1), z(H1)
        h2, c2 = z(H2), z(H2)
        h3, c3 = z(H3), z(H3)

        # Wavefront: at iteration s compute layer-1 step s, layer-2 step s-1,
        # layer-3 step s-2.  Three independent dependence chains per iteration.
        for s in range(T + 2):
            h1_in = h1    # = h1[s-1] : layer-2 input for step s-1
            h2_in = h2    # = h2[s-2] : layer-3 input for step s-2

            if s < T:
                # xp1 slice starts at a multiple of RP=8 sublanes -> whole-vreg slice.
                h1, c1 = lstm_step(xp1[s * RP:(s + 1) * RP, :], h1, c1, whh1, H1, gp1)

            t2 = s - 1
            if 0 <= t2 < T:
                # h1_in was produced in the *previous* wavefront iteration, so this
                # input projection is off the h2 recurrent critical path.
                xg2 = jnp.dot(h1_in, wih2, preferred_element_type=f32) + b2
                h2, c2 = lstm_step(xg2, h2, c2, whh2, H2, gp2)

            t3 = s - 2
            if 0 <= t3 < T:
                xg3 = jnp.dot(h2_in, wih3, preferred_element_type=f32) + b3
                h3, c3 = lstm_step(xg3, h3, c3, whh3, H3, gp3)
                # Each step owns its own 8-sublane tile of the scratch: aligned store,
                # no read-modify-write of a shared tile across steps.
                hs3_sc[t3 * RP:(t3 + 1) * RP, :] = h3

        # Fused quantile heads: one (T*RP, H3) @ (H3, Q) matmul.
        y = jnp.dot(hs3_sc[...], wq_r[...], preferred_element_type=f32) + bq_r[...]
        out_ref[...] = y.astype(out_ref.dtype)

    return kernel


# ---------------------------------------------------------------------------
# One-time parameter packing (hoisted out of the forward path)
# ---------------------------------------------------------------------------
def _pack_lstm(w_ih, w_hh, b_ih, b_hh):
    """PyTorch layout (4H, Fin)/(4H, H)/(4H,) -> lane-pitch-packed matmul operands."""
    H4, Fin = w_ih.shape
    H = H4 // 4
    gp = _gate_pitch(H)
    wih_g = w_ih.reshape(4, H, Fin)
    whh_g = w_hh.reshape(4, H, H)
    bias_g = (b_ih + b_hh).reshape(4, H)

    wih_p = jnp.zeros((Fin, 4 * gp), jnp.float32)
    whh_p = jnp.zeros((H, 4 * gp), jnp.float32)
    b_p = jnp.zeros((1, 4 * gp), jnp.float32)
    for k in range(4):  # gate order i, f, g, o
        wih_p = wih_p.at[:, k * gp:k * gp + H].set(wih_g[k].T)
        whh_p = whh_p.at[:, k * gp:k * gp + H].set(whh_g[k].T)
        b_p = b_p.at[:, k * gp:k * gp + H].set(bias_g[k])
    return wih_p, whh_p, b_p


def prepare_params(params):
    wih, whh, bias = [], [], []
    for (w_ih, w_hh, b_ih, b_hh) in params["lstm"]:
        a, b, c = _pack_lstm(w_ih, w_hh, b_ih, b_hh)
        wih.append(a)
        whh.append(b)
        bias.append(c)
    return {
        "wih": tuple(wih),
        "whh": tuple(whh),
        "b": tuple(bias),
        "wq": params["w_final"],                       # (10, Q)
        "bq": params["b_final"].reshape(1, -1),        # (1, Q)
    }


# ---------------------------------------------------------------------------
# Forward wrapper (one pallas_call per forward)
# ---------------------------------------------------------------------------
def q_model_forward(x_btf, pp):
    """x_btf: (B, T, len_features) -> (B, T, num_quantiles)."""
    B, T, F = x_btf.shape
    assert B <= RP, "fold larger batches into multiples of the row pitch"
    Q = pp["wq"].shape[1]
    H3 = pp["whh"][2].shape[0]

    # time-major, step pitch padded to RP=8 sublanes: rows [t*RP, t*RP+B) hold x[:, t, :];
    # padded rows are zero (they evolve as a zero-input LSTM and never reach the output).
    x_p = jnp.zeros((T, RP, F), x_btf.dtype)
    x_p = x_p.at[:, :B, :].set(jnp.transpose(x_btf, (1, 0, 2)))
    x2d = x_p.reshape(T * RP, F)

    kernel = _make_fused_kernel(T)
    y2d = pl.pallas_call(
        kernel,
        out_shape=jax.ShapeDtypeStruct((T * RP, Q), x_btf.dtype),
        scratch_shapes=[pltpu.VMEM((T * RP, H3), jnp.float32)],
    )(x2d,
      pp["wih"][0], pp["whh"][0], pp["b"][0],
      pp["wih"][1], pp["whh"][1], pp["b"][1],
      pp["wih"][2], pp["whh"][2], pp["b"][2],
      pp["wq"], pp["bq"])

    y = y2d.reshape(T, RP, Q)[:, :B, :]
    return jnp.transpose(y, (1, 0, 2))


# ---------------------------------------------------------------------------
# Pure-JAX reference (for correctness check)
# ---------------------------------------------------------------------------
def _lstm_ref(x_btf, w_ih, w_hh, b_ih, b_hh):
    B, T, F = x_btf.shape
    H = w_hh.shape[1]

    def step(carry, x_t):
        h, c = carry
        gates = x_t @ w_ih.T + h @ w_hh.T + b_ih + b_hh
        i, f, g, o = jnp.split(gates, 4, axis=-1)
        i, f, o = jax.nn.sigmoid(i), jax.nn.sigmoid(f), jax.nn.sigmoid(o)
        g = jnp.tanh(g)
        c = f * c + i * g
        h = o * jnp.tanh(c)
        return (h, c), h

    h0 = jnp.zeros((B, H), x_btf.dtype)
    c0 = jnp.zeros((B, H), x_btf.dtype)
    _, hs = jax.lax.scan(step, (h0, c0), jnp.transpose(x_btf, (1, 0, 2)))
    return jnp.transpose(hs, (1, 0, 2))


def q_model_ref(x_btf, params):
    x = x_btf
    for (w_ih, w_hh, b_ih, b_hh) in params["lstm"]:
        x = _lstm_ref(x, w_ih, w_hh, b_ih, b_hh)
    return x @ params["w_final"] + params["b_final"]


# ---------------------------------------------------------------------------
# Deterministic parameter construction (mirrors q_model.__init__)
# ---------------------------------------------------------------------------
def make_params(key, len_features, quantiles):
    layer_dims = [(len_features, 50), (50, 25), (25, 10)]
    lstm = []
    for (fin, h) in layer_dims:
        bound = 1.0 / np.sqrt(h)
        key, k1, k2, k3, k4 = jax.random.split(key, 5)
        w_ih = jax.random.uniform(k1, (4 * h, fin), jnp.float32, -bound, bound)
        w_hh = jax.random.uniform(k2, (4 * h, h), jnp.float32, -bound, bound)
        b_ih = jax.random.uniform(k3, (4 * h,), jnp.float32, -bound, bound)
        b_hh = jax.random.uniform(k4, (4 * h,), jnp.float32, -bound, bound)
        lstm.append((w_ih, w_hh, b_ih, b_hh))

    # final_layers: one Linear(10, 1) per quantile, orthogonal weight, zero bias
    ortho = jax.nn.initializers.orthogonal()
    rows = []
    for _ in quantiles:
        key, sub = jax.random.split(key)
        rows.append(ortho(sub, (1, 10), jnp.float32))
    w_final = jnp.concatenate(rows, axis=0).T          # (10, Q)
    b_final = jnp.zeros((len(quantiles),), jnp.float32)
    return {"lstm": lstm, "w_final": w_final, "b_final": b_final}


# ---------------------------------------------------------------------------
if __name__ == "__main__":
    quantiles = (0.1, 0.5, 0.9)
    batch, seq, len_features = 2, 8, 77

    key = jax.random.PRNGKey(0)
    key, kp, kx = jax.random.split(key, 3)
    params = make_params(kp, len_features, quantiles)
    packed = prepare_params(params)          # one-time weight packing (off the hot path)
    x = jax.random.normal(kx, (batch, seq, len_features), jnp.float32)

    fwd = jax.jit(q_model_forward)
    out = jax.block_until_ready(fwd(x, packed))
    assert out.shape == (batch, seq, len(quantiles)), out.shape

    ref = jax.block_until_ready(q_model_ref(x, params))
    np.testing.assert_allclose(np.asarray(out), np.asarray(ref),
                               rtol=1e-4, atol=1e-5)
    print("KERNEL_OK")
</pallas_src>

<mosaic_0001>
module attributes {stable_mosaic.version = 11 : i64} {
  func.func @kernel(%arg0: memref<64x77xf32, #tpu.memory_space<vmem>>, %arg1: memref<77x256xf32, #tpu.memory_space<vmem>>, %arg2: memref<50x256xf32, #tpu.memory_space<vmem>>, %arg3: memref<1x256xf32, #tpu.memory_space<vmem>>, %arg4: memref<50x128xf32, #tpu.memory_space<vmem>>, %arg5: memref<25x128xf32, #tpu.memory_space<vmem>>, %arg6: memref<1x128xf32, #tpu.memory_space<vmem>>, %arg7: memref<25x128xf32, #tpu.memory_space<vmem>>, %arg8: memref<10x128xf32, #tpu.memory_space<vmem>>, %arg9: memref<1x128xf32, #tpu.memory_space<vmem>>, %arg10: memref<10x3xf32, #tpu.memory_space<vmem>>, %arg11: memref<1x3xf32, #tpu.memory_space<vmem>>, %arg12: memref<64x3xf32, #tpu.memory_space<vmem>>, %arg13: memref<64x10xf32, #tpu.memory_space<vmem>>) attributes {dimension_semantics = [], scalar_prefetch = 0 : i64, scratch_operands = 1 : i64, tpu.core_type = #tpu.core_type<tc>} {
    %c0 = arith.constant 0 : index
    %c0_0 = arith.constant 0 : index
    %0 = vector.load %arg0[%c0, %c0_0] : memref<64x77xf32, #tpu.memory_space<vmem>>, vector<64x77xf32>
    %c0_1 = arith.constant 0 : index
    %c0_2 = arith.constant 0 : index
    %1 = vector.load %arg1[%c0_1, %c0_2] : memref<77x256xf32, #tpu.memory_space<vmem>>, vector<77x256xf32>
    %c0_3 = arith.constant 0 : index
    %c0_4 = arith.constant 0 : index
    %2 = vector.load %arg2[%c0_3, %c0_4] : memref<50x256xf32, #tpu.memory_space<vmem>>, vector<50x256xf32>
    %c0_5 = arith.constant 0 : index
    %c0_6 = arith.constant 0 : index
    %3 = vector.load %arg3[%c0_5, %c0_6] : memref<1x256xf32, #tpu.memory_space<vmem>>, vector<1x256xf32>
    %c0_7 = arith.constant 0 : index
    %c0_8 = arith.constant 0 : index
    %4 = vector.load %arg4[%c0_7, %c0_8] : memref<50x128xf32, #tpu.memory_space<vmem>>, vector<50x128xf32>
    %c0_9 = arith.constant 0 : index
    %c0_10 = arith.constant 0 : index
    %5 = vector.load %arg5[%c0_9, %c0_10] : memref<25x128xf32, #tpu.memory_space<vmem>>, vector<25x128xf32>
    %c0_11 = arith.constant 0 : index
    %c0_12 = arith.constant 0 : index
    %6 = vector.load %arg6[%c0_11, %c0_12] : memref<1x128xf32, #tpu.memory_space<vmem>>, vector<1x128xf32>
    %c0_13 = arith.constant 0 : index
    %c0_14 = arith.constant 0 : index
    %7 = vector.load %arg7[%c0_13, %c0_14] : memref<25x128xf32, #tpu.memory_space<vmem>>, vector<25x128xf32>
    %c0_15 = arith.constant 0 : index
    %c0_16 = arith.constant 0 : index
    %8 = vector.load %arg8[%c0_15, %c0_16] : memref<10x128xf32, #tpu.memory_space<vmem>>, vector<10x128xf32>
    %c0_17 = arith.constant 0 : index
    %c0_18 = arith.constant 0 : index
    %9 = vector.load %arg9[%c0_17, %c0_18] : memref<1x128xf32, #tpu.memory_space<vmem>>, vector<1x128xf32>
    %cst = arith.constant dense<0.000000e+00> : vector<64x256xf32>
    %10 = tpu.matmul %0, %1, %cst {dimension_numbers = #tpu.dot_dimension_numbers<[1], [0], [0], [1], [0, 0, 1, 1], [], []>} : vector<64x77xf32>, vector<77x256xf32>, vector<64x256xf32> -> vector<64x256xf32>
    %11 = vector.broadcast %3 : vector<1x256xf32> to vector<64x256xf32>
    %12 = arith.addf %10, %11 : vector<64x256xf32>
    %cst_19 = arith.constant 0.000000e+00 : f32
    %13 = vector.broadcast %cst_19 : f32 to vector<8x50xf32>
    %cst_20 = arith.constant 0.000000e+00 : f32
    %14 = vector.broadcast %cst_20 : f32 to vector<8x50xf32>
    %cst_21 = arith.constant 0.000000e+00 : f32
    %15 = vector.broadcast %cst_21 : f32 to vector<8x25xf32>
    %cst_22 = arith.constant 0.000000e+00 : f32
    %16 = vector.broadcast %cst_22 : f32 to vector<8x25xf32>
    %cst_23 = arith.constant 0.000000e+00 : f32
    %17 = vector.broadcast %cst_23 : f32 to vector<8x10xf32>
    %cst_24 = arith.constant 0.000000e+00 : f32
    %18 = vector.broadcast %cst_24 : f32 to vector<8x10xf32>
    %19 = vector.extract_strided_slice %12 {offsets = [0, 0], sizes = [8, 256], strides = [1, 1]} : vector<64x256xf32> to vector<8x256xf32>
    %cst_25 = arith.constant dense<0.000000e+00> : vector<8x256xf32>
    %20 = tpu.matmul %13, %2, %cst_25 {dimension_numbers = #tpu.dot_dimension_numbers<[1], [0], [0], [1], [0, 0, 1, 1], [], []>} : vector<8x50xf32>, vector<50x256xf32>, vector<8x256xf32> -> vector<8x256xf32>
    %21 = arith.addf %19, %20 : vector<8x256xf32>
    %22 = vector.extract_strided_slice %21 {offsets = [0, 0], sizes = [8, 50], strides = [1, 1]} : vector<8x256xf32> to vector<8x50xf32>
    %23 = arith.negf %22 : vector<8x50xf32>
    %24 = math.exp %23 : vector<8x50xf32>
    %cst_26 = arith.constant 1.000000e+00 : f32
    %25 = vector.broadcast %cst_26 : f32 to vector<8x50xf32>
    %26 = arith.addf %25, %24 : vector<8x50xf32>
    %27 = arith.divf %25, %26 : vector<8x50xf32>
    %28 = vector.extract_strided_slice %21 {offsets = [0, 64], sizes = [8, 50], strides = [1, 1]} : vector<8x256xf32> to vector<8x50xf32>
    %29 = arith.negf %28 : vector<8x50xf32>
    %30 = math.exp %29 : vector<8x50xf32>
    %cst_27 = arith.constant 1.000000e+00 : f32
    %31 = vector.broadcast %cst_27 : f32 to vector<8x50xf32>
    %32 = arith.addf %31, %30 : vector<8x50xf32>
    %33 = arith.divf %31, %32 : vector<8x50xf32>
    %34 = vector.extract_strided_slice %21 {offsets = [0, 128], sizes = [8, 50], strides = [1, 1]} : vector<8x256xf32> to vector<8x50xf32>
    %35 = math.tanh %34 : vector<8x50xf32>
    %36 = vector.extract_strided_slice %21 {offsets = [0, 192], sizes = [8, 50], strides = [1, 1]} : vector<8x256xf32> to vector<8x50xf32>
    %37 = arith.negf %36 : vector<8x50xf32>
    %38 = math.exp %37 : vector<8x50xf32>
    %cst_28 = arith.constant 1.000000e+00 : f32
    %39 = vector.broadcast %cst_28 : f32 to vector<8x50xf32>
    %40 = arith.addf %39, %38 : vector<8x50xf32>
    %41 = arith.divf %39, %40 : vector<8x50xf32>
    %42 = arith.mulf %33, %14 : vector<8x50xf32>
    %43 = arith.mulf %27, %35 : vector<8x50xf32>
    %44 = arith.addf %42, %43 : vector<8x50xf32>
    %45 = math.tanh %44 : vector<8x50xf32>
    %46 = arith.mulf %41, %45 : vector<8x50xf32>
    %47 = vector.extract_strided_slice %12 {offsets = [8, 0], sizes = [8, 256], strides = [1, 1]} : vector<64x256xf32> to vector<8x256xf32>
    %cst_29 = arith.constant dense<0.000000e+00> : vector<8x256xf32>
    %48 = tpu.matmul %46, %2, %cst_29 {dimension_numbers = #tpu.dot_dimension_numbers<[1], [0], [0], [1], [0, 0, 1, 1], [], []>} : vector<8x50xf32>, vector<50x256xf32>, vector<8x256xf32> -> vector<8x256xf32>
    %49 = arith.addf %47, %48 : vector<8x256xf32>
    %50 = vector.extract_strided_slice %49 {offsets = [0, 0], sizes = [8, 50], strides = [1, 1]} : vector<8x256xf32> to vector<8x50xf32>
    %51 = arith.negf %50 : vector<8x50xf32>
    %52 = math.exp %51 : vector<8x50xf32>
    %cst_30 = arith.constant 1.000000e+00 : f32
    %53 = vector.broadcast %cst_30 : f32 to vector<8x50xf32>
    %54 = arith.addf %53, %52 : vector<8x50xf32>
    %55 = arith.divf %53, %54 : vector<8x50xf32>
    %56 = vector.extract_strided_slice %49 {offsets = [0, 64], sizes = [8, 50], strides = [1, 1]} : vector<8x256xf32> to vector<8x50xf32>
    %57 = arith.negf %56 : vector<8x50xf32>
    %58 = math.exp %57 : vector<8x50xf32>
    %cst_31 = arith.constant 1.000000e+00 : f32
    %59 = vector.broadcast %cst_31 : f32 to vector<8x50xf32>
    %60 = arith.addf %59, %58 : vector<8x50xf32>
    %61 = arith.divf %59, %60 : vector<8x50xf32>
    %62 = vector.extract_strided_slice %49 {offsets = [0, 128], sizes = [8, 50], strides = [1, 1]} : vector<8x256xf32> to vector<8x50xf32>
    %63 = math.tanh %62 : vector<8x50xf32>
    %64 = vector.extract_strided_slice %49 {offsets = [0, 192], sizes = [8, 50], strides = [1, 1]} : vector<8x256xf32> to vector<8x50xf32>
    %65 = arith.negf %64 : vector<8x50xf32>
    %66 = math.exp %65 : vector<8x50xf32>
    %cst_32 = arith.constant 1.000000e+00 : f32
    %67 = vector.broadcast %cst_32 : f32 to vector<8x50xf32>
    %68 = arith.addf %67, %66 : vector<8x50xf32>
    %69 = arith.divf %67, %68 : vector<8x50xf32>
    %70 = arith.mulf %61, %44 : vector<8x50xf32>
    %71 = arith.mulf %55, %63 : vector<8x50xf32>
    %72 = arith.addf %70, %71 : vector<8x50xf32>
    %73 = math.tanh %72 : vector<8x50xf32>
    %74 = arith.mulf %69, %73 : vector<8x50xf32>
    %cst_33 = arith.constant dense<0.000000e+00> : vector<8x128xf32>
    %75 = tpu.matmul %46, %4, %cst_33 {dimension_numbers = #tpu.dot_dimension_numbers<[1], [0], [0], [1], [0, 0, 1, 1], [], []>} : vector<8x50xf32>, vector<50x128xf32>, vector<8x128xf32> -> vector<8x128xf32>
    %76 = vector.broadcast %6 : vector<1x128xf32> to vector<8x128xf32>
    %77 = arith.addf %75, %76 : vector<8x128xf32>
    %cst_34 = arith.constant dense<0.000000e+00> : vector<8x128xf32>
    %78 = tpu.matmul %15, %5, %cst_34 {dimension_numbers = #tpu.dot_dimension_numbers<[1], [0], [0], [1], [0, 0, 1, 1], [], []>} : vector<8x25xf32>, vector<25x128xf32>, vector<8x128xf32> -> vector<8x128xf32>
    %79 = arith.addf %77, %78 : vector<8x128xf32>
    %80 = vector.extract_strided_slice %79 {offsets = [0, 0], sizes = [8, 25], strides = [1, 1]} : vector<8x128xf32> to vector<8x25xf32>
    %81 = arith.negf %80 : vector<8x25xf32>
    %82 = math.exp %81 : vector<8x25xf32>
    %cst_35 = arith.constant 1.000000e+00 : f32
    %83 = vector.broadcast %cst_35 : f32 to vector<8x25xf32>
    %84 = arith.addf %83, %82 : vector<8x25xf32>
    %85 = arith.divf %83, %84 : vector<8x25xf32>
    %86 = vector.extract_strided_slice %79 {offsets = [0, 32], sizes = [8, 25], strides = [1, 1]} : vector<8x128xf32> to vector<8x25xf32>
    %87 = arith.negf %86 : vector<8x25xf32>
    %88 = math.exp %87 : vector<8x25xf32>
    %cst_36 = arith.constant 1.000000e+00 : f32
    %89 = vector.broadcast %cst_36 : f32 to vector<8x25xf32>
    %90 = arith.addf %89, %88 : vector<8x25xf32>
    %91 = arith.divf %89, %90 : vector<8x25xf32>
    %92 = vector.extract_strided_slice %79 {offsets = [0, 64], sizes = [8, 25], strides = [1, 1]} : vector<8x128xf32> to vector<8x25xf32>
    %93 = math.tanh %92 : vector<8x25xf32>
    %94 = vector.extract_strided_slice %79 {offsets = [0, 96], sizes = [8, 25], strides = [1, 1]} : vector<8x128xf32> to vector<8x25xf32>
    %95 = arith.negf %94 : vector<8x25xf32>
    %96 = math.exp %95 : vector<8x25xf32>
    %cst_37 = arith.constant 1.000000e+00 : f32
    %97 = vector.broadcast %cst_37 : f32 to vector<8x25xf32>
    %98 = arith.addf %97, %96 : vector<8x25xf32>
    %99 = arith.divf %97, %98 : vector<8x25xf32>
    %100 = arith.mulf %91, %16 : vector<8x25xf32>
    %101 = arith.mulf %85, %93 : vector<8x25xf32>
    %102 = arith.addf %100, %101 : vector<8x25xf32>
    %103 = math.tanh %102 : vector<8x25xf32>
    %104 = arith.mulf %99, %103 : vector<8x25xf32>
    %105 = vector.extract_strided_slice %12 {offsets = [16, 0], sizes = [8, 256], strides = [1, 1]} : vector<64x256xf32> to vector<8x256xf32>
    %cst_38 = arith.constant dense<0.000000e+00> : vector<8x256xf32>
    %106 = tpu.matmul %74, %2, %cst_38 {dimension_numbers = #tpu.dot_dimension_numbers<[1], [0], [0], [1], [0, 0, 1, 1], [], []>} : vector<8x50xf32>, vector<50x256xf32>, vector<8x256xf32> -> vector<8x256xf32>
    %107 = arith.addf %105, %106 : vector<8x256xf32>
    %108 = vector.extract_strided_slice %107 {offsets = [0, 0], sizes = [8, 50], strides = [1, 1]} : vector<8x256xf32> to vector<8x50xf32>
    %109 = arith.negf %108 : vector<8x50xf32>
    %110 = math.exp %109 : vector<8x50xf32>
    %cst_39 = arith.constant 1.000000e+00 : f32
    %111 = vector.broadcast %cst_39 : f32 to vector<8x50xf32>
    %112 = arith.addf %111, %110 : vector<8x50xf32>
    %113 = arith.divf %111, %112 : vector<8x50xf32>
    %114 = vector.extract_strided_slice %107 {offsets = [0, 64], sizes = [8, 50], strides = [1, 1]} : vector<8x256xf32> to vector<8x50xf32>
    %115 = arith.negf %114 : vector<8x50xf32>
    %116 = math.exp %115 : vector<8x50xf32>
    %cst_40 = arith.constant 1.000000e+00 : f32
    %117 = vector.broadcast %cst_40 : f32 to vector<8x50xf32>
    %118 = arith.addf %117, %116 : vector<8x50xf32>
    %119 = arith.divf %117, %118 : vector<8x50xf32>
    %120 = vector.extract_strided_slice %107 {offsets = [0, 128], sizes = [8, 50], strides = [1, 1]} : vector<8x256xf32> to vector<8x50xf32>
    %121 = math.tanh %120 : vector<8x50xf32>
    %122 = vector.extract_strided_slice %107 {offsets = [0, 192], sizes = [8, 50], strides = [1, 1]} : vector<8x256xf32> to vector<8x50xf32>
    %123 = arith.negf %122 : vector<8x50xf32>
    %124 = math.exp %123 : vector<8x50xf32>
    %cst_41 = arith.constant 1.000000e+00 : f32
    %125 = vector.broadcast %cst_41 : f32 to vector<8x50xf32>
    %126 = arith.addf %125, %124 : vector<8x50xf32>
    %127 = arith.divf %125, %126 : vector<8x50xf32>
    %128 = arith.mulf %119, %72 : vector<8x50xf32>
    %129 = arith.mulf %113, %121 : vector<8x50xf32>
    %130 = arith.addf %128, %129 : vector<8x50xf32>
    %131 = math.tanh %130 : vector<8x50xf32>
    %132 = arith.mulf %127, %131 : vector<8x50xf32>
    %cst_42 = arith.constant dense<0.000000e+00> : vector<8x128xf32>
    %133 = tpu.matmul %74, %4, %cst_42 {dimension_numbers = #tpu.dot_dimension_numbers<[1], [0], [0], [1], [0, 0, 1, 1], [], []>} : vector<8x50xf32>, vector<50x128xf32>, vector<8x128xf32> -> vector<8x128xf32>
    %134 = vector.broadcast %6 : vector<1x128xf32> to vector<8x128xf32>
    %135 = arith.addf %133, %134 : vector<8x128xf32>
    %cst_43 = arith.constant dense<0.000000e+00> : vector<8x128xf32>
    %136 = tpu.matmul %104, %5, %cst_43 {dimension_numbers = #tpu.dot_dimension_numbers<[1], [0], [0], [1], [0, 0, 1, 1], [], []>} : vector<8x25xf32>, vector<25x128xf32>, vector<8x128xf32> -> vector<8x128xf32>
    %137 = arith.addf %135, %136 : vector<8x128xf32>
    %138 = vector.extract_strided_slice %137 {offsets = [0, 0], sizes = [8, 25], strides = [1, 1]} : vector<8x128xf32> to vector<8x25xf32>
    %139 = arith.negf %138 : vector<8x25xf32>
    %140 = math.exp %139 : vector<8x25xf32>
    %cst_44 = arith.constant 1.000000e+00 : f32
    %141 = vector.broadcast %cst_44 : f32 to vector<8x25xf32>
    %142 = arith.addf %141, %140 : vector<8x25xf32>
    %143 = arith.divf %141, %142 : vector<8x25xf32>
    %144 = vector.extract_strided_slice %137 {offsets = [0, 32], sizes = [8, 25], strides = [1, 1]} : vector<8x128xf32> to vector<8x25xf32>
    %145 = arith.negf %144 : vector<8x25xf32>
    %146 = math.exp %145 : vector<8x25xf32>
    %cst_45 = arith.constant 1.000000e+00 : f32
    %147 = vector.broadcast %cst_45 : f32 to vector<8x25xf32>
    %148 = arith.addf %147, %146 : vector<8x25xf32>
    %149 = arith.divf %147, %148 : vector<8x25xf32>
    %150 = vector.extract_strided_slice %137 {offsets = [0, 64], sizes = [8, 25], strides = [1, 1]} : vector<8x128xf32> to vector<8x25xf32>
    %151 = math.tanh %150 : vector<8x25xf32>
    %152 = vector.extract_strided_slice %137 {offsets = [0, 96], sizes = [8, 25], strides = [1, 1]} : vector<8x128xf32> to vector<8x25xf32>
    %153 = arith.negf %152 : vector<8x25xf32>
    %154 = math.exp %153 : vector<8x25xf32>
    %cst_46 = arith.constant 1.000000e+00 : f32
    %155 = vector.broadcast %cst_46 : f32 to vector<8x25xf32>
    %156 = arith.addf %155, %154 : vector<8x25xf32>
    %157 = arith.divf %155, %156 : vector<8x25xf32>
    %158 = arith.mulf %149, %102 : vector<8x25xf32>
    %159 = arith.mulf %143, %151 : vector<8x25xf32>
    %160 = arith.addf %158, %159 : vector<8x25xf32>
    %161 = math.tanh %160 : vector<8x25xf32>
    %162 = arith.mulf %157, %161 : vector<8x25xf32>
    %cst_47 = arith.constant dense<0.000000e+00> : vector<8x128xf32>
    %163 = tpu.matmul %104, %7, %cst_47 {dimension_numbers = #tpu.dot_dimension_numbers<[1], [0], [0], [1], [0, 0, 1, 1], [], []>} : vector<8x25xf32>, vector<25x128xf32>, vector<8x128xf32> -> vector<8x128xf32>
    %164 = vector.broadcast %9 : vector<1x128xf32> to vector<8x128xf32>
    %165 = arith.addf %163, %164 : vector<8x128xf32>
    %cst_48 = arith.constant dense<0.000000e+00> : vector<8x128xf32>
    %166 = tpu.matmul %17, %8, %cst_48 {dimension_numbers = #tpu.dot_dimension_numbers<[1], [0], [0], [1], [0, 0, 1, 1], [], []>} : vector<8x10xf32>, vector<10x128xf32>, vector<8x128xf32> -> vector<8x128xf32>
    %167 = arith.addf %165, %166 : vector<8x128xf32>
    %168 = vector.extract_strided_slice %167 {offsets = [0, 0], sizes = [8, 10], strides = [1, 1]} : vector<8x128xf32> to vector<8x10xf32>
    %169 = arith.negf %168 : vector<8x10xf32>
    %170 = math.exp %169 : vector<8x10xf32>
    %cst_49 = arith.constant 1.000000e+00 : f32
    %171 = vector.broadcast %cst_49 : f32 to vector<8x10xf32>
    %172 = arith.addf %171, %170 : vector<8x10xf32>
    %173 = arith.divf %171, %172 : vector<8x10xf32>
    %174 = vector.extract_strided_slice %167 {offsets = [0, 32], sizes = [8, 10], strides = [1, 1]} : vector<8x128xf32> to vector<8x10xf32>
    %175 = arith.negf %174 : vector<8x10xf32>
    %176 = math.exp %175 : vector<8x10xf32>
    %cst_50 = arith.constant 1.000000e+00 : f32
    %177 = vector.broadcast %cst_50 : f32 to vector<8x10xf32>
    %178 = arith.addf %177, %176 : vector<8x10xf32>
    %179 = arith.divf %177, %178 : vector<8x10xf32>
    %180 = vector.extract_strided_slice %167 {offsets = [0, 64], sizes = [8, 10], strides = [1, 1]} : vector<8x128xf32> to vector<8x10xf32>
    %181 = math.tanh %180 : vector<8x10xf32>
    %182 = vector.extract_strided_slice %167 {offsets = [0, 96], sizes = [8, 10], strides = [1, 1]} : vector<8x128xf32> to vector<8x10xf32>
    %183 = arith.negf %182 : vector<8x10xf32>
    %184 = math.exp %183 : vector<8x10xf32>
    %cst_51 = arith.constant 1.000000e+00 : f32
    %185 = vector.broadcast %cst_51 : f32 to vector<8x10xf32>
    %186 = arith.addf %185, %184 : vector<8x10xf32>
    %187 = arith.divf %185, %186 : vector<8x10xf32>
    %188 = arith.mulf %179, %18 : vector<8x10xf32>
    %189 = arith.mulf %173, %181 : vector<8x10xf32>
    %190 = arith.addf %188, %189 : vector<8x10xf32>
    %191 = math.tanh %190 : vector<8x10xf32>
    %192 = arith.mulf %187, %191 : vector<8x10xf32>
    %c0_52 = arith.constant 0 : index
    %c0_53 = arith.constant 0 : index
    %193 = vector.load %arg13[%c0_52, %c0_53] : memref<64x10xf32, #tpu.memory_space<vmem>>, vector<8x10xf32>
    tpu.vector_store %arg13[%c0_52, %c0_53], %192 {strides = array<i32>} : memref<64x10xf32, #tpu.memory_space<vmem>>, vector<8x10xf32>,
    %194 = vector.extract_strided_slice %12 {offsets = [24, 0], sizes = [8, 256], strides = [1, 1]} : vector<64x256xf32> to vector<8x256xf32>
    %cst_54 = arith.constant dense<0.000000e+00> : vector<8x256xf32>
    %195 = tpu.matmul %132, %2, %cst_54 {dimension_numbers = #tpu.dot_dimension_numbers<[1], [0], [0], [1], [0, 0, 1, 1], [], []>} : vector<8x50xf32>, vector<50x256xf32>, vector<8x256xf32> -> vector<8x256xf32>
    %196 = arith.addf %194, %195 : vector<8x256xf32>
    %197 = vector.extract_strided_slice %196 {offsets = [0, 0], sizes = [8, 50], strides = [1, 1]} : vector<8x256xf32> to vector<8x50xf32>
    %198 = arith.negf %197 : vector<8x50xf32>
    %199 = math.exp %198 : vector<8x50xf32>
    %cst_55 = arith.constant 1.000000e+00 : f32
    %200 = vector.broadcast %cst_55 : f32 to vector<8x50xf32>
    %201 = arith.addf %200, %199 : vector<8x50xf32>
    %202 = arith.divf %200, %201 : vector<8x50xf32>
    %203 = vector.extract_strided_slice %196 {offsets = [0, 64], sizes = [8, 50], strides = [1, 1]} : vector<8x256xf32> to vector<8x50xf32>
    %204 = arith.negf %203 : vector<8x50xf32>
    %205 = math.exp %204 : vector<8x50xf32>
    %cst_56 = arith.constant 1.000000e+00 : f32
    %206 = vector.broadcast %cst_56 : f32 to vector<8x50xf32>
    %207 = arith.addf %206, %205 : vector<8x50xf32>
    %208 = arith.divf %206, %207 : vector<8x50xf32>
    %209 = vector.extract_strided_slice %196 {offsets = [0, 128], sizes = [8, 50], strides = [1, 1]} : vector<8x256xf32> to vector<8x50xf32>
    %210 = math.tanh %209 : vector<8x50xf32>
    %211 = vector.extract_strided_slice %196 {offsets = [0, 192], sizes = [8, 50], strides = [1, 1]} : vector<8x256xf32> to vector<8x50xf32>
    %212 = arith.negf %211 : vector<8x50xf32>
    %213 = math.exp %212 : vector<8x50xf32>
    %cst_57 = arith.constant 1.000000e+00 : f32
    %214 = vector.broadcast %cst_57 : f32 to vector<8x50xf32>
    %215 = arith.addf %214, %213 : vector<8x50xf32>
    %216 = arith.divf %214, %215 : vector<8x50xf32>
    %217 = arith.mulf %208, %130 : vector<8x50xf32>
    %218 = arith.mulf %202, %210 : vector<8x50xf32>
    %219 = arith.addf %217, %218 : vector<8x50xf32>
    %220 = math.tanh %219 : vector<8x50xf32>
    %221 = arith.mulf %216, %220 : vector<8x50xf32>
    %cst_58 = arith.constant dense<0.000000e+00> : vector<8x128xf32>
    %222 = tpu.matmul %132, %4, %cst_58 {dimension_numbers = #tpu.dot_dimension_numbers<[1], [0], [0], [1], [0, 0, 1, 1], [], []>} : vector<8x50xf32>, vector<50x128xf32>, vector<8x128xf32> -> vector<8x128xf32>
    %223 = vector.broadcast %6 : vector<1x128xf32> to vector<8x128xf32>
    %224 = arith.addf %222, %223 : vector<8x128xf32>
    %cst_59 = arith.constant dense<0.000000e+00> : vector<8x128xf32>
    %225 = tpu.matmul %162, %5, %cst_59 {dimension_numbers = #tpu.dot_dimension_numbers<[1], [0], [0], [1], [0, 0, 1, 1], [], []>} : vector<8x25xf32>, vector<25x128xf32>, vector<8x128xf32> -> vector<8x128xf32>
    %226 = arith.addf %224, %225 : vector<8x128xf32>
    %227 = vector.extract_strided_slice %226 {offsets = [0, 0], sizes = [8, 25], strides = [1, 1]} : vector<8x128xf32> to vector<8x25xf32>
    %228 = arith.negf %227 : vector<8x25xf32>
    %229 = math.exp %228 : vector<8x25xf32>
    %cst_60 = arith.constant 1.000000e+00 : f32
    %230 = vector.broadcast %cst_60 : f32 to vector<8x25xf32>
    %231 = arith.addf %230, %229 : vector<8x25xf32>
    %232 = arith.divf %230, %231 : vector<8x25xf32>
    %233 = vector.extract_strided_slice %226 {offsets = [0, 32], sizes = [8, 25], strides = [1, 1]} : vector<8x128xf32> to vector<8x25xf32>
    %234 = arith.negf %233 : vector<8x25xf32>
    %235 = math.exp %234 : vector<8x25xf32>
    %cst_61 = arith.constant 1.000000e+00 : f32
    %236 = vector.broadcast %cst_61 : f32 to vector<8x25xf32>
    %237 = arith.addf %236, %235 : vector<8x25xf32>
    %238 = arith.divf %236, %237 : vector<8x25xf32>
    %239 = vector.extract_strided_slice %226 {offsets = [0, 64], sizes = [8, 25], strides = [1, 1]} : vector<8x128xf32> to vector<8x25xf32>
    %240 = math.tanh %239 : vector<8x25xf32>
    %241 = vector.extract_strided_slice %226 {offsets = [0, 96], sizes = [8, 25], strides = [1, 1]} : vector<8x128xf32> to vector<8x25xf32>
    %242 = arith.negf %241 : vector<8x25xf32>
    %243 = math.exp %242 : vector<8x25xf32>
    %cst_62 = arith.constant 1.000000e+00 : f32
    %244 = vector.broadcast %cst_62 : f32 to vector<8x25xf32>
    %245 = arith.addf %244, %243 : vector<8x25xf32>
    %246 = arith.divf %244, %245 : vector<8x25xf32>
    %247 = arith.mulf %238, %160 : vector<8x25xf32>
    %248 = arith.mulf %232, %240 : vector<8x25xf32>
    %249 = arith.addf %247, %248 : vector<8x25xf32>
    %250 = math.tanh %249 : vector<8x25xf32>
    %251 = arith.mulf %246, %250 : vector<8x25xf32>
    %cst_63 = arith.constant dense<0.000000e+00> : vector<8x128xf32>
    %252 = tpu.matmul %162, %7, %cst_63 {dimension_numbers = #tpu.dot_dimension_numbers<[1], [0], [0], [1], [0, 0, 1, 1], [], []>} : vector<8x25xf32>, vector<25x128xf32>, vector<8x128xf32> -> vector<8x128xf32>
    %253 = vector.broadcast %9 : vector<1x128xf32> to vector<8x128xf32>
    %254 = arith.addf %252, %253 : vector<8x128xf32>
    %cst_64 = arith.constant dense<0.000000e+00> : vector<8x128xf32>
    %255 = tpu.matmul %192, %8, %cst_64 {dimension_numbers = #tpu.dot_dimension_numbers<[1], [0], [0], [1], [0, 0, 1, 1], [], []>} : vector<8x10xf32>, vector<10x128xf32>, vector<8x128xf32> -> vector<8x128xf32>
    %256 = arith.addf %254, %255 : vector<8x128xf32>
    %257 = vector.extract_strided_slice %256 {offsets = [0, 0], sizes = [8, 10], strides = [1, 1]} : vector<8x128xf32> to vector<8x10xf32>
    %258 = arith.negf %257 : vector<8x10xf32>
    %259 = math.exp %258 : vector<8x10xf32>
    %cst_65 = arith.constant 1.000000e+00 : f32
    %260 = vector.broadcast %cst_65 : f32 to vector<8x10xf32>
    %261 = arith.addf %260, %259 : vector<8x10xf32>
    %262 = arith.divf %260, %261 : vector<8x10xf32>
    %263 = vector.extract_strided_slice %256 {offsets = [0, 32], sizes = [8, 10], strides = [1, 1]} : vector<8x128xf32> to vector<8x10xf32>
    %264 = arith.negf %263 : vector<8x10xf32>
    %265 = math.exp %264 : vector<8x10xf32>
    %cst_66 = arith.constant 1.000000e+00 : f32
    %266 = vector.broadcast %cst_66 : f32 to vector<8x10xf32>
    %267 = arith.addf %266, %265 : vector<8x10xf32>
    %268 = arith.divf %266, %267 : vector<8x10xf32>
    %269 = vector.extract_strided_slice %256 {offsets = [0, 64], sizes = [8, 10], strides = [1, 1]} : vector<8x128xf32> to vector<8x10xf32>
    %270 = math.tanh %269 : vector<8x10xf32>
    %271 = vector.extract_strided_slice %256 {offsets = [0, 96], sizes = [8, 10], strides = [1, 1]} : vector<8x128xf32> to vector<8x10xf32>
    %272 = arith.negf %271 : vector<8x10xf32>
    %273 = math.exp %272 : vector<8x10xf32>
    %cst_67 = arith.constant 1.000000e+00 : f32
    %274 = vector.broadcast %cst_67 : f32 to vector<8x10xf32>
    %275 = arith.addf %274, %273 : vector<8x10xf32>
    %276 = arith.divf %274, %275 : vector<8x10xf32>
    %277 = arith.mulf %268, %190 : vector<8x10xf32>
    %278 = arith.mulf %262, %270 : vector<8x10xf32>
    %279 = arith.addf %277, %278 : vector<8x10xf32>
    %280 = math.tanh %279 : vector<8x10xf32>
    %281 = arith.mulf %276, %280 : vector<8x10xf32>
    %c8 = arith.constant 8 : index
    %c0_68 = arith.constant 0 : index
    %282 = vector.load %arg13[%c8, %c0_68] : memref<64x10xf32, #tpu.memory_space<vmem>>, vector<8x10xf32>
    tpu.vector_store %arg13[%c8, %c0_68], %281 {strides = array<i32>} : memref<64x10xf32, #tpu.memory_space<vmem>>, vector<8x10xf32>,
    %283 = vector.extract_strided_slice %12 {offsets = [32, 0], sizes = [8, 256], strides = [1, 1]} : vector<64x256xf32> to vector<8x256xf32>
    %cst_69 = arith.constant dense<0.000000e+00> : vector<8x256xf32>
    %284 = tpu.matmul %221, %2, %cst_69 {dimension_numbers = #tpu.dot_dimension_numbers<[1], [0], [0], [1], [0, 0, 1, 1], [], []>} : vector<8x50xf32>, vector<50x256xf32>, vector<8x256xf32> -> vector<8x256xf32>
    %285 = arith.addf %283, %284 : vector<8x256xf32>
    %286 = vector.extract_strided_slice %285 {offsets = [0, 0], sizes = [8, 50], strides = [1, 1]} : vector<8x256xf32> to vector<8x50xf32>
    %287 = arith.negf %286 : vector<8x50xf32>
    %288 = math.exp %287 : vector<8x50xf32>
    %cst_70 = arith.constant 1.000000e+00 : f32
    %289 = vector.broadcast %cst_70 : f32 to vector<8x50xf32>
    %290 = arith.addf %289, %288 : vector<8x50xf32>
    %291 = arith.divf %289, %290 : vector<8x50xf32>
    %292 = vector.extract_strided_slice %285 {offsets = [0, 64], sizes = [8, 50], strides = [1, 1]} : vector<8x256xf32> to vector<8x50xf32>
    %293 = arith.negf %292 : vector<8x50xf32>
    %294 = math.exp %293 : vector<8x50xf32>
    %cst_71 = arith.constant 1.000000e+00 : f32
    %295 = vector.broadcast %cst_71 : f32 to vector<8x50xf32>
    %296 = arith.addf %295, %294 : vector<8x50xf32>
    %297 = arith.divf %295, %296 : vector<8x50xf32>
    %298 = vector.extract_strided_slice %285 {offsets = [0, 128], sizes = [8, 50], strides = [1, 1]} : vector<8x256xf32> to vector<8x50xf32>
    %299 = math.tanh %298 : vector<8x50xf32>
    %300 = vector.extract_strided_slice %285 {offsets = [0, 192], sizes = [8, 50], strides = [1, 1]} : vector<8x256xf32> to vector<8x50xf32>
    %301 = arith.negf %300 : vector<8x50xf32>
    %302 = math.exp %301 : vector<8x50xf32>
    %cst_72 = arith.constant 1.000000e+00 : f32
    %303 = vector.broadcast %cst_72 : f32 to vector<8x50xf32>
    %304 = arith.addf %303, %302 : vector<8x50xf32>
    %305 = arith.divf %303, %304 : vector<8x50xf32>
    %306 = arith.mulf %297, %219 : vector<8x50xf32>
    %307 = arith.mulf %291, %299 : vector<8x50xf32>
    %308 = arith.addf %306, %307 : vector<8x50xf32>
    %309 = math.tanh %308 : vector<8x50xf32>
    %310 = arith.mulf %305, %309 : vector<8x50xf32>
    %cst_73 = arith.constant dense<0.000000e+00> : vector<8x128xf32>
    %311 = tpu.matmul %221, %4, %cst_73 {dimension_numbers = #tpu.dot_dimension_numbers<[1], [0], [0], [1], [0, 0, 1, 1], [], []>} : vector<8x50xf32>, vector<50x128xf32>, vector<8x128xf32> -> vector<8x128xf32>
    %312 = vector.broadcast %6 : vector<1x128xf32> to vector<8x128xf32>
    %313 = arith.addf %311, %312 : vector<8x128xf32>
    %cst_74 = arith.constant dense<0.000000e+00> : vector<8x128xf32>
    %314 = tpu.matmul %251, %5, %cst_74 {dimension_numbers = #tpu.dot_dimension_numbers<[1], [0], [0], [1], [0, 0, 1, 1], [], []>} : vector<8x25xf32>, vector<25x128xf32>, vector<8x128xf32> -> vector<8x128xf32>
    %315 = arith.addf %313, %314 : vector<8x128xf32>
    %316 = vector.extract_strided_slice %315 {offsets = [0, 0], sizes = [8, 25], strides = [1, 1]} : vector<8x128xf32> to vector<8x25xf32>
    %317 = arith.negf %316 : vector<8x25xf32>
    %318 = math.exp %317 : vector<8x25xf32>
    %cst_75 = arith.constant 1.000000e+00 : f32
    %319 = vector.broadcast %cst_75 : f32 to vector<8x25xf32>
    %320 = arith.addf %319, %318 : vector<8x25xf32>
    %321 = arith.divf %319, %320 : vector<8x25xf32>
    %322 = vector.extract_strided_slice %315 {offsets = [0, 32], sizes = [8, 25], strides = [1, 1]} : vector<8x128xf32> to vector<8x25xf32>
    %323 = arith.negf %322 : vector<8x25xf32>
    %324 = math.exp %323 : vector<8x25xf32>
    %cst_76 = arith.constant 1.000000e+00 : f32
    %325 = vector.broadcast %cst_76 : f32 to vector<8x25xf32>
    %326 = arith.addf %325, %324 : vector<8x25xf32>
    %327 = arith.divf %325, %326 : vector<8x25xf32>
    %328 = vector.extract_strided_slice %315 {offsets = [0, 64], sizes = [8, 25], strides = [1, 1]} : vector<8x128xf32> to vector<8x25xf32>
    %329 = math.tanh %328 : vector<8x25xf32>
    %330 = vector.extract_strided_slice %315 {offsets = [0, 96], sizes = [8, 25], strides = [1, 1]} : vector<8x128xf32> to vector<8x25xf32>
    %331 = arith.negf %330 : vector<8x25xf32>
    %332 = math.exp %331 : vector<8x25xf32>
    %cst_77 = arith.constant 1.000000e+00 : f32
    %333 = vector.broadcast %cst_77 : f32 to vector<8x25xf32>
    %334 = arith.addf %333, %332 : vector<8x25xf32>
    %335 = arith.divf %333, %334 : vector<8x25xf32>
    %336 = arith.mulf %327, %249 : vector<8x25xf32>
    %337 = arith.mulf %321, %329 : vector<8x25xf32>
    %338 = arith.addf %336, %337 : vector<8x25xf32>
    %339 = math.tanh %338 : vector<8x25xf32>
    %340 = arith.mulf %335, %339 : vector<8x25xf32>
    %cst_78 = arith.constant dense<0.000000e+00> : vector<8x128xf32>
    %341 = tpu.matmul %251, %7, %cst_78 {dimension_numbers = #tpu.dot_dimension_numbers<[1], [0], [0], [1], [0, 0, 1, 1], [], []>} : vector<8x25xf32>, vector<25x128xf32>, vector<8x128xf32> -> vector<8x128xf32>
    %342 = vector.broadcast %9 : vector<1x128xf32> to vector<8x128xf32>
    %343 = arith.addf %341, %342 : vector<8x128xf32>
    %cst_79 = arith.constant dense<0.000000e+00> : vector<8x128xf32>
    %344 = tpu.matmul %281, %8, %cst_79 {dimension_numbers = #tpu.dot_dimension_numbers<[1], [0], [0], [1], [0, 0, 1, 1], [], []>} : vector<8x10xf32>, vector<10x128xf32>, vector<8x128xf32> -> vector<8x128xf32>
    %345 = arith.addf %343, %344 : vector<8x128xf32>
    %346 = vector.extract_strided_slice %345 {offsets = [0, 0], sizes = [8, 10], strides = [1, 1]} : vector<8x128xf32> to vector<8x10xf32>
    %347 = arith.negf %346 : vector<8x10xf32>
    %348 = math.exp %347 : vector<8x10xf32>
    %cst_80 = arith.constant 1.000000e+00 : f32
    %349 = vector.broadcast %cst_80 : f32 to vector<8x10xf32>
    %350 = arith.addf %349, %348 : vector<8x10xf32>
    %351 = arith.divf %349, %350 : vector<8x10xf32>
    %352 = vector.extract_strided_slice %345 {offsets = [0, 32], sizes = [8, 10], strides = [1, 1]} : vector<8x128xf32> to vector<8x10xf32>
    %353 = arith.negf %352 : vector<8x10xf32>
    %354 = math.exp %353 : vector<8x10xf32>
    %cst_81 = arith.constant 1.000000e+00 : f32
    %355 = vector.broadcast %cst_81 : f32 to vector<8x10xf32>
    %356 = arith.addf %355, %354 : vector<8x10xf32>
    %357 = arith.divf %355, %356 : vector<8x10xf32>
    %358 = vector.extract_strided_slice %345 {offsets = [0, 64], sizes = [8, 10], strides = [1, 1]} : vector<8x128xf32> to vector<8x10xf32>
    %359 = math.tanh %358 : vector<8x10xf32>
    %360 = vector.extract_strided_slice %345 {offsets = [0, 96], sizes = [8, 10], strides = [1, 1]} : vector<8x128xf32> to vector<8x10xf32>
    %361 = arith.negf %360 : vector<8x10xf32>
    %362 = math.exp %361 : vector<8x10xf32>
    %cst_82 = arith.constant 1.000000e+00 : f32
    %363 = vector.broadcast %cst_82 : f32 to vector<8x10xf32>
    %364 = arith.addf %363, %362 : vector<8x10xf32>
    %365 = arith.divf %363, %364 : vector<8x10xf32>
    %366 = arith.mulf %357, %279 : vector<8x10xf32>
    %367 = arith.mulf %351, %359 : vector<8x10xf32>
    %368 = arith.addf %366, %367 : vector<8x10xf32>
    %369 = math.tanh %368 : vector<8x10xf32>
    %370 = arith.mulf %365, %369 : vector<8x10xf32>
    %c16 = arith.constant 16 : index
    %c0_83 = arith.constant 0 : index
    %371 = vector.load %arg13[%c16, %c0_83] : memref<64x10xf32, #tpu.memory_space<vmem>>, vector<8x10xf32>
    tpu.vector_store %arg13[%c16, %c0_83], %370 {strides = array<i32>} : memref<64x10xf32, #tpu.memory_space<vmem>>, vector<8x10xf32>,
    %372 = vector.extract_strided_slice %12 {offsets = [40, 0], sizes = [8, 256], strides = [1, 1]} : vector<64x256xf32> to vector<8x256xf32>
    %cst_84 = arith.constant dense<0.000000e+00> : vector<8x256xf32>
    %373 = tpu.matmul %310, %2, %cst_84 {dimension_numbers = #tpu.dot_dimension_numbers<[1], [0], [0], [1], [0, 0, 1, 1], [], []>} : vector<8x50xf32>, vector<50x256xf32>, vector<8x256xf32> -> vector<8x256xf32>
    %374 = arith.addf %372, %373 : vector<8x256xf32>
    %375 = vector.extract_strided_slice %374 {offsets = [0, 0], sizes = [8, 50], strides = [1, 1]} : vector<8x256xf32> to vector<8x50xf32>
    %376 = arith.negf %375 : vector<8x50xf32>
    %377 = math.exp %376 : vector<8x50xf32>
    %cst_85 = arith.constant 1.000000e+00 : f32
    %378 = vector.broadcast %cst_85 : f32 to vector<8x50xf32>
    %379 = arith.addf %378, %377 : vector<8x50xf32>
    %380 = arith.divf %378, %379 : vector<8x50xf32>
    %381 = vector.extract_strided_slice %374 {offsets = [0, 64], sizes = [8, 50], strides = [1, 1]} : vector<8x256xf32> to vector<8x50xf32>
    %382 = arith.negf %381 : vector<8x50xf32>
    %383 = math.exp %382 : vector<8x50xf32>
    %cst_86 = arith.constant 1.000000e+00 : f32
    %384 = vector.broadcast %cst_86 : f32 to vector<8x50xf32>
    %385 = arith.addf %384, %383 : vector<8x50xf32>
    %386 = arith.divf %384, %385 : vector<8x50xf32>
    %387 = vector.extract_strided_slice %374 {offsets = [0, 128], sizes = [8, 50], strides = [1, 1]} : vector<8x256xf32> to vector<8x50xf32>
    %388 = math.tanh %387 : vector<8x50xf32>
    %389 = vector.extract_strided_slice %374 {offsets = [0, 192], sizes = [8, 50], strides = [1, 1]} : vector<8x256xf32> to vector<8x50xf32>
    %390 = arith.negf %389 : vector<8x50xf32>
    %391 = math.exp %390 : vector<8x50xf32>
    %cst_87 = arith.constant 1.000000e+00 : f32
    %392 = vector.broadcast %cst_87 : f32 to vector<8x50xf32>
    %393 = arith.addf %392, %391 : vector<8x50xf32>
    %394 = arith.divf %392, %393 : vector<8x50xf32>
    %395 = arith.mulf %386, %308 : vector<8x50xf32>
    %396 = arith.mulf %380, %388 : vector<8x50xf32>
    %397 = arith.addf %395, %396 : vector<8x50xf32>
    %398 = math.tanh %397 : vector<8x50xf32>
    %399 = arith.mulf %394, %398 : vector<8x50xf32>
    %cst_88 = arith.constant dense<0.000000e+00> : vector<8x128xf32>
    %400 = tpu.matmul %310, %4, %cst_88 {dimension_numbers = #tpu.dot_dimension_numbers<[1], [0], [0], [1], [0, 0, 1, 1], [], []>} : vector<8x50xf32>, vector<50x128xf32>, vector<8x128xf32> -> vector<8x128xf32>
    %401 = vector.broadcast %6 : vector<1x128xf32> to vector<8x128xf32>
    %402 = arith.addf %400, %401 : vector<8x128xf32>
    %cst_89 = arith.constant dense<0.000000e+00> : vector<8x128xf32>
    %403 = tpu.matmul %340, %5, %cst_89 {dimension_numbers = #tpu.dot_dimension_numbers<[1], [0], [0], [1], [0, 0, 1, 1], [], []>} : vector<8x25xf32>, vector<25x128xf32>, vector<8x128xf32> -> vector<8x128xf32>
    %404 = arith.addf %402, %403 : vector<8x128xf32>
    %405 = vector.extract_strided_slice %404 {offsets = [0, 0], sizes = [8, 25], strides = [1, 1]} : vector<8x128xf32> to vector<8x25xf32>
    %406 = arith.negf %405 : vector<8x25xf32>
    %407 = math.exp %406 : vector<8x25xf32>
    %cst_90 = arith.constant 1.000000e+00 : f32
    %408 = vector.broadcast %cst_90 : f32 to vector<8x25xf32>
    %409 = arith.addf %408, %407 : vector<8x25xf32>
    %410 = arith.divf %408, %409 : vector<8x25xf32>
    %411 = vector.extract_strided_slice %404 {offsets = [0, 32], sizes = [8, 25], strides = [1, 1]} : vector<8x128xf32> to vector<8x25xf32>
    %412 = arith.negf %411 : vector<8x25xf32>
    %413 = math.exp %412 : vector<8x25xf32>
    %cst_91 = arith.constant 1.000000e+00 : f32
    %414 = vector.broadcast %cst_91 : f32 to vector<8x25xf32>
    %415 = arith.addf %414, %413 : vector<8x25xf32>
    %416 = arith.divf %414, %415 : vector<8x25xf32>
    %417 = vector.extract_strided_slice %404 {offsets = [0, 64], sizes = [8, 25], strides = [1, 1]} : vector<8x128xf32> to vector<8x25xf32>
    %418 = math.tanh %417 : vector<8x25xf32>
    %419 = vector.extract_strided_slice %404 {offsets = [0, 96], sizes = [8, 25], strides = [1, 1]} : vector<8x128xf32> to vector<8x25xf32>
    %420 = arith.negf %419 : vector<8x25xf32>
    %421 = math.exp %420 : vector<8x25xf32>
    %cst_92 = arith.constant 1.000000e+00 : f32
    %422 = vector.broadcast %cst_92 : f32 to vector<8x25xf32>
    %423 = arith.addf %422, %421 : vector<8x25xf32>
    %424 = arith.divf %422, %423 : vector<8x25xf32>
    %425 = arith.mulf %416, %338 : vector<8x25xf32>
    %426 = arith.mulf %410, %418 : vector<8x25xf32>
    %427 = arith.addf %425, %426 : vector<8x25xf32>
    %428 = math.tanh %427 : vector<8x25xf32>
    %429 = arith.mulf %424, %428 : vector<8x25xf32>
    %cst_93 = arith.constant dense<0.000000e+00> : vector<8x128xf32>
    %430 = tpu.matmul %340, %7, %cst_93 {dimension_numbers = #tpu.dot_dimension_numbers<[1], [0], [0], [1], [0, 0, 1, 1], [], []>} : vector<8x25xf32>, vector<25x128xf32>, vector<8x128xf32> -> vector<8x128xf32>
    %431 = vector.broadcast %9 : vector<1x128xf32> to vector<8x128xf32>
    %432 = arith.addf %430, %431 : vector<8x128xf32>
    %cst_94 = arith.constant dense<0.000000e+00> : vector<8x128xf32>
    %433 = tpu.matmul %370, %8, %cst_94 {dimension_numbers = #tpu.dot_dimension_numbers<[1], [0], [0], [1], [0, 0, 1, 1], [], []>} : vector<8x10xf32>, vector<10x128xf32>, vector<8x128xf32> -> vector<8x128xf32>
    %434 = arith.addf %432, %433 : vector<8x128xf32>
    %435 = vector.extract_strided_slice %434 {offsets = [0, 0], sizes = [8, 10], strides = [1, 1]} : vector<8x128xf32> to vector<8x10xf32>
    %436 = arith.negf %435 : vector<8x10xf32>
    %437 = math.exp %436 : vector<8x10xf32>
    %cst_95 = arith.constant 1.000000e+00 : f32
    %438 = vector.broadcast %cst_95 : f32 to vector<8x10xf32>
    %439 = arith.addf %438, %437 : vector<8x10xf32>
    %440 = arith.divf %438, %439 : vector<8x10xf32>
    %441 = vector.extract_strided_slice %434 {offsets = [0, 32], sizes = [8, 10], strides = [1, 1]} : vector<8x128xf32> to vector<8x10xf32>
    %442 = arith.negf %441 : vector<8x10xf32>
    %443 = math.exp %442 : vector<8x10xf32>
    %cst_96 = arith.constant 1.000000e+00 : f32
    %444 = vector.broadcast %cst_96 : f32 to vector<8x10xf32>
    %445 = arith.addf %444, %443 : vector<8x10xf32>
    %446 = arith.divf %444, %445 : vector<8x10xf32>
    %447 = vector.extract_strided_slice %434 {offsets = [0, 64], sizes = [8, 10], strides = [1, 1]} : vector<8x128xf32> to vector<8x10xf32>
    %448 = math.tanh %447 : vector<8x10xf32>
    %449 = vector.extract_strided_slice %434 {offsets = [0, 96], sizes = [8, 10], strides = [1, 1]} : vector<8x128xf32> to vector<8x10xf32>
    %450 = arith.negf %449 : vector<8x10xf32>
    %451 = math.exp %450 : vector<8x10xf32>
    %cst_97 = arith.constant 1.000000e+00 : f32
    %452 = vector.broadcast %cst_97 : f32 to vector<8x10xf32>
    %453 = arith.addf %452, %451 : vector<8x10xf32>
    %454 = arith.divf %452, %453 : vector<8x10xf32>
    %455 = arith.mulf %446, %368 : vector<8x10xf32>
    %456 = arith.mulf %440, %448 : vector<8x10xf32>
    %457 = arith.addf %455, %456 : vector<8x10xf32>
    %458 = math.tanh %457 : vector<8x10xf32>
    %459 = arith.mulf %454, %458 : vector<8x10xf32>
    %c24 = arith.constant 24 : index
    %c0_98 = arith.constant 0 : index
    %460 = vector.load %arg13[%c24, %c0_98] : memref<64x10xf32, #tpu.memory_space<vmem>>, vector<8x10xf32>
    tpu.vector_store %arg13[%c24, %c0_98], %459 {strides = array<i32>} : memref<64x10xf32, #tpu.memory_space<vmem>>, vector<8x10xf32>,
    %461 = vector.extract_strided_slice %12 {offsets = [48, 0], sizes = [8, 256], strides = [1, 1]} : vector<64x256xf32> to vector<8x256xf32>
    %cst_99 = arith.constant dense<0.000000e+00> : vector<8x256xf32>
    %462 = tpu.matmul %399, %2, %cst_99 {dimension_numbers = #tpu.dot_dimension_numbers<[1], [0], [0], [1], [0, 0, 1, 1], [], []>} : vector<8x50xf32>, vector<50x256xf32>, vector<8x256xf32> -> vector<8x256xf32>
    %463 = arith.addf %461, %462 : vector<8x256xf32>
    %464 = vector.extract_strided_slice %463 {offsets = [0, 0], sizes = [8, 50], strides = [1, 1]} : vector<8x256xf32> to vector<8x50xf32>
    %465 = arith.negf %464 : vector<8x50xf32>
    %466 = math.exp %465 : vector<8x50xf32>
    %cst_100 = arith.constant 1.000000e+00 : f32
    %467 = vector.broadcast %cst_100 : f32 to vector<8x50xf32>
    %468 = arith.addf %467, %466 : vector<8x50xf32>
    %469 = arith.divf %467, %468 : vector<8x50xf32>
    %470 = vector.extract_strided_slice %463 {offsets = [0, 64], sizes = [8, 50], strides = [1, 1]} : vector<8x256xf32> to vector<8x50xf32>
    %471 = arith.negf %470 : vector<8x50xf32>
    %472 = math.exp %471 : vector<8x50xf32>
    %cst_101 = arith.constant 1.000000e+00 : f32
    %473 = vector.broadcast %cst_101 : f32 to vector<8x50xf32>
    %474 = arith.addf %473, %472 : vector<8x50xf32>
    %475 = arith.divf %473, %474 : vector<8x50xf32>
    %476 = vector.extract_strided_slice %463 {offsets = [0, 128], sizes = [8, 50], strides = [1, 1]} : vector<8x256xf32> to vector<8x50xf32>
    %477 = math.tanh %476 : vector<8x50xf32>
    %478 = vector.extract_strided_slice %463 {offsets = [0, 192], sizes = [8, 50], strides = [1, 1]} : vector<8x256xf32> to vector<8x50xf32>
    %479 = arith.negf %478 : vector<8x50xf32>
    %480 = math.exp %479 : vector<8x50xf32>
    %cst_102 = arith.constant 1.000000e+00 : f32
    %481 = vector.broadcast %cst_102 : f32 to vector<8x50xf32>
    %482 = arith.addf %481, %480 : vector<8x50xf32>
    %483 = arith.divf %481, %482 : vector<8x50xf32>
    %484 = arith.mulf %475, %397 : vector<8x50xf32>
    %485 = arith.mulf %469, %477 : vector<8x50xf32>
    %486 = arith.addf %484, %485 : vector<8x50xf32>
    %487 = math.tanh %486 : vector<8x50xf32>
    %488 = arith.mulf %483, %487 : vector<8x50xf32>
    %cst_103 = arith.constant dense<0.000000e+00> : vector<8x128xf32>
    %489 = tpu.matmul %399, %4, %cst_103 {dimension_numbers = #tpu.dot_dimension_numbers<[1], [0], [0], [1], [0, 0, 1, 1], [], []>} : vector<8x50xf32>, vector<50x128xf32>, vector<8x128xf32> -> vector<8x128xf32>
    %490 = vector.broadcast %6 : vector<1x128xf32> to vector<8x128xf32>
    %491 = arith.addf %489, %490 : vector<8x128xf32>
    %cst_104 = arith.constant dense<0.000000e+00> : vector<8x128xf32>
    %492 = tpu.matmul %429, %5, %cst_104 {dimension_numbers = #tpu.dot_dimension_numbers<[1], [0], [0], [1], [0, 0, 1, 1], [], []>} : vector<8x25xf32>, vector<25x128xf32>, vector<8x128xf32> -> vector<8x128xf32>
    %493 = arith.addf %491, %492 : vector<8x128xf32>
    %494 = vector.extract_strided_slice %493 {offsets = [0, 0], sizes = [8, 25], strides = [1, 1]} : vector<8x128xf32> to vector<8x25xf32>
    %495 = arith.negf %494 : vector<8x25xf32>
    %496 = math.exp %495 : vector<8x25xf32>
    %cst_105 = arith.constant 1.000000e+00 : f32
    %497 = vector.broadcast %cst_105 : f32 to vector<8x25xf32>
    %498 = arith.addf %497, %496 : vector<8x25xf32>
    %499 = arith.divf %497, %498 : vector<8x25xf32>
    %500 = vector.extract_strided_slice %493 {offsets = [0, 32], sizes = [8, 25], strides = [1, 1]} : vector<8x128xf32> to vector<8x25xf32>
    %501 = arith.negf %500 : vector<8x25xf32>
    %502 = math.exp %501 : vector<8x25xf32>
    %cst_106 = arith.constant 1.000000e+00 : f32
    %503 = vector.broadcast %cst_106 : f32 to vector<8x25xf32>
    %504 = arith.addf %503, %502 : vector<8x25xf32>
    %505 = arith.divf %503, %504 : vector<8x25xf32>
    %506 = vector.extract_strided_slice %493 {offsets = [0, 64], sizes = [8, 25], strides = [1, 1]} : vector<8x128xf32> to vector<8x25xf32>
    %507 = math.tanh %506 : vector<8x25xf32>
    %508 = vector.extract_strided_slice %493 {offsets = [0, 96], sizes = [8, 25], strides = [1, 1]} : vector<8x128xf32> to vector<8x25xf32>
    %509 = arith.negf %508 : vector<8x25xf32>
    %510 = math.exp %509 : vector<8x25xf32>
    %cst_107 = arith.constant 1.000000e+00 : f32
    %511 = vector.broadcast %cst_107 : f32 to vector<8x25xf32>
    %512 = arith.addf %511, %510 : vector<8x25xf32>
    %513 = arith.divf %511, %512 : vector<8x25xf32>
    %514 = arith.mulf %505, %427 : vector<8x25xf32>
    %515 = arith.mulf %499, %507 : vector<8x25xf32>
    %516 = arith.addf %514, %515 : vector<8x25xf32>
    %517 = math.tanh %516 : vector<8x25xf32>
    %518 = arith.mulf %513, %517 : vector<8x25xf32>
    %cst_108 = arith.constant dense<0.000000e+00> : vector<8x128xf32>
    %519 = tpu.matmul %429, %7, %cst_108 {dimension_numbers = #tpu.dot_dimension_numbers<[1], [0], [0], [1], [0, 0, 1, 1], [], []>} : vector<8x25xf32>, vector<25x128xf32>, vector<8x128xf32> -> vector<8x128xf32>
    %520 = vector.broadcast %9 : vector<1x128xf32> to vector<8x128xf32>
    %521 = arith.addf %519, %520 : vector<8x128xf32>
    %cst_109 = arith.constant dense<0.000000e+00> : vector<8x128xf32>
    %522 = tpu.matmul %459, %8, %cst_109 {dimension_numbers = #tpu.dot_dimension_numbers<[1], [0], [0], [1], [0, 0, 1, 1], [], []>} : vector<8x10xf32>, vector<10x128xf32>, vector<8x128xf32> -> vector<8x128xf32>
    %523 = arith.addf %521, %522 : vector<8x128xf32>
    %524 = vector.extract_strided_slice %523 {offsets = [0, 0], sizes = [8, 10], strides = [1, 1]} : vector<8x128xf32> to vector<8x10xf32>
    %525 = arith.negf %524 : vector<8x10xf32>
    %526 = math.exp %525 : vector<8x10xf32>
    %cst_110 = arith.constant 1.000000e+00 : f32
    %527 = vector.broadcast %cst_110 : f32 to vector<8x10xf32>
    %528 = arith.addf %527, %526 : vector<8x10xf32>
    %529 = arith.divf %527, %528 : vector<8x10xf32>
    %530 = vector.extract_strided_slice %523 {offsets = [0, 32], sizes = [8, 10], strides = [1, 1]} : vector<8x128xf32> to vector<8x10xf32>
    %531 = arith.negf %530 : vector<8x10xf32>
    %532 = math.exp %531 : vector<8x10xf32>
    %cst_111 = arith.constant 1.000000e+00 : f32
    %533 = vector.broadcast %cst_111 : f32 to vector<8x10xf32>
    %534 = arith.addf %533, %532 : vector<8x10xf32>
    %535 = arith.divf %533, %534 : vector<8x10xf32>
    %536 = vector.extract_strided_slice %523 {offsets = [0, 64], sizes = [8, 10], strides = [1, 1]} : vector<8x128xf32> to vector<8x10xf32>
    %537 = math.tanh %536 : vector<8x10xf32>
    %538 = vector.extract_strided_slice %523 {offsets = [0, 96], sizes = [8, 10], strides = [1, 1]} : vector<8x128xf32> to vector<8x10xf32>
    %539 = arith.negf %538 : vector<8x10xf32>
    %540 = math.exp %539 : vector<8x10xf32>
    %cst_112 = arith.constant 1.000000e+00 : f32
    %541 = vector.broadcast %cst_112 : f32 to vector<8x10xf32>
    %542 = arith.addf %541, %540 : vector<8x10xf32>
    %543 = arith.divf %541, %542 : vector<8x10xf32>
    %544 = arith.mulf %535, %457 : vector<8x10xf32>
    %545 = arith.mulf %529, %537 : vector<8x10xf32>
    %546 = arith.addf %544, %545 : vector<8x10xf32>
    %547 = math.tanh %546 : vector<8x10xf32>
    %548 = arith.mulf %543, %547 : vector<8x10xf32>
    %c32 = arith.constant 32 : index
    %c0_113 = arith.constant 0 : index
    %549 = vector.load %arg13[%c32, %c0_113] : memref<64x10xf32, #tpu.memory_space<vmem>>, vector<8x10xf32>
    tpu.vector_store %arg13[%c32, %c0_113], %548 {strides = array<i32>} : memref<64x10xf32, #tpu.memory_space<vmem>>, vector<8x10xf32>,
    %550 = vector.extract_strided_slice %12 {offsets = [56, 0], sizes = [8, 256], strides = [1, 1]} : vector<64x256xf32> to vector<8x256xf32>
    %cst_114 = arith.constant dense<0.000000e+00> : vector<8x256xf32>
    %551 = tpu.matmul %488, %2, %cst_114 {dimension_numbers = #tpu.dot_dimension_numbers<[1], [0], [0], [1], [0, 0, 1, 1], [], []>} : vector<8x50xf32>, vector<50x256xf32>, vector<8x256xf32> -> vector<8x256xf32>
    %552 = arith.addf %550, %551 : vector<8x256xf32>
    %553 = vector.extract_strided_slice %552 {offsets = [0, 0], sizes = [8, 50], strides = [1, 1]} : vector<8x256xf32> to vector<8x50xf32>
    %554 = arith.negf %553 : vector<8x50xf32>
    %555 = math.exp %554 : vector<8x50xf32>
    %cst_115 = arith.constant 1.000000e+00 : f32
    %556 = vector.broadcast %cst_115 : f32 to vector<8x50xf32>
    %557 = arith.addf %556, %555 : vector<8x50xf32>
    %558 = arith.divf %556, %557 : vector<8x50xf32>
    %559 = vector.extract_strided_slice %552 {offsets = [0, 64], sizes = [8, 50], strides = [1, 1]} : vector<8x256xf32> to vector<8x50xf32>
    %560 = arith.negf %559 : vector<8x50xf32>
    %561 = math.exp %560 : vector<8x50xf32>
    %cst_116 = arith.constant 1.000000e+00 : f32
    %562 = vector.broadcast %cst_116 : f32 to vector<8x50xf32>
    %563 = arith.addf %562, %561 : vector<8x50xf32>
    %564 = arith.divf %562, %563 : vector<8x50xf32>
    %565 = vector.extract_strided_slice %552 {offsets = [0, 128], sizes = [8, 50], strides = [1, 1]} : vector<8x256xf32> to vector<8x50xf32>
    %566 = math.tanh %565 : vector<8x50xf32>
    %567 = vector.extract_strided_slice %552 {offsets = [0, 192], sizes = [8, 50], strides = [1, 1]} : vector<8x256xf32> to vector<8x50xf32>
    %568 = arith.negf %567 : vector<8x50xf32>
    %569 = math.exp %568 : vector<8x50xf32>
    %cst_117 = arith.constant 1.000000e+00 : f32
    %570 = vector.broadcast %cst_117 : f32 to vector<8x50xf32>
    %571 = arith.addf %570, %569 : vector<8x50xf32>
    %572 = arith.divf %570, %571 : vector<8x50xf32>
    %573 = arith.mulf %564, %486 : vector<8x50xf32>
    %574 = arith.mulf %558, %566 : vector<8x50xf32>
    %575 = arith.addf %573, %574 : vector<8x50xf32>
    %576 = math.tanh %575 : vector<8x50xf32>
    %577 = arith.mulf %572, %576 : vector<8x50xf32>
    %cst_118 = arith.constant dense<0.000000e+00> : vector<8x128xf32>
    %578 = tpu.matmul %488, %4, %cst_118 {dimension_numbers = #tpu.dot_dimension_numbers<[1], [0], [0], [1], [0, 0, 1, 1], [], []>} : vector<8x50xf32>, vector<50x128xf32>, vector<8x128xf32> -> vector<8x128xf32>
    %579 = vector.broadcast %6 : vector<1x128xf32> to vector<8x128xf32>
    %580 = arith.addf %578, %579 : vector<8x128xf32>
    %cst_119 = arith.constant dense<0.000000e+00> : vector<8x128xf32>
    %581 = tpu.matmul %518, %5, %cst_119 {dimension_numbers = #tpu.dot_dimension_numbers<[1], [0], [0], [1], [0, 0, 1, 1], [], []>} : vector<8x25xf32>, vector<25x128xf32>, vector<8x128xf32> -> vector<8x128xf32>
    %582 = arith.addf %580, %581 : vector<8x128xf32>
    %583 = vector.extract_strided_slice %582 {offsets = [0, 0], sizes = [8, 25], strides = [1, 1]} : vector<8x128xf32> to vector<8x25xf32>
    %584 = arith.negf %583 : vector<8x25xf32>
    %585 = math.exp %584 : vector<8x25xf32>
    %cst_120 = arith.constant 1.000000e+00 : f32
    %586 = vector.broadcast %cst_120 : f32 to vector<8x25xf32>
    %587 = arith.addf %586, %585 : vector<8x25xf32>
    %588 = arith.divf %586, %587 : vector<8x25xf32>
    %589 = vector.extract_strided_slice %582 {offsets = [0, 32], sizes = [8, 25], strides = [1, 1]} : vector<8x128xf32> to vector<8x25xf32>
    %590 = arith.negf %589 : vector<8x25xf32>
    %591 = math.exp %590 : vector<8x25xf32>
    %cst_121 = arith.constant 1.000000e+00 : f32
    %592 = vector.broadcast %cst_121 : f32 to vector<8x25xf32>
    %593 = arith.addf %592, %591 : vector<8x25xf32>
    %594 = arith.divf %592, %593 : vector<8x25xf32>
    %595 = vector.extract_strided_slice %582 {offsets = [0, 64], sizes = [8, 25], strides = [1, 1]} : vector<8x128xf32> to vector<8x25xf32>
    %596 = math.tanh %595 : vector<8x25xf32>
    %597 = vector.extract_strided_slice %582 {offsets = [0, 96], sizes = [8, 25], strides = [1, 1]} : vector<8x128xf32> to vector<8x25xf32>
    %598 = arith.negf %597 : vector<8x25xf32>
    %599 = math.exp %598 : vector<8x25xf32>
    %cst_122 = arith.constant 1.000000e+00 : f32
    %600 = vector.broadcast %cst_122 : f32 to vector<8x25xf32>
    %601 = arith.addf %600, %599 : vector<8x25xf32>
    %602 = arith.divf %600, %601 : vector<8x25xf32>
    %603 = arith.mulf %594, %516 : vector<8x25xf32>
    %604 = arith.mulf %588, %596 : vector<8x25xf32>
    %605 = arith.addf %603, %604 : vector<8x25xf32>
    %606 = math.tanh %605 : vector<8x25xf32>
    %607 = arith.mulf %602, %606 : vector<8x25xf32>
    %cst_123 = arith.constant dense<0.000000e+00> : vector<8x128xf32>
    %608 = tpu.matmul %518, %7, %cst_123 {dimension_numbers = #tpu.dot_dimension_numbers<[1], [0], [0], [1], [0, 0, 1, 1], [], []>} : vector<8x25xf32>, vector<25x128xf32>, vector<8x128xf32> -> vector<8x128xf32>
    %609 = vector.broadcast %9 : vector<1x128xf32> to vector<8x128xf32>
    %610 = arith.addf %608, %609 : vector<8x128xf32>
    %cst_124 = arith.constant dense<0.000000e+00> : vector<8x128xf32>
    %611 = tpu.matmul %548, %8, %cst_124 {dimension_numbers = #tpu.dot_dimension_numbers<[1], [0], [0], [1], [0, 0, 1, 1], [], []>} : vector<8x10xf32>, vector<10x128xf32>, vector<8x128xf32> -> vector<8x128xf32>
    %612 = arith.addf %610, %611 : vector<8x128xf32>
    %613 = vector.extract_strided_slice %612 {offsets = [0, 0], sizes = [8, 10], strides = [1, 1]} : vector<8x128xf32> to vector<8x10xf32>
    %614 = arith.negf %613 : vector<8x10xf32>
    %615 = math.exp %614 : vector<8x10xf32>
    %cst_125 = arith.constant 1.000000e+00 : f32
    %616 = vector.broadcast %cst_125 : f32 to vector<8x10xf32>
    %617 = arith.addf %616, %615 : vector<8x10xf32>
    %618 = arith.divf %616, %617 : vector<8x10xf32>
    %619 = vector.extract_strided_slice %612 {offsets = [0, 32], sizes = [8, 10], strides = [1, 1]} : vector<8x128xf32> to vector<8x10xf32>
    %620 = arith.negf %619 : vector<8x10xf32>
    %621 = math.exp %620 : vector<8x10xf32>
    %cst_126 = arith.constant 1.000000e+00 : f32
    %622 = vector.broadcast %cst_126 : f32 to vector<8x10xf32>
    %623 = arith.addf %622, %621 : vector<8x10xf32>
    %624 = arith.divf %622, %623 : vector<8x10xf32>
    %625 = vector.extract_strided_slice %612 {offsets = [0, 64], sizes = [8, 10], strides = [1, 1]} : vector<8x128xf32> to vector<8x10xf32>
    %626 = math.tanh %625 : vector<8x10xf32>
    %627 = vector.extract_strided_slice %612 {offsets = [0, 96], sizes = [8, 10], strides = [1, 1]} : vector<8x128xf32> to vector<8x10xf32>
    %628 = arith.negf %627 : vector<8x10xf32>
    %629 = math.exp %628 : vector<8x10xf32>
    %cst_127 = arith.constant 1.000000e+00 : f32
    %630 = vector.broadcast %cst_127 : f32 to vector<8x10xf32>
    %631 = arith.addf %630, %629 : vector<8x10xf32>
    %632 = arith.divf %630, %631 : vector<8x10xf32>
    %633 = arith.mulf %624, %546 : vector<8x10xf32>
    %634 = arith.mulf %618, %626 : vector<8x10xf32>
    %635 = arith.addf %633, %634 : vector<8x10xf32>
    %636 = math.tanh %635 : vector<8x10xf32>
    %637 = arith.mulf %632, %636 : vector<8x10xf32>
    %c40 = arith.constant 40 : index
    %c0_128 = arith.constant 0 : index
    %638 = vector.load %arg13[%c40, %c0_128] : memref<64x10xf32, #tpu.memory_space<vmem>>, vector<8x10xf32>
    tpu.vector_store %arg13[%c40, %c0_128], %637 {strides = array<i32>} : memref<64x10xf32, #tpu.memory_space<vmem>>, vector<8x10xf32>,
    %cst_129 = arith.constant dense<0.000000e+00> : vector<8x128xf32>
    %639 = tpu.matmul %577, %4, %cst_129 {dimension_numbers = #tpu.dot_dimension_numbers<[1], [0], [0], [1], [0, 0, 1, 1], [], []>} : vector<8x50xf32>, vector<50x128xf32>, vector<8x128xf32> -> vector<8x128xf32>
    %640 = vector.broadcast %6 : vector<1x128xf32> to vector<8x128xf32>
    %641 = arith.addf %639, %640 : vector<8x128xf32>
    %cst_130 = arith.constant dense<0.000000e+00> : vector<8x128xf32>
    %642 = tpu.matmul %607, %5, %cst_130 {dimension_numbers = #tpu.dot_dimension_numbers<[1], [0], [0], [1], [0, 0, 1, 1], [], []>} : vector<8x25xf32>, vector<25x128xf32>, vector<8x128xf32> -> vector<8x128xf32>
    %643 = arith.addf %641, %642 : vector<8x128xf32>
    %644 = vector.extract_strided_slice %643 {offsets = [0, 0], sizes = [8, 25], strides = [1, 1]} : vector<8x128xf32> to vector<8x25xf32>
    %645 = arith.negf %644 : vector<8x25xf32>
    %646 = math.exp %645 : vector<8x25xf32>
    %cst_131 = arith.constant 1.000000e+00 : f32
    %647 = vector.broadcast %cst_131 : f32 to vector<8x25xf32>
    %648 = arith.addf %647, %646 : vector<8x25xf32>
    %649 = arith.divf %647, %648 : vector<8x25xf32>
    %650 = vector.extract_strided_slice %643 {offsets = [0, 32], sizes = [8, 25], strides = [1, 1]} : vector<8x128xf32> to vector<8x25xf32>
    %651 = arith.negf %650 : vector<8x25xf32>
    %652 = math.exp %651 : vector<8x25xf32>
    %cst_132 = arith.constant 1.000000e+00 : f32
    %653 = vector.broadcast %cst_132 : f32 to vector<8x25xf32>
    %654 = arith.addf %653, %652 : vector<8x25xf32>
    %655 = arith.divf %653, %654 : vector<8x25xf32>
    %656 = vector.extract_strided_slice %643 {offsets = [0, 64], sizes = [8, 25], strides = [1, 1]} : vector<8x128xf32> to vector<8x25xf32>
    %657 = math.tanh %656 : vector<8x25xf32>
    %658 = vector.extract_strided_slice %643 {offsets = [0, 96], sizes = [8, 25], strides = [1, 1]} : vector<8x128xf32> to vector<8x25xf32>
    %659 = arith.negf %658 : vector<8x25xf32>
    %660 = math.exp %659 : vector<8x25xf32>
    %cst_133 = arith.constant 1.000000e+00 : f32
    %661 = vector.broadcast %cst_133 : f32 to vector<8x25xf32>
    %662 = arith.addf %661, %660 : vector<8x25xf32>
    %663 = arith.divf %661, %662 : vector<8x25xf32>
    %664 = arith.mulf %655, %605 : vector<8x25xf32>
    %665 = arith.mulf %649, %657 : vector<8x25xf32>
    %666 = arith.addf %664, %665 : vector<8x25xf32>
    %667 = math.tanh %666 : vector<8x25xf32>
    %668 = arith.mulf %663, %667 : vector<8x25xf32>
    %cst_134 = arith.constant dense<0.000000e+00> : vector<8x128xf32>
    %669 = tpu.matmul %607, %7, %cst_134 {dimension_numbers = #tpu.dot_dimension_numbers<[1], [0], [0], [1], [0, 0, 1, 1], [], []>} : vector<8x25xf32>, vector<25x128xf32>, vector<8x128xf32> -> vector<8x128xf32>
    %670 = vector.broadcast %9 : vector<1x128xf32> to vector<8x128xf32>
    %671 = arith.addf %669, %670 : vector<8x128xf32>
    %cst_135 = arith.constant dense<0.000000e+00> : vector<8x128xf32>
    %672 = tpu.matmul %637, %8, %cst_135 {dimension_numbers = #tpu.dot_dimension_numbers<[1], [0], [0], [1], [0, 0, 1, 1], [], []>} : vector<8x10xf32>, vector<10x128xf32>, vector<8x128xf32> -> vector<8x128xf32>
    %673 = arith.addf %671, %672 : vector<8x128xf32>
    %674 = vector.extract_strided_slice %673 {offsets = [0, 0], sizes = [8, 10], strides = [1, 1]} : vector<8x128xf32> to vector<8x10xf32>
    %675 = arith.negf %674 : vector<8x10xf32>
    %676 = math.exp %675 : vector<8x10xf32>
    %cst_136 = arith.constant 1.000000e+00 : f32
    %677 = vector.broadcast %cst_136 : f32 to vector<8x10xf32>
    %678 = arith.addf %677, %676 : vector<8x10xf32>
    %679 = arith.divf %677, %678 : vector<8x10xf32>
    %680 = vector.extract_strided_slice %673 {offsets = [0, 32], sizes = [8, 10], strides = [1, 1]} : vector<8x128xf32> to vector<8x10xf32>
    %681 = arith.negf %680 : vector<8x10xf32>
    %682 = math.exp %681 : vector<8x10xf32>
    %cst_137 = arith.constant 1.000000e+00 : f32
    %683 = vector.broadcast %cst_137 : f32 to vector<8x10xf32>
    %684 = arith.addf %683, %682 : vector<8x10xf32>
    %685 = arith.divf %683, %684 : vector<8x10xf32>
    %686 = vector.extract_strided_slice %673 {offsets = [0, 64], sizes = [8, 10], strides = [1, 1]} : vector<8x128xf32> to vector<8x10xf32>
    %687 = math.tanh %686 : vector<8x10xf32>
    %688 = vector.extract_strided_slice %673 {offsets = [0, 96], sizes = [8, 10], strides = [1, 1]} : vector<8x128xf32> to vector<8x10xf32>
    %689 = arith.negf %688 : vector<8x10xf32>
    %690 = math.exp %689 : vector<8x10xf32>
    %cst_138 = arith.constant 1.000000e+00 : f32
    %691 = vector.broadcast %cst_138 : f32 to vector<8x10xf32>
    %692 = arith.addf %691, %690 : vector<8x10xf32>
    %693 = arith.divf %691, %692 : vector<8x10xf32>
    %694 = arith.mulf %685, %635 : vector<8x10xf32>
    %695 = arith.mulf %679, %687 : vector<8x10xf32>
    %696 = arith.addf %694, %695 : vector<8x10xf32>
    %697 = math.tanh %696 : vector<8x10xf32>
    %698 = arith.mulf %693, %697 : vector<8x10xf32>
    %c48 = arith.constant 48 : index
    %c0_139 = arith.constant 0 : index
    %699 = vector.load %arg13[%c48, %c0_139] : memref<64x10xf32, #tpu.memory_space<vmem>>, vector<8x10xf32>
    tpu.vector_store %arg13[%c48, %c0_139], %698 {strides = array<i32>} : memref<64x10xf32, #tpu.memory_space<vmem>>, vector<8x10xf32>,
    %cst_140 = arith.constant dense<0.000000e+00> : vector<8x128xf32>
    %700 = tpu.matmul %668, %7, %cst_140 {dimension_numbers = #tpu.dot_dimension_numbers<[1], [0], [0], [1], [0, 0, 1, 1], [], []>} : vector<8x25xf32>, vector<25x128xf32>, vector<8x128xf32> -> vector<8x128xf32>
    %701 = vector.broadcast %9 : vector<1x128xf32> to vector<8x128xf32>
    %702 = arith.addf %700, %701 : vector<8x128xf32>
    %cst_141 = arith.constant dense<0.000000e+00> : vector<8x128xf32>
    %703 = tpu.matmul %698, %8, %cst_141 {dimension_numbers = #tpu.dot_dimension_numbers<[1], [0], [0], [1], [0, 0, 1, 1], [], []>} : vector<8x10xf32>, vector<10x128xf32>, vector<8x128xf32> -> vector<8x128xf32>
    %704 = arith.addf %702, %703 : vector<8x128xf32>
    %705 = vector.extract_strided_slice %704 {offsets = [0, 0], sizes = [8, 10], strides = [1, 1]} : vector<8x128xf32> to vector<8x10xf32>
    %706 = arith.negf %705 : vector<8x10xf32>
    %707 = math.exp %706 : vector<8x10xf32>
    %cst_142 = arith.constant 1.000000e+00 : f32
    %708 = vector.broadcast %cst_142 : f32 to vector<8x10xf32>
    %709 = arith.addf %708, %707 : vector<8x10xf32>
    %710 = arith.divf %708, %709 : vector<8x10xf32>
    %711 = vector.extract_strided_slice %704 {offsets = [0, 32], sizes = [8, 10], strides = [1, 1]} : vector<8x128xf32> to vector<8x10xf32>
    %712 = arith.negf %711 : vector<8x10xf32>
    %713 = math.exp %712 : vector<8x10xf32>
    %cst_143 = arith.constant 1.000000e+00 : f32
    %714 = vector.broadcast %cst_143 : f32 to vector<8x10xf32>
    %715 = arith.addf %714, %713 : vector<8x10xf32>
    %716 = arith.divf %714, %715 : vector<8x10xf32>
    %717 = vector.extract_strided_slice %704 {offsets = [0, 64], sizes = [8, 10], strides = [1, 1]} : vector<8x128xf32> to vector<8x10xf32>
    %718 = math.tanh %717 : vector<8x10xf32>
    %719 = vector.extract_strided_slice %704 {offsets = [0, 96], sizes = [8, 10], strides = [1, 1]} : vector<8x128xf32> to vector<8x10xf32>
    %720 = arith.negf %719 : vector<8x10xf32>
    %721 = math.exp %720 : vector<8x10xf32>
    %cst_144 = arith.constant 1.000000e+00 : f32
    %722 = vector.broadcast %cst_144 : f32 to vector<8x10xf32>
    %723 = arith.addf %722, %721 : vector<8x10xf32>
    %724 = arith.divf %722, %723 : vector<8x10xf32>
    %725 = arith.mulf %716, %696 : vector<8x10xf32>
    %726 = arith.mulf %710, %718 : vector<8x10xf32>
    %727 = arith.addf %725, %726 : vector<8x10xf32>
    %728 = math.tanh %727 : vector<8x10xf32>
    %729 = arith.mulf %724, %728 : vector<8x10xf32>
    %c56 = arith.constant 56 : index
    %c0_145 = arith.constant 0 : index
    %730 = vector.load %arg13[%c56, %c0_145] : memref<64x10xf32, #tpu.memory_space<vmem>>, vector<8x10xf32>
    tpu.vector_store %arg13[%c56, %c0_145], %729 {strides = array<i32>} : memref<64x10xf32, #tpu.memory_space<vmem>>, vector<8x10xf32>,
    %c0_146 = arith.constant 0 : index
    %c0_147 = arith.constant 0 : index
    %731 = vector.load %arg13[%c0_146, %c0_147] : memref<64x10xf32, #tpu.memory_space<vmem>>, vector<64x10xf32>
    %c0_148 = arith.constant 0 : index
    %c0_149 = arith.constant 0 : index
    %732 = vector.load %arg10[%c0_148, %c0_149] : memref<10x3xf32, #tpu.memory_space<vmem>>, vector<10x3xf32>
    %cst_150 = arith.constant dense<0.000000e+00> : vector<64x3xf32>
    %733 = tpu.matmul %731, %732, %cst_150 {dimension_numbers = #tpu.dot_dimension_numbers<[1], [0], [0], [1], [0, 0, 1, 1], [], []>} : vector<64x10xf32>, vector<10x3xf32>, vector<64x3xf32> -> vector<64x3xf32>
    %c0_151 = arith.constant 0 : index
    %c0_152 = arith.constant 0 : index
    %734 = vector.load %arg11[%c0_151, %c0_152] : memref<1x3xf32, #tpu.memory_space<vmem>>, vector<1x3xf32>
    %735 = vector.broadcast %734 : vector<1x3xf32> to vector<64x3xf32>
    %736 = arith.addf %733, %735 : vector<64x3xf32>
    %c0_153 = arith.constant 0 : index
    %c0_154 = arith.constant 0 : index
    %737 = vector.load %arg12[%c0_153, %c0_154] : memref<64x3xf32, #tpu.memory_space<vmem>>, vector<64x3xf32>
    tpu.vector_store %arg12[%c0_153, %c0_154], %736 {strides = array<i32>} : memref<64x3xf32, #tpu.memory_space<vmem>>, vector<64x3xf32>,
    return
  }
}

</mosaic_0001>

<bundles_post_ra>
// kernel: q_model_forward.1
= control target key start
LH: loop header
LB: loop body
LE: loop exit
PB: predicated region body
PF: predicated region fallthrough
CT: control target
= control target key end

     0   :  { %17 = vsyncpa [#allocation4], 0  ;;  %s4167_s0 = inlined_call_operand.vmem [shape: f32[64,77], index: 0, kind: input, shape index: {}]   ;;  %s4168_s1 = inlined_call_operand.hbm [shape: f32[77,256], index: 1, kind: input, shape index: {}]   ;;  %s4169_s2 = inlined_call_operand.vmem [shape: f32[50,256], index: 2, kind: input, shape index: {}]   ;;  %s4170_s3 = inlined_call_operand.hbm [shape: f32[1,256], index: 3, kind: input, shape index: {}]   ;;  %s4171_s4 = inlined_call_operand.hbm [shape: f32[50,128], index: 4, kind: input, shape index: {}]   ;;  %s4172_s5 = inlined_call_operand.hbm [shape: f32[25,128], index: 5, kind: input, shape index: {}]   ;;  %s4173_s6 = inlined_call_operand.vmem [shape: f32[1,128], index: 6, kind: input, shape index: {}]   ;;  %s4174_s7 = inlined_call_operand.hbm [shape: f32[25,128], index: 7, kind: input, shape index: {}]   ;;  %s4175_s8 = inlined_call_operand.vmem [shape: f32[10,128], index: 8, kind: input, shape index: {}]   ;;  %s4176_s9 = inlined_call_operand.vmem [shape: f32[1,128], index: 9, kind: input, shape index: {}]   ;;  %s4177_s10 = inlined_call_operand.vmem [shape: f32[10,3], index: 10, kind: input, shape index: {}]   ;;  %s4178_s11 = inlined_call_operand.vmem [shape: f32[1,3], index: 11, kind: input, shape index: {}]   ;;  %s4179_s12 = inlined_call_operand.vmem [shape: f32[64,3], index: 12, kind: output, shape index: {}]  }
   0x1   :  { %18 = vsyncpa [#allocation6], 0  ;;  %s42_s23 = sshll.u32 %s4170_s3, 4  ;;  %s43_s23 = int_to_ptr.hbm [resolvable:$true] %s42_s23 }
   0x2   :  { %19 = vsyncpa [#allocation9], 0  ;;  %s3089_s24 = smov [#allocation5]   ;;  %s65_s28 = sshll.u32 %s4172_s5, 4  ;;  %s66_s28 = int_to_ptr.hbm [resolvable:$true] %s65_s28 }
   0x3   :  { %s44_s25 = sshll.u32 %s3089_s24, 4  ;;  %s3090_s29 = smov [#allocation8]   ;;  %s45_s25 = int_to_ptr.vmem [resolvable:$true] %s44_s25 }
   0x4   :  { %47 = dma.hbm_to_vmem [thread:$0]  %s43_s23, 32, %s45_s25, [#allocation6]  }
   0x5   :  { %s67_s30 = sshll.u32 %s3090_s29, 4  ;;  %s26_s15 = sshll.u32 %s4168_s1, 4  ;;  %s68_s30 = int_to_ptr.vmem [resolvable:$true] %s67_s30  ;;  %s27_s15 = int_to_ptr.hbm [resolvable:$true] %s26_s15 }
   0x6   :  { %s3091_s3 = smov 128   ;;  %s3092_s16 = smov 8  }
   0x7   :  { %73 = dma.hbm_to_vmem [thread:$0]  %s66_s28, 512, %s68_s30, [#allocation9], %s3091_s3, %s3091_s3, %s3092_s16  }
   0x8   :  { %s3093_s17 = smov [#allocation3]   ;;  %s52_s21 = sshll.u32 %s4171_s4, 4  ;;  %s53_s21 = int_to_ptr.hbm [resolvable:$true] %s52_s21 }
   0x9   :  { %s28_s18 = sshll.u32 %s3093_s17, 4  ;;  %s3094_s5 = smov 256   ;;  %s29_s18 = int_to_ptr.vmem [resolvable:$true] %s28_s18 }
   0xa   :  { %s3095_s22 = smov 16   ;;  %s3096_s23 = smov [#allocation7]  }
   0xb   :  { %34 = dma.hbm_to_vmem [thread:$0]  %s27_s15, 2560, %s29_s18, [#allocation4], %s3094_s5, %s3094_s5, %s3095_s22  }
   0xc   :  { %s54_s24 = sshll.u32 %s3096_s23, 4  ;;  %s80_s26 = sshll.u32 %s4174_s7, 4  ;;  %s55_s24 = int_to_ptr.vmem [resolvable:$true] %s54_s24  ;;  %s81_s26 = int_to_ptr.hbm [resolvable:$true] %s80_s26 }
   0xd   :  { %60 = dma.hbm_to_vmem [thread:$0]  %s53_s21, 896, %s55_s24, [#allocation6], %s3091_s3, %s3091_s3, %s3092_s16  }
   0xe   :  { %s3097_s27 = smov [#allocation10]  }
   0xf   :  { %s82_s28 = sshll.u32 %s3097_s27, 4  ;;  %s83_s28 = int_to_ptr.vmem [resolvable:$true] %s82_s28 }
  0x10   :  { %88 = dma.hbm_to_vmem [thread:$0]  %s81_s26, 512, %s83_s28, [#allocation9], %s3091_s3, %s3091_s3, %s3092_s16  }
  0x11   :  { %3083 = dma.done.wait [#allocation4], 2560  }
  0x12   :  { %3084 = vsyncadd [#allocation4], 4294964736 }
  0x13   :  { %3085 = dma.done.wait [#allocation6], 928  }
  0x14   :  { %3086 = vsyncadd [#allocation6], 4294966368 }
  0x15   :  { %3087 = dma.done.wait [#allocation9], 1024  }
  0x16   :  { %3088 = vsyncadd [#allocation9], 4294966272  ;;  %vm209_vm0 = vcmask 1044480   ;;  %vm302_vm1 = vcmask 1041408   ;;  %v143_v0 = vld [vmem:[#allocation3 + $0x90] sm:$0x1f] }
  0x17   :  { %v141_v1 = vld [vmem:[#allocation3 + $0x80] sm:$0xff]  ;;  %2534 = vmatpush.msk.msra.mxu0 %vm209_vm0, %v143_v0  ;;  %v3191_v3 = vld [vmem:[%s4169_s2 + $0x50] sm:$0xff]  ;;  %v144_v6 = vld [vmem:[#allocation3 + $0x98] sm:$0x1f]  ;;  %v3098_v27 = vmov 0.0   ;;  %vm184_vm2 = vcmask 629760  }
  0x18   :  { %v3184_v2 = vld [vmem:[%s4169_s2 + $0x60] sm:$0x3]  ;;  %v139_v4 = vld [vmem:[#allocation3 + $0x70] sm:$0xff]  ;;  %v142_v7 = vld [vmem:[#allocation3 + $0x88] sm:$0xff]  ;;  %2543 = vmatpush.msk.msra.mxu1 %vm209_vm0, %v144_v6  ;;  %s3099_s3 = smov 64   ;;  %vm523_vm11 = vcmask 1040384  }
  0x19   :  { %2552 = vmatpush.msk.msra.mxu2 %vm302_vm1, %v3184_v2  ;;  %v3196_v5 = vld [vmem:[%s4169_s2 + $0x40] sm:$0xff]  ;;  %223 = vmatpush.msra.mxu0 %v141_v1  ;;  %v3202_v9 = vld [vmem:[%s4169_s2 + $0x30] sm:$0xff]  ;;  %v3207_v10 = vld [vmem:[%s4169_s2 + $0x68] sm:$0x3]  ;;  %vm298_vm12 = vcmask 408576   ;;  %s3100_s20 = smov 32  }
  0x1a   :  { %v137_v8 = vld [vmem:[#allocation3 + $0x60] sm:$0xff]  ;;  %v140_v11 = vld [vmem:[#allocation3 + $0x78] sm:$0xff]  ;;  %v135_v13 = vld [vmem:[#allocation3 + $0x50] sm:$0xff]  ;;  %264 = vmatpush.msra.mxu1 %v142_v7  ;;  %2553 = vmatpush.msk.msra.mxu3 %vm302_vm1, %v3207_v10 }
  0x1b   :  { %319 = vmatpush.msra.mxu2 %v3191_v3  ;;  %224 = vmatpush.msra.mxu0 %v139_v4  ;;  %v3213_v12 = vld [vmem:[%s4169_s2 + $0x58] sm:$0xff]  ;;  %v3218_v14 = vld [vmem:[%s4169_s2 + $0x20] sm:$0xff]  ;;  %v138_v15 = vld [vmem:[#allocation3 + $0x68] sm:$0xff] }
  0x1c   :  { %v3226_v16 = vld [vmem:[%s4169_s2 + $0x48] sm:$0xff]  ;;  %v133_v17 = vld [vmem:[#allocation3 + $0x40] sm:$0xff]  ;;  %265 = vmatpush.msra.mxu1 %v140_v11  ;;  %v3231_v18 = vld [vmem:[%s4169_s2 + $0x10] sm:$0xff]  ;;  %339 = vmatpush.msra.mxu3 %v3213_v12 }
  0x1d   :  { %320 = vmatpush.msra.mxu2 %v3196_v5  ;;  %225 = vmatpush.msra.mxu0 %v137_v8  ;;  %v136_v19 = vld [vmem:[#allocation3 + $0x58] sm:$0xff]  ;;  %v131_v21 = vld [vmem:[#allocation3 + $0x30] sm:$0xff]  ;;  %v3243_v22 = vld [vmem:[%s4169_s2] sm:$0xff] }
  0x1e   :  { %v3238_v20 = vld [vmem:[%s4169_s2 + $0x38] sm:$0xff]  ;;  %266 = vmatpush.msra.mxu1 %v138_v15  ;;  %340 = vmatpush.msra.mxu3 %v3226_v16  ;;  %v129_v23 = vld [vmem:[#allocation3 + $0x20] sm:$0xff]  ;;  %v134_v24 = vld [vmem:[#allocation3 + $0x48] sm:$0xff] }
  0x1f   :  { %321 = vmatpush.msra.mxu2 %v3202_v9  ;;  %226 = vmatpush.msra.mxu0 %v135_v13  ;;  %v3251_v25 = vld [vmem:[%s4169_s2 + $0x28] sm:$0xff]  ;;  %v132_v26 = vld [vmem:[#allocation3 + $0x38] sm:$0xff]  ;;  %v127_v28 = vld [vmem:[#allocation3 + $0x10] sm:$0xff] }
  0x20   :  { %267 = vmatpush.msra.mxu1 %v136_v19  ;;  %341 = vmatpush.msra.mxu3 %v3238_v20  ;;  %v3258_v29 = vld [vmem:[%s4169_s2 + $0x18] sm:$0xff]  ;;  %v130_v30 = vld [vmem:[#allocation3 + $0x28] sm:$0xff]  ;;  %v125_v31 = vld [vmem:[#allocation3] sm:$0xff] }
  0x21   :  { %322 = vmatpush.msra.mxu2 %v3218_v14  ;;  %227 = vmatpush.msra.mxu0 %v133_v17  ;;  %v3264_v32 = vld [vmem:[%s4169_s2 + $0x8] sm:$0xff]  ;;  %v117_v33 = vld [vmem:[%s4167_s0] sm:$0xff]  ;;  %v128_v34 = vld [vmem:[#allocation3 + $0x18] sm:$0xff] }
  0x22   :  { %268 = vmatpush.msra.mxu1 %v134_v24  ;;  %342 = vmatpush.msra.mxu3 %v3251_v25  ;;  %v126_v35 = vld [vmem:[#allocation3 + $0x8] sm:$0xff]  ;;  %v159_v36 = vld [vmem:[#allocation5] sm:$0x3]  ;;  %v3321_v1 = vld [vmem:[#allocation7 + $0x30] sm:$0x3] }
  0x23   :  { %323 = vmatpush.msra.mxu2 %v3231_v18  ;;  %228 = vmatpush.msra.mxu0 %v131_v21  ;;  %v3314_v37 = vperm.slane %v159_v36, 0  ;;  %v3317_v45 = vperm.slane %v159_v36, 1  ;;  %v3323_v4 = vld [vmem:[#allocation7 + $0x28] sm:$0xff]  ;;  %v3327_v6 = vld [vmem:[#allocation7 + $0x20] sm:$0xff]  ;;  %v3339_v36 = vld [vmem:[#allocation7 + $0x10] sm:$0xff] }
  0x24   :  { %269 = vmatpush.msra.mxu1 %v132_v26  ;;  %343 = vmatpush.msra.mxu3 %v3258_v29 }
  0x25   :  { %324 = vmatpush.msra.mxu2 %v3243_v22  ;;  %229 = vmatpush.msra.mxu0 %v129_v23 }
  0x26   :  { %325 = vmatmul.f32.vlgmr.msra.gmra.mxu2 %v3098_v27  ;;  %270 = vmatpush.msra.mxu1 %v130_v30 }
  0x27   :  { %2556 = vmatpush.msk.msrb.mxu2 %vm302_vm1, %v3184_v2  ;;  %230 = vmatpush.msra.mxu0 %v127_v28 }
  0x28   :  { %344 = vmatpush.msra.mxu3 %v3264_v32  ;;  %271 = vmatpush.msra.mxu1 %v128_v34  ;;  %v3335_v34 = vld [vmem:[#allocation7 + $0x18] sm:$0xff] }
  0x29   :  { %414 = vmatpush.msrb.mxu2 %v3191_v3  ;;  %231 = vmatpush.msra.mxu0 %v125_v31 }
  0x2a   :  { %2535 = vmatmul.msk.f32.vlgmr.msra.gmra.mxu0 %vm184_vm2, %v117_v33  ;;  %345 = vmatmul.f32.vlgmr.msra.gmra.mxu3 %v3098_v27 }
  0x2b   :  { %415 = vmatpush.msrb.mxu2 %v3196_v5  ;;  %2558 = vmatpush.msk.msrb.mxu3 %vm302_vm1, %v3207_v10 }
  0x2c   :  { %2581 = vmatpush.msk.msrb.mxu0 %vm302_vm1, %v3184_v2  ;;  %272 = vmatpush.msra.mxu1 %v126_v35  ;;  %v3337_v35 = vld [vmem:[#allocation8 + $0x18] sm:$0x1] }
  0x2d   :  { %416 = vmatpush.msrb.mxu2 %v3202_v9  ;;  %2544 = vmatmul.msk.f32.vlgmr.msra.gmra.mxu1 %vm184_vm2, %v117_v33 }
  0x2e   :  { %434 = vmatpush.msrb.mxu3 %v3213_v12  ;;  %2583 = vmatpush.msk.msrb.mxu1 %vm302_vm1, %v3207_v10 }
  0x2f   :  { %417 = vmatpush.msrb.mxu2 %v3218_v14  ;;  %873 = vmatpush.msrb.mxu0 %v3191_v3 }
  0x30   :  { %435 = vmatpush.msrb.mxu3 %v3226_v16  ;;  %893 = vmatpush.msrb.mxu1 %v3213_v12 }
  0x31   :  { %418 = vmatpush.msrb.mxu2 %v3231_v18  ;;  %874 = vmatpush.msrb.mxu0 %v3196_v5 }
  0x32   :  { %436 = vmatpush.msrb.mxu3 %v3238_v20  ;;  %894 = vmatpush.msrb.mxu1 %v3226_v16 }
  0x33   :  { %419 = vmatpush.msrb.mxu2 %v3243_v22  ;;  %875 = vmatpush.msrb.mxu0 %v3202_v9 }
  0x34   :  { %437 = vmatpush.msrb.mxu3 %v3251_v25  ;;  %895 = vmatpush.msrb.mxu1 %v3238_v20 }
  0x35   :  { %876 = vmatpush.msrb.mxu0 %v3218_v14  ;;  %2562 = vmatpush.msk.msra.mxu2 %vm302_vm1, %v3321_v1 }
  0x36   :  { %438 = vmatpush.msrb.mxu3 %v3258_v29  ;;  %896 = vmatpush.msrb.mxu1 %v3251_v25 }
  0x37   :  { %877 = vmatpush.msrb.mxu0 %v3231_v18  ;;  %510 = vmatpush.msra.mxu2 %v3323_v4 }
  0x38   :  { %439 = vmatpush.msrb.mxu3 %v3264_v32  ;;  %897 = vmatpush.msrb.mxu1 %v3258_v29 }
  0x39   :  { %878 = vmatpush.msrb.mxu0 %v3243_v22  ;;  %511 = vmatpush.msra.mxu2 %v3327_v6 }
  0x3a   :  { %898 = vmatpush.msrb.mxu1 %v3264_v32  ;;  %2564 = vmatpush.msk.msra.mxu3 %vm523_vm11, %v3337_v35 }
  0x3b   :  { %512 = vmatpush.msra.mxu2 %v3335_v34 }
  0x3c   :  { %2597 = vmatpush.msk.msra.mxu1 %vm302_vm1, %v3184_v2 }
  0x3d   :  { %513 = vmatpush.msra.mxu2 %v3339_v36 }
  0x3e   :  { %1136 = vmatpush.msra.mxu1 %v3191_v3 }
  0x40   :  { %1137 = vmatpush.msra.mxu1 %v3196_v5 }
  0x42   :  { %1138 = vmatpush.msra.mxu1 %v3202_v9 }
  0x44   :  { %1139 = vmatpush.msra.mxu1 %v3218_v14 }
  0x46   :  { %1140 = vmatpush.msra.mxu1 %v3231_v18 }
  0x48   :  { %1141 = vmatpush.msra.mxu1 %v3243_v22 }
  0xa7   :  { %v233_v38 = vpop.f32.mrf.mxu0 }
  0xa8   :  { %v234_v40 = vadd.f32 %v233_v38, %v3314_v37  ;;  %v118_v38 = vld [vmem:[%s4167_s0 + $0x8] sm:$0xff] }
  0xa9   :  { %v326_v39 = vpop.f32.mrf.mxu2  ;;  %2536 = vmatmul.msk.f32.gmra.mxu0 %vm184_vm2, %v118_v38  ;;  %2545 = vmatmul.msk.f32.gmra.mxu1 %vm184_vm2, %v118_v38 }
  0xaa   :  { %v349_v41 = vadd.f32 %v326_v39, %v234_v40  ;;  %v274_v46 = vpop.f32.mrf.mxu1  ;;  %v3347_v39 = vld [vmem:[#allocation8 + $0x10] sm:$0xff] }
  0xab   :  { %v275_v47 = vadd.f32 %v274_v46, %v3317_v45  ;;  %v3351_v40 = vld [vmem:[#allocation7 + $0x8] sm:$0xff]  ;;  %540 = vmatpush.msra.mxu3 %v3347_v39 }
  0xac   :  { %v2554_v42 = vmul.f32 -1.442695, %v349_v41  ;;  %v3353_v41 = vld [vmem:[#allocation8 + $0x8] sm:$0xff]  ;;  %514 = vmatpush.msra.mxu2 %v3351_v40 }
  0xad   :  { %v346_v48 = vpop.f32.mrf.mxu3  ;;  %541 = vmatpush.msra.mxu3 %v3353_v41 }
  0xae   :  { %2704 = vpow2.f32 %v2554_v42  ;;  %v350_v50 = vadd.f32 %v346_v48, %v275_v47  ;;  %v3357_v42 = vld [vmem:[#allocation7] sm:$0xff]  ;;  %v3402_v47 = vld [vmem:[%s4173_s6] ss:$0 sm:$0xff] }
  0xaf   :  { %515 = vmatpush.msra.mxu2 %v3357_v42 }
  0xb0   :  { %v2555_v62 = vmul.f32 -1.442695, %v350_v50 }
  0xb4   :  { %v2705_v43 = vpop.eup %2704 }
  0xb5   :  { %v354_v44 = vadd.f32 1.0, %v2705_v43  ;;  %v3362_v43 = vld [vmem:[#allocation8] sm:$0xff] }
  0xb6   :  { %542 = vmatpush.msra.mxu3 %v3362_v43 }
  0xb7   :  { %2706 = vrcp.f32 %v354_v44  ;;  %v366_v53 = vand.u32 2147483648, %v354_v44  ;;  %v364_v55 = vand.u32 2147483647, %v354_v44  ;;  %vm360_vm4 = vweird.f32 %v354_v44 }
  0xb8   :  { %2708 = vtanh.f32 %v350_v50 }
  0xb9   :  { %v367_v58 = vor.u32 1.1754944e-38, %v366_v53  ;;  %vm365_vm6 = vcmp.eq.f32.partialorder %v364_v55, 8.507059e+37  ;;  %2710 = vpow2.f32 %v2555_v62 }
  0xbd   :  { %v2707_v49 = vpop.eup %2706 }
  0xbe   :  { %v356_v51 = vmul.f32 %v2707_v49, %v354_v44  ;;  %vm361_vm3 = vweird.f32 %v2707_v49  ;;  %v2709_v57 = vpop.eup %2708 }
  0xbf   :  { %vm362_vm5 = vmor %vm360_vm4, %vm361_vm3  ;;  %v2711_v63 = vpop.eup %2710 }
  0xc0   :  { %v357_v52 = vsub.f32 1.0, %v356_v51  ;;  %v374_v0 = vadd.f32 1.0, %v2711_v63 }
  0xc2   :  { %v358_v54 = vmul.f32 %v2707_v49, %v357_v52  ;;  %2712 = vrcp.f32 %v374_v0  ;;  %vm380_vm7 = vweird.f32 %v374_v0  ;;  %v386_v21 = vand.u32 2147483648, %v374_v0 }
  0xc3   :  { %v384_v24 = vand.u32 2147483647, %v374_v0 }
  0xc4   :  { %v359_v56 = vadd.f32 %v2707_v49, %v358_v54  ;;  %v387_v26 = vor.u32 1.1754944e-38, %v386_v21 }
  0xc5   :  { %vm385_vm10 = vcmp.eq.f32.partialorder %v384_v24, 8.507059e+37 }
  0xc6   :  { %v363_v59 = vsel %vm362_vm5, %v2707_v49, %v359_v56 }
  0xc7   :  { %v368_v60 = vsel %vm365_vm6, %v367_v58, %v363_v59 }
  0xc8   :  { %v391_v61 = vmul.f32 %v2709_v57, %v368_v60  ;;  %v2713_v7 = vpop.eup %2712  ;;  %v390_v15 = vmul.f32 0.0, %v368_v60 }
  0xc9   :  { %v376_v8 = vmul.f32 %v2713_v7, %v374_v0  ;;  %vm381_vm8 = vweird.f32 %v2713_v7 }
  0xca   :  { %393 = vrot.lane.b32.xlu0 %v391_v61, %s3099_s3  ;;  %vm382_vm9 = vmor %vm380_vm7, %vm381_vm8 }
  0xcb   :  { %v377_v11 = vsub.f32 1.0, %v376_v8 }
  0xcd   :  { %v378_v13 = vmul.f32 %v2713_v7, %v377_v11 }
  0xcf   :  { %v379_v23 = vadd.f32 %v2713_v7, %v378_v13 }
  0xd1   :  { %v383_v28 = vsel %vm382_vm9, %v2713_v7, %v379_v23 }
  0xd2   :  { %v388_v31 = vsel %vm385_vm10, %v387_v26, %v383_v28 }
 0x126   :  { %v277_v54 = vpop.f32.mrf.mxu1 }
 0x127   :  { %v278_v55 = vadd.f32 %v277_v54, %v3317_v45 }
 0x13c   :  { %v394_v17 = vpop.permute.xlu0 %393 }
 0x13d   :  { %v3331_v19 = vadd.f32 %v394_v17, %v390_v15 }
 0x13f   :  { %2714 = vtanh.f32 %v3331_v19 }
 0x145   :  { %v2715_v30 = vpop.eup %2714 }
 0x146   :  { %v398_v33 = vmul.f32 %v2715_v30, %v388_v31 }
 0x148   :  { %400 = vrot.lane.b32.xlu0 %v398_v33, %s3099_s3 }
 0x1ba   :  { %v401_v44 = vpop.permute.xlu0 %400 }
 0x1bb   :  { %2557 = vmatmul.msk.f32.vlgmr.msrb.gmra.mxu2 %vm298_vm12, %v401_v44  ;;  %2559 = vmatmul.msk.f32.vlgmr.msrb.gmra.mxu3 %vm298_vm12, %v401_v44 }
 0x1bc   :  { %2566 = vmatpush.msk.msrb.mxu3 %vm302_vm1, %v3184_v2  ;;  %2568 = vmatpush.msk.msrb.mxu2 %vm302_vm1, %v3207_v10  ;;  %v236_v2 = vpop.f32.mrf.mxu0 }
 0x1be   :  { %600 = vmatpush.msrb.mxu3 %v3191_v3  ;;  %620 = vmatpush.msrb.mxu2 %v3213_v12  ;;  %v237_v3 = vadd.f32 %v236_v2, %v3314_v37 }
 0x1c0   :  { %601 = vmatpush.msrb.mxu3 %v3196_v5  ;;  %621 = vmatpush.msrb.mxu2 %v3226_v16 }
 0x1c2   :  { %602 = vmatpush.msrb.mxu3 %v3202_v9  ;;  %622 = vmatpush.msrb.mxu2 %v3238_v20 }
 0x1c3   :  { %2563 = vmatmul.msk.f32.vlgmr.msra.gmra.mxu2 %vm298_vm12, %v401_v44  ;;  %543 = vmatmul.f32.vlgmr.msra.gmra.mxu3 %v3098_v27 }
 0x1c4   :  { %603 = vmatpush.msrb.mxu3 %v3218_v14  ;;  %623 = vmatpush.msrb.mxu2 %v3251_v25 }
 0x1c6   :  { %604 = vmatpush.msrb.mxu3 %v3231_v18  ;;  %624 = vmatpush.msrb.mxu2 %v3258_v29 }
 0x1c8   :  { %605 = vmatpush.msrb.mxu3 %v3243_v22  ;;  %625 = vmatpush.msrb.mxu2 %v3264_v32 }
 0x1ca   :  { %2572 = vmatpush.msk.msra.mxu3 %vm302_vm1, %v3321_v1  ;;  %2574 = vmatpush.msk.msra.mxu2 %vm523_vm11, %v3337_v35 }
 0x1cc   :  { %690 = vmatpush.msra.mxu3 %v3323_v4  ;;  %718 = vmatpush.msra.mxu2 %v3347_v39 }
 0x1ce   :  { %691 = vmatpush.msra.mxu3 %v3327_v6  ;;  %719 = vmatpush.msra.mxu2 %v3353_v41 }
 0x1d0   :  { %692 = vmatpush.msra.mxu3 %v3335_v34  ;;  %720 = vmatpush.msra.mxu2 %v3362_v43 }
 0x1d2   :  { %693 = vmatpush.msra.mxu3 %v3339_v36 }
 0x1d4   :  { %694 = vmatpush.msra.mxu3 %v3351_v40 }
 0x1d6   :  { %695 = vmatpush.msra.mxu3 %v3357_v42 }
 0x23e   :  { %v421_v5 = vpop.f32.mrf.mxu2  ;;  %v441_v9 = vpop.f32.mrf.mxu3 }
 0x23f   :  { %v444_v14 = vadd.f32 %v421_v5, %v237_v3  ;;  %v445_v58 = vadd.f32 %v441_v9, %v278_v55 }
 0x241   :  { %v2560_v46 = vmul.f32 -1.442695, %v444_v14  ;;  %v2561_v17 = vmul.f32 -1.442695, %v445_v58 }
 0x243   :  { %2716 = vpow2.f32 %v2560_v46 }
 0x246   :  { %v517_v48 = vpop.f32.mrf.mxu2  ;;  %v544_v49 = vpop.f32.mrf.mxu3 }
 0x247   :  { %v518_v50 = vadd.f32 %v3402_v47, %v517_v48 }
 0x249   :  { %v2717_v51 = vpop.eup %2716  ;;  %v547_v52 = vadd.f32 %v544_v49, %v518_v50 }
 0x24a   :  { %v449_v53 = vadd.f32 1.0, %v2717_v51 }
 0x24b   :  { %2718 = vtanh.f32 %v547_v52  ;;  %v2565_v21 = vmul.f32 -1.442695, %v547_v52 }
 0x24c   :  { %2720 = vrcp.f32 %v449_v53  ;;  %v461_v61 = vand.u32 2147483648, %v449_v53  ;;  %v459_v63 = vand.u32 2147483647, %v449_v53  ;;  %vm455_vm14 = vweird.f32 %v449_v53 }
 0x24d   :  { %2722 = vtanh.f32 %v445_v58 }
 0x24e   :  { %v462_v7 = vor.u32 1.1754944e-38, %v461_v61  ;;  %vm460_vm0 = vcmp.eq.f32.partialorder %v459_v63, 8.507059e+37  ;;  %2724 = vpow2.f32 %v2561_v17  ;;  %v119_v63 = vld [vmem:[%s4167_s0 + $0x10] sm:$0xff] }
 0x24f   :  { %2726 = vpow2.f32 %v2565_v21  ;;  %2537 = vmatmul.msk.f32.gmra.mxu0 %vm184_vm2, %v119_v63  ;;  %2546 = vmatmul.msk.f32.gmra.mxu1 %vm184_vm2, %v119_v63  ;;  %v3427_v21 = vld [vmem:[#allocation10 + $0x18] sm:$0x1] }
 0x251   :  { %v2719_v56 = vpop.eup %2718 }
 0x252   :  { %v2721_v57 = vpop.eup %2720  ;;  %570 = vrot.lane.b32.xlu1 %v2719_v56, %s3099_s3 }
 0x253   :  { %v451_v59 = vmul.f32 %v2721_v57, %v449_v53  ;;  %vm456_vm13 = vweird.f32 %v2721_v57  ;;  %v2723_v11 = vpop.eup %2722 }
 0x254   :  { %vm457_vm15 = vmor %vm455_vm14, %vm456_vm13  ;;  %v2725_v23 = vpop.eup %2724  ;;  %vm520_vm13 = vcmask 203776  }
 0x255   :  { %v452_v60 = vsub.f32 1.0, %v451_v59  ;;  %v2727_v24 = vpop.eup %2726  ;;  %v469_v26 = vadd.f32 1.0, %v2725_v23  ;;  %v3429_v23 = vld [vmem:[#allocation10 + $0x10] sm:$0xff] }
 0x256   :  { %v551_v28 = vadd.f32 1.0, %v2727_v24  ;;  %v3436_v24 = vld [vmem:[%s4175_s8 + $0x8] sm:$0x3] }
 0x257   :  { %v453_v62 = vmul.f32 %v2721_v57, %v452_v60  ;;  %2728 = vrcp.f32 %v469_v26  ;;  %v481_v49 = vand.u32 2147483648, %v469_v26  ;;  %vm475_vm5 = vweird.f32 %v469_v26  ;;  %2594 = vmatpush.msk.msra.mxu0 %vm302_vm1, %v3436_v24 }
 0x258   :  { %2730 = vrcp.f32 %v551_v28  ;;  %v479_v51 = vand.u32 2147483647, %v469_v26  ;;  %v563_v52 = vand.u32 2147483648, %v551_v28  ;;  %vm557_vm7 = vweird.f32 %v551_v28 }
 0x259   :  { %v454_v0 = vadd.f32 %v2721_v57, %v453_v62  ;;  %v561_v53 = vand.u32 2147483647, %v551_v28 }
 0x25a   :  { %vm480_vm9 = vcmp.eq.f32.partialorder %v479_v51, 8.507059e+37 }
 0x25b   :  { %v458_v8 = vsel %vm457_vm15, %v2721_v57, %v454_v0  ;;  %v564_v57 = vor.u32 1.1754944e-38, %v563_v52  ;;  %vm562_vm10 = vcmp.eq.f32.partialorder %v561_v53, 8.507059e+37 }
 0x25c   :  { %v463_v13 = vsel %vm460_vm0, %v462_v7, %v458_v8 }
 0x25d   :  { %v486_v15 = vmul.f32 %v2723_v11, %v463_v13  ;;  %v2729_v30 = vpop.eup %2728  ;;  %v485_v5 = vmul.f32 %v463_v13, %v3331_v19  ;;  %v482_v19 = vor.u32 1.1754944e-38, %v481_v49 }
 0x25e   :  { %v2731_v31 = vpop.eup %2730  ;;  %v471_v33 = vmul.f32 %v2729_v30, %v469_v26  ;;  %vm476_vm3 = vweird.f32 %v2729_v30  ;;  %v3438_v26 = vld [vmem:[#allocation10 + $0x8] sm:$0xff] }
 0x25f   :  { %488 = vrot.lane.b32.xlu2 %v486_v15, %s3099_s3  ;;  %v553_v38 = vmul.f32 %v2731_v31, %v551_v28  ;;  %vm558_vm4 = vweird.f32 %v2731_v31  ;;  %vm477_vm6 = vmor %vm475_vm5, %vm476_vm3  ;;  %v3445_v28 = vld [vmem:[#allocation10] sm:$0xff] }
 0x260   :  { %v472_v44 = vsub.f32 1.0, %v471_v33  ;;  %vm559_vm8 = vmor %vm557_vm7, %vm558_vm4 }
 0x261   :  { %v554_v2 = vsub.f32 1.0, %v553_v38 }
 0x262   :  { %v473_v3 = vmul.f32 %v2729_v30, %v472_v44 }
 0x263   :  { %v555_v14 = vmul.f32 %v2731_v31, %v554_v2 }
 0x264   :  { %v474_v48 = vadd.f32 %v2729_v30, %v473_v3 }
 0x265   :  { %v556_v50 = vadd.f32 %v2731_v31, %v555_v14  ;;  %v3490_v14 = vld [vmem:[%s4176_s9] ss:$0 sm:$0xff] }
 0x266   :  { %v478_v54 = vsel %vm477_vm6, %v2729_v30, %v474_v48  ;;  %v3452_v30 = vld [vmem:[%s4175_s8] sm:$0xff] }
 0x267   :  { %v560_v55 = vsel %vm559_vm8, %v2731_v31, %v556_v50  ;;  %v483_v58 = vsel %vm480_vm9, %v482_v19, %v478_v54  ;;  %1073 = vmatpush.msra.mxu0 %v3452_v30 }
 0x268   :  { %v565_v61 = vsel %vm562_vm10, %v564_v57, %v560_v55 }
 0x269   :  { %v568_v7 = vmul.f32 0.0, %v565_v61 }
 0x2b9   :  { %v489_v9 = vpop.permute.xlu2 %488 }
 0x2ba   :  { %v3409_v46 = vadd.f32 %v489_v9, %v485_v5 }
 0x2bc   :  { %2732 = vtanh.f32 %v3409_v46 }
 0x2c2   :  { %v2733_v56 = vpop.eup %2732 }
 0x2c3   :  { %v493_v59 = vmul.f32 %v2733_v56, %v483_v58 }
 0x2c4   :  { %v571_v60 = vpop.permute.xlu1 %570 }
 0x2c5   :  { %v573_v62 = vmul.f32 %v571_v60, %v565_v61  ;;  %586 = vrot.lane.b32.xlu0 %v493_v59, %s3099_s3 }
 0x2c7   :  { %575 = vrot.lane.b32.xlu1 %v573_v62, %s3100_s20 }
 0x2cc   :  { %v239_v31 = vpop.f32.mrf.mxu0  ;;  %v280_v48 = vpop.f32.mrf.mxu1 }
 0x2cd   :  { %v240_v33 = vadd.f32 %v239_v31, %v3314_v37  ;;  %v281_v54 = vadd.f32 %v280_v48, %v3317_v45 }
 0x337   :  { %v587_v0 = vpop.permute.xlu0 %586 }
 0x338   :  { %2567 = vmatmul.msk.f32.vlgmr.msrb.gmra.mxu3 %vm298_vm12, %v587_v0  ;;  %2569 = vmatmul.msk.f32.vlgmr.msrb.gmra.mxu2 %vm298_vm12, %v587_v0 }
 0x339   :  { %v576_v8 = vpop.permute.xlu1 %575  ;;  %2577 = vmatpush.msk.msrb.mxu2 %vm523_vm11, %v3427_v21  ;;  %2579 = vmatpush.msk.msrb.mxu3 %vm302_vm1, %v3436_v24 }
 0x33a   :  { %v3421_v11 = vadd.f32 %v576_v8, %v568_v7 }
 0x33b   :  { %782 = vmatpush.msrb.mxu2 %v3429_v23  ;;  %810 = vmatpush.msrb.mxu3 %v3452_v30 }
 0x33c   :  { %2734 = vtanh.f32 %v3421_v11 }
 0x33d   :  { %783 = vmatpush.msrb.mxu2 %v3438_v26 }
 0x33f   :  { %784 = vmatpush.msrb.mxu2 %v3445_v28 }
 0x340   :  { %2573 = vmatmul.msk.f32.vlgmr.msra.gmra.mxu3 %vm298_vm12, %v587_v0 }
 0x341   :  { %2589 = vmatpush.msk.msra.mxu3 %vm523_vm11, %v3337_v35 }
 0x342   :  { %v2735_v13 = vpop.eup %2734 }
 0x343   :  { %581 = vrot.lane.b32.xlu2 %v2735_v13, %s3099_s3  ;;  %991 = vmatpush.msra.mxu3 %v3347_v39 }
 0x345   :  { %992 = vmatpush.msra.mxu3 %v3353_v41 }
 0x347   :  { %993 = vmatpush.msra.mxu3 %v3362_v43 }
 0x348   :  { %811 = vmatmul.f32.vlgmr.msrb.gmra.mxu3 %v3098_v27 }
 0x349   :  { %2592 = vmatpush.msk.msrb.mxu3 %vm523_vm11, %v3427_v21 }
 0x34b   :  { %1049 = vmatpush.msrb.mxu3 %v3429_v23 }
 0x34d   :  { %1050 = vmatpush.msrb.mxu3 %v3438_v26 }
 0x34f   :  { %1051 = vmatpush.msrb.mxu3 %v3445_v28 }
 0x39d   :  { %v582_v15 = vpop.permute.xlu2 %581 }
 0x39e   :  { %v584_v17 = vmul.f32 %v582_v15, %v565_v61 }
 0x3a0   :  { %701 = vrot.lane.b32.xlu1 %v584_v17, %s3100_s20 }
 0x3bb   :  { %v607_v38 = vpop.f32.mrf.mxu3 }
 0x3bc   :  { %v630_v44 = vadd.f32 %v607_v38, %v240_v33 }
 0x3be   :  { %v2570_v2 = vmul.f32 -1.442695, %v630_v44 }
 0x3c0   :  { %2736 = vpow2.f32 %v2570_v2 }
 0x412   :  { %v702_v27 = vpop.permute.xlu1 %701 }
 0x413   :  { %2575 = vmatmul.msk.f32.vlgmr.msra.gmra.mxu2 %vm520_vm13, %v702_v27 }
 0x414   :  { %2587 = vmatpush.msk.msra.mxu2 %vm302_vm1, %v3321_v1 }
 0x416   :  { %963 = vmatpush.msra.mxu2 %v3323_v4 }
 0x418   :  { %964 = vmatpush.msra.mxu2 %v3327_v6 }
 0x41a   :  { %965 = vmatpush.msra.mxu2 %v3335_v34 }
 0x41b   :  { %2578 = vmatmul.msk.f32.vlgmr.msrb.gmra.mxu2 %vm520_vm13, %v702_v27 }
 0x41c   :  { %966 = vmatpush.msra.mxu2 %v3339_v36 }
 0x41e   :  { %967 = vmatpush.msra.mxu2 %v3351_v40 }
 0x420   :  { %968 = vmatpush.msra.mxu2 %v3357_v42 }
 0x422   :  { %2599 = vmatpush.msk.msrb.mxu2 %vm302_vm1, %v3207_v10  ;;  %v2737_v10 = vpop.eup %2736 }
 0x423   :  { %v635_v3 = vadd.f32 1.0, %v2737_v10 }
 0x424   :  { %1156 = vmatpush.msrb.mxu2 %v3213_v12  ;;  %v627_v12 = vpop.f32.mrf.mxu2 }
 0x425   :  { %2738 = vrcp.f32 %v635_v3  ;;  %v631_v56 = vadd.f32 %v627_v12, %v281_v54  ;;  %v647_v58 = vand.u32 2147483648, %v635_v3  ;;  %vm641_vm15 = vweird.f32 %v635_v3 }
 0x426   :  { %1157 = vmatpush.msrb.mxu2 %v3226_v16  ;;  %v697_v16 = vpop.f32.mrf.mxu3  ;;  %v645_v59 = vand.u32 2147483647, %v635_v3 }
 0x427   :  { %v648_v62 = vor.u32 1.1754944e-38, %v647_v58 }
 0x428   :  { %1158 = vmatpush.msrb.mxu2 %v3238_v20  ;;  %v698_v20 = vadd.f32 %v3402_v47, %v697_v16  ;;  %vm646_vm3 = vcmp.eq.f32.partialorder %v645_v59, 8.507059e+37 }
 0x42a   :  { %1159 = vmatpush.msrb.mxu2 %v3251_v25 }
 0x42b   :  { %v2739_v25 = vpop.eup %2738 }
 0x42c   :  { %1160 = vmatpush.msrb.mxu2 %v3258_v29  ;;  %v637_v29 = vmul.f32 %v2739_v25, %v635_v3  ;;  %vm642_vm14 = vweird.f32 %v2739_v25 }
 0x42d   :  { %vm643_vm0 = vmor %vm641_vm15, %vm642_vm14 }
 0x42e   :  { %1161 = vmatpush.msrb.mxu2 %v3264_v32  ;;  %v812_v50 = vpop.f32.mrf.mxu3  ;;  %v638_v51 = vsub.f32 1.0, %v637_v29  ;;  %v2571_v29 = vmul.f32 -1.442695, %v631_v56 }
 0x430   :  { %v639_v55 = vmul.f32 %v2739_v25, %v638_v51 }
 0x432   :  { %v640_v57 = vadd.f32 %v2739_v25, %v639_v55 }
 0x434   :  { %v644_v61 = vsel %vm643_vm0, %v2739_v25, %v640_v57 }
 0x435   :  { %v649_v63 = vsel %vm646_vm3, %v648_v62, %v644_v61 }
 0x496   :  { %v722_v5 = vpop.f32.mrf.mxu2 }
 0x497   :  { %v725_v9 = vadd.f32 %v722_v5, %v698_v20 }
 0x499   :  { %2740 = vtanh.f32 %v725_v9  ;;  %v2576_v8 = vmul.f32 -1.442695, %v725_v9 }
 0x49e   :  { %v786_v49 = vpop.f32.mrf.mxu2 }
 0x49f   :  { %v2741_v52 = vpop.eup %2740  ;;  %v787_v53 = vadd.f32 %v3490_v14, %v786_v49 }
 0x4a0   :  { %748 = vrot.lane.b32.xlu2 %v2741_v52, %s3099_s3 }
 0x4a1   :  { %v815_v19 = vadd.f32 %v812_v50, %v787_v53 }
 0x4a3   :  { %2742 = vtanh.f32 %v815_v19  ;;  %v2580_v33 = vmul.f32 -1.442695, %v815_v19 }
 0x4a4   :  { %2744 = vtanh.f32 %v631_v56 }
 0x4a5   :  { %2746 = vpow2.f32 %v2576_v8  ;;  %v671_v8 = vmul.f32 %v649_v63, %v3409_v46  ;;  %v120_v46 = vld [vmem:[%s4167_s0 + $0x18] sm:$0xff] }
 0x4a6   :  { %2538 = vmatmul.msk.f32.gmra.mxu0 %vm184_vm2, %v120_v46  ;;  %2547 = vmatmul.msk.f32.gmra.mxu1 %vm184_vm2, %v120_v46 }
 0x4a9   :  { %v2743_v60 = vpop.eup %2742 }
 0x4aa   :  { %838 = vrot.lane.b32.xlu0 %v2743_v60, %s3099_s3  ;;  %v2745_v0 = vpop.eup %2744 }
 0x4ab   :  { %v672_v7 = vmul.f32 %v2745_v0, %v649_v63  ;;  %v2747_v13 = vpop.eup %2746  ;;  %v121_v63 = vld [vmem:[%s4167_s0 + $0x20] sm:$0xff] }
 0x4ac   :  { %v729_v15 = vadd.f32 1.0, %v2747_v13 }
 0x4ae   :  { %2748 = vrcp.f32 %v729_v15  ;;  %v741_v2 = vand.u32 2147483648, %v729_v15  ;;  %vm735_vm5 = vweird.f32 %v729_v15  ;;  %v739_v10 = vand.u32 2147483647, %v729_v15  ;;  %2539 = vmatmul.msk.f32.gmra.mxu0 %vm184_vm2, %v121_v63  ;;  %2548 = vmatmul.msk.f32.gmra.mxu1 %vm184_vm2, %v121_v63 }
 0x4af   :  { %2750 = vpow2.f32 %v2580_v33 }
 0x4b0   :  { %v742_v12 = vor.u32 1.1754944e-38, %v741_v2  ;;  %vm740_vm7 = vcmp.eq.f32.partialorder %v739_v10, 8.507059e+37 }
 0x4b2   :  { %674 = vrot.lane.b32.xlu0 %v672_v7, %s3099_s3 }
 0x4b4   :  { %v2749_v17 = vpop.eup %2748 }
 0x4b5   :  { %v731_v27 = vmul.f32 %v2749_v17, %v729_v15  ;;  %vm736_vm4 = vweird.f32 %v2749_v17  ;;  %v2751_v16 = vpop.eup %2750 }
 0x4b6   :  { %vm737_vm6 = vmor %vm735_vm5, %vm736_vm4  ;;  %v819_v9 = vadd.f32 1.0, %v2751_v16 }
 0x4b7   :  { %v732_v31 = vsub.f32 1.0, %v731_v27 }
 0x4b8   :  { %2752 = vrcp.f32 %v819_v9  ;;  %v831_v19 = vand.u32 2147483648, %v819_v9  ;;  %vm825_vm9 = vweird.f32 %v819_v9  ;;  %v829_v57 = vand.u32 2147483647, %v819_v9 }
 0x4b9   :  { %v733_v38 = vmul.f32 %v2749_v17, %v732_v31  ;;  %2754 = vpow2.f32 %v2571_v29 }
 0x4ba   :  { %v832_v59 = vor.u32 1.1754944e-38, %v831_v19  ;;  %vm830_vm14 = vcmp.eq.f32.partialorder %v829_v57, 8.507059e+37 }
 0x4bb   :  { %v734_v44 = vadd.f32 %v2749_v17, %v733_v38 }
 0x4bd   :  { %v738_v3 = vsel %vm737_vm6, %v2749_v17, %v734_v44 }
 0x4be   :  { %v3497_v5 = vsel %vm740_vm7, %v742_v12, %v738_v3  ;;  %v2753_v48 = vpop.eup %2752  ;;  %v122_v3 = vld [vmem:[%s4167_s0 + $0x28] sm:$0xff] }
 0x4bf   :  { %v821_v49 = vmul.f32 %v2753_v48, %v819_v9  ;;  %v2755_v50 = vpop.eup %2754  ;;  %vm826_vm8 = vweird.f32 %v2753_v48  ;;  %2540 = vmatmul.msk.f32.gmra.mxu0 %vm184_vm2, %v122_v3  ;;  %2549 = vmatmul.msk.f32.gmra.mxu1 %vm184_vm2, %v122_v3  ;;  %v746_v12 = vmul.f32 %v3497_v5, %v3421_v11 }
 0x4c0   :  { %v655_v51 = vadd.f32 1.0, %v2755_v50  ;;  %vm827_vm10 = vmor %vm825_vm9, %vm826_vm8 }
 0x4c1   :  { %v822_v52 = vsub.f32 1.0, %v821_v49  ;;  %v124_v49 = vld [vmem:[%s4167_s0 + $0x38] sm:$0xff] }
 0x4c2   :  { %2756 = vrcp.f32 %v655_v51  ;;  %v667_v27 = vand.u32 2147483648, %v655_v51  ;;  %vm661_vm0 = vweird.f32 %v655_v51  ;;  %v665_v31 = vand.u32 2147483647, %v655_v51 }
 0x4c3   :  { %v823_v53 = vmul.f32 %v2753_v48, %v822_v52  ;;  %v3554_v52 = vld [vmem:[%s4169_s2 + $0x60] sm:$0x3] }
 0x4c4   :  { %v668_v38 = vor.u32 1.1754944e-38, %v667_v27  ;;  %vm666_vm4 = vcmp.eq.f32.partialorder %v665_v31, 8.507059e+37 }
 0x4c5   :  { %v824_v54 = vadd.f32 %v2753_v48, %v823_v53  ;;  %v3564_v53 = vld [vmem:[%s4169_s2 + $0x50] sm:$0xff] }
 0x4c7   :  { %v828_v58 = vsel %vm827_vm10, %v2753_v48, %v824_v54 }
 0x4c8   :  { %v2757_v55 = vpop.eup %2756  ;;  %v3501_v61 = vsel %vm830_vm14, %v832_v59, %v828_v58 }
 0x4c9   :  { %v657_v60 = vmul.f32 %v2757_v55, %v655_v51  ;;  %vm662_vm15 = vweird.f32 %v2757_v55  ;;  %v836_v29 = vmul.f32 0.0, %v3501_v61 }
 0x4ca   :  { %vm663_vm3 = vmor %vm661_vm0, %vm662_vm15 }
 0x4cb   :  { %v658_v0 = vsub.f32 1.0, %v657_v60 }
 0x4cd   :  { %v659_v7 = vmul.f32 %v2757_v55, %v658_v0 }
 0x4cf   :  { %v660_v17 = vadd.f32 %v2757_v55, %v659_v7 }
 0x4d1   :  { %v664_v33 = vsel %vm663_vm3, %v2757_v55, %v660_v17 }
 0x4d2   :  { %v669_v2 = vsel %vm666_vm4, %v668_v38, %v664_v33 }
 0x4fa   :  { %v749_v20 = vpop.permute.xlu2 %748 }
 0x4fb   :  { %v751_v25 = vmul.f32 %v749_v20, %v3497_v5 }
 0x4fd   :  { %753 = vrot.lane.b32.xlu1 %v751_v25, %s3100_s20  ;;  %v123_v25 = vld [vmem:[%s4167_s0 + $0x30] sm:$0xff] }
 0x4fe   :  { %2541 = vmatmul.msk.f32.gmra.mxu0 %vm184_vm2, %v123_v25  ;;  %2550 = vmatmul.msk.f32.gmra.mxu1 %vm184_vm2, %v123_v25 }
 0x506   :  { %2542 = vmatmul.msk.f32.gmra.mxu0 %vm184_vm2, %v124_v49  ;;  %2551 = vmatmul.msk.f32.gmra.mxu1 %vm184_vm2, %v124_v49  ;;  %vm789_vm2 = vcmask 80896  }
 0x51c   :  { %v839_v56 = vpop.permute.xlu0 %838 }
 0x51d   :  { %v841_v62 = vmul.f32 %v839_v56, %v3501_v61 }
 0x51f   :  { %843 = vrot.lane.b32.xlu2 %v841_v62, %s3100_s20 }
 0x523   :  { %v283_v60 = vpop.f32.mrf.mxu1 }
 0x524   :  { %v675_v13 = vpop.permute.xlu0 %674  ;;  %v284_v25 = vadd.f32 %v283_v60, %v3317_v45 }
 0x525   :  { %v3506_v15 = vadd.f32 %v675_v13, %v671_v8 }
 0x527   :  { %2758 = vtanh.f32 %v3506_v15 }
 0x52b   :  { %v3663_v62 = vpop.f32.mrf.mxu1 }
 0x52d   :  { %v2759_v44 = vpop.eup %2758 }
 0x52e   :  { %v679_v10 = vmul.f32 %v2759_v44, %v669_v2 }
 0x530   :  { %859 = vrot.lane.b32.xlu0 %v679_v10, %s3099_s3 }
 0x53c   :  { %v3665_v8 = vpop.f32.mrf.mxu1 }
 0x56f   :  { %v754_v16 = vpop.permute.xlu1 %753 }
 0x570   :  { %v3527_v20 = vadd.f32 %v754_v16, %v746_v12 }
 0x572   :  { %2760 = vtanh.f32 %v3527_v20 }
 0x578   :  { %v2761_v9 = vpop.eup %2760 }
 0x579   :  { %v844_v48 = vpop.permute.xlu2 %843  ;;  %759 = vrot.lane.b32.xlu1 %v2761_v9, %s3099_s3 }
 0x57a   :  { %v3537_v11 = vadd.f32 %v844_v48, %v836_v29 }
 0x57b   :  { %v3667_v17 = vpop.f32.mrf.mxu1 }
 0x57c   :  { %2762 = vtanh.f32 %v3537_v11 }
 0x582   :  { %v2763_v50 = vpop.eup %2762 }
 0x583   :  { %849 = vrot.lane.b32.xlu2 %v2763_v50, %s3099_s3  ;;  %v3670_v2 = vpop.f32.mrf.mxu1 }
 0x5a2   :  { %v860_v51 = vpop.permute.xlu0 %859 }
 0x5a3   :  { %2582 = vmatmul.msk.f32.vlgmr.msrb.gmra.mxu0 %vm298_vm12, %v860_v51  ;;  %2584 = vmatmul.msk.f32.vlgmr.msrb.gmra.mxu1 %vm298_vm12, %v860_v51 }
 0x5a4   :  { %2588 = vmatmul.msk.f32.vlgmr.msra.gmra.mxu2 %vm298_vm12, %v860_v51  ;;  %2605 = vmatpush.msk.msrb.mxu0 %vm523_vm11, %v3337_v35  ;;  %v3572_v35 = vld [vmem:[%s4169_s2 + $0x40] sm:$0xff] }
 0x5a5   :  { %2613 = vmatpush.msk.msra.mxu2 %vm302_vm1, %v3554_v52  ;;  %2619 = vmatpush.msk.msrb.mxu1 %vm302_vm1, %v3321_v1 }
 0x5a6   :  { %1254 = vmatpush.msrb.mxu0 %v3347_v39  ;;  %v3580_v39 = vld [vmem:[%s4169_s2 + $0x30] sm:$0xff] }
 0x5a7   :  { %1399 = vmatpush.msra.mxu2 %v3564_v53  ;;  %1489 = vmatpush.msrb.mxu1 %v3323_v4 }
 0x5a8   :  { %1255 = vmatpush.msrb.mxu0 %v3353_v41  ;;  %v3587_v41 = vld [vmem:[%s4169_s2 + $0x20] sm:$0xff] }
 0x5a9   :  { %1400 = vmatpush.msra.mxu2 %v3572_v35  ;;  %1490 = vmatpush.msrb.mxu1 %v3327_v6 }
 0x5aa   :  { %1256 = vmatpush.msrb.mxu0 %v3362_v43 }
 0x5ab   :  { %1401 = vmatpush.msra.mxu2 %v3580_v39  ;;  %1491 = vmatpush.msrb.mxu1 %v3335_v34 }
 0x5ad   :  { %1402 = vmatpush.msra.mxu2 %v3587_v41  ;;  %1492 = vmatpush.msrb.mxu1 %v3339_v36 }
 0x5af   :  { %1403 = vmatpush.msra.mxu2 %v3231_v18  ;;  %1493 = vmatpush.msrb.mxu1 %v3351_v40 }
 0x5b1   :  { %1404 = vmatpush.msra.mxu2 %v3243_v22  ;;  %1494 = vmatpush.msrb.mxu1 %v3357_v42  ;;  %v3619_v22 = vld [vmem:[%s4169_s2 + $0x68] sm:$0x3] }
 0x5dd   :  { %v850_v43 = vpop.permute.xlu2 %849 }
 0x5de   :  { %v852_v54 = vmul.f32 %v850_v43, %v3501_v61 }
 0x5e0   :  { %854 = vrot.lane.b32.xlu2 %v852_v54, %s3100_s20 }
 0x5eb   :  { %v760_v19 = vpop.permute.xlu1 %759 }
 0x5ec   :  { %v762_v55 = vmul.f32 %v760_v19, %v3497_v5 }
 0x5ee   :  { %974 = vrot.lane.b32.xlu1 %v762_v55, %s3100_s20 }
 0x620   :  { %v900_v29 = vpop.f32.mrf.mxu1 }
 0x621   :  { %v904_v48 = vadd.f32 %v900_v29, %v284_v25 }
 0x627   :  { %v970_v27 = vpop.f32.mrf.mxu2 }
 0x628   :  { %v971_v31 = vadd.f32 %v3402_v47, %v970_v27  ;;  %v2586_v27 = vmul.f32 -1.442695, %v904_v48 }
 0x63a   :  { %v855_v57 = vpop.permute.xlu2 %854 }
 0x63b   :  { %857 = vst.msk [vmem:[#allocation2] sm:$0xff] %vm789_vm2, %v855_v57  ;;  %2595 = vmatmul.msk.f32.vlgmr.msra.gmra.mxu0 %vm789_vm2, %v855_v57 }
 0x63c   :  { %2608 = vmatpush.msk.msra.mxu0 %vm523_vm11, %v3427_v21 }
 0x63e   :  { %1312 = vmatpush.msra.mxu0 %v3429_v23 }
 0x640   :  { %1313 = vmatpush.msra.mxu0 %v3438_v26 }
 0x642   :  { %1314 = vmatpush.msra.mxu0 %v3445_v28 }
 0x660   :  { %v975_v18 = vpop.permute.xlu1 %974 }
 0x661   :  { %2590 = vmatmul.msk.f32.vlgmr.msra.gmra.mxu3 %vm520_vm13, %v975_v18 }
 0x662   :  { %2603 = vmatpush.msk.msra.mxu3 %vm302_vm1, %v3321_v1  ;;  %v3626_v1 = vld [vmem:[%s4169_s2 + $0x58] sm:$0xff] }
 0x664   :  { %1226 = vmatpush.msra.mxu3 %v3323_v4  ;;  %v3632_v4 = vld [vmem:[%s4169_s2 + $0x48] sm:$0xff] }
 0x666   :  { %1227 = vmatpush.msra.mxu3 %v3327_v6  ;;  %v3638_v6 = vld [vmem:[%s4169_s2 + $0x38] sm:$0xff] }
 0x668   :  { %1228 = vmatpush.msra.mxu3 %v3335_v34  ;;  %v3644_v34 = vld [vmem:[%s4169_s2 + $0x28] sm:$0xff] }
 0x669   :  { %2593 = vmatmul.msk.f32.vlgmr.msrb.gmra.mxu3 %vm520_vm13, %v975_v18 }
 0x66a   :  { %1229 = vmatpush.msra.mxu3 %v3339_v36  ;;  %v3650_v36 = vld [vmem:[%s4169_s2 + $0x18] sm:$0xff] }
 0x66c   :  { %1230 = vmatpush.msra.mxu3 %v3351_v40  ;;  %v242_v40 = vpop.f32.mrf.mxu0 }
 0x66d   :  { %v243_v56 = vadd.f32 %v242_v40, %v3314_v37 }
 0x66e   :  { %1231 = vmatpush.msra.mxu3 %v3357_v42 }
 0x670   :  { %2615 = vmatpush.msk.msrb.mxu3 %vm302_vm1, %v3619_v22 }
 0x672   :  { %1419 = vmatpush.msrb.mxu3 %v3626_v1 }
 0x674   :  { %1420 = vmatpush.msrb.mxu3 %v3632_v4  ;;  %v3654_v42 = vpop.f32.mrf.mxu0 }
 0x676   :  { %1421 = vmatpush.msrb.mxu3 %v3638_v6 }
 0x678   :  { %1422 = vmatpush.msrb.mxu3 %v3644_v34 }
 0x67a   :  { %1423 = vmatpush.msrb.mxu3 %v3650_v36 }
 0x67c   :  { %1424 = vmatpush.msrb.mxu3 %v3264_v32  ;;  %v3656_v5 = vpop.f32.mrf.mxu0 }
 0x684   :  { %v3658_v58 = vpop.f32.mrf.mxu0 }
 0x68c   :  { %v3660_v59 = vpop.f32.mrf.mxu0 }
 0x694   :  { %v880_v61 = vpop.f32.mrf.mxu0 }
 0x695   :  { %v903_v0 = vadd.f32 %v880_v61, %v243_v56 }
 0x697   :  { %v2585_v7 = vmul.f32 -1.442695, %v903_v0 }
 0x699   :  { %2764 = vpow2.f32 %v2585_v7 }
 0x69f   :  { %v2765_v32 = vpop.eup %2764 }
 0x6a0   :  { %v908_v13 = vadd.f32 1.0, %v2765_v32 }
 0x6a2   :  { %2766 = vrcp.f32 %v908_v13  ;;  %v920_v50 = vand.u32 2147483648, %v908_v13  ;;  %vm914_vm6 = vweird.f32 %v908_v13  ;;  %v918_v51 = vand.u32 2147483647, %v908_v13 }
 0x6a4   :  { %v921_v19 = vor.u32 1.1754944e-38, %v920_v50  ;;  %vm919_vm8 = vcmp.eq.f32.partialorder %v918_v51, 8.507059e+37 }
 0x6a8   :  { %v2767_v38 = vpop.eup %2766 }
 0x6a9   :  { %v910_v10 = vmul.f32 %v2767_v38, %v908_v13  ;;  %vm915_vm5 = vweird.f32 %v2767_v38 }
 0x6aa   :  { %vm916_vm7 = vmor %vm914_vm6, %vm915_vm5 }
 0x6ab   :  { %v911_v63 = vsub.f32 1.0, %v910_v10 }
 0x6ad   :  { %v912_v47 = vmul.f32 %v2767_v38, %v911_v63 }
 0x6af   :  { %v913_v49 = vadd.f32 %v2767_v38, %v912_v47 }
 0x6b1   :  { %v917_v54 = vsel %vm916_vm7, %v2767_v38, %v913_v49 }
 0x6b2   :  { %v922_v55 = vsel %vm919_vm8, %v921_v19, %v917_v54 }
 0x6b8   :  { %v1075_v16 = vpop.f32.mrf.mxu0 }
 0x6e4   :  { %v995_v33 = vpop.f32.mrf.mxu3 }
 0x6e5   :  { %v998_v44 = vadd.f32 %v995_v33, %v971_v31 }
 0x6e7   :  { %2768 = vtanh.f32 %v998_v44  ;;  %v2591_v40 = vmul.f32 -1.442695, %v998_v44 }
 0x6ec   :  { %v1053_v46 = vpop.f32.mrf.mxu3 }
 0x6ed   :  { %v2769_v3 = vpop.eup %2768  ;;  %v1054_v12 = vadd.f32 %v3490_v14, %v1053_v46 }
 0x6ee   :  { %1021 = vrot.lane.b32.xlu0 %v2769_v3, %s3099_s3 }
 0x6ef   :  { %v1078_v9 = vadd.f32 %v1075_v16, %v1054_v12 }
 0x6f1   :  { %2770 = vtanh.f32 %v1078_v9  ;;  %v2596_v56 = vmul.f32 -1.442695, %v1078_v9 }
 0x6f2   :  { %2772 = vtanh.f32 %v904_v48 }
 0x6f3   :  { %2774 = vpow2.f32 %v2591_v40 }
 0x6f4   :  { %2776 = vpow2.f32 %v2596_v56 }
 0x6f7   :  { %v2771_v43 = vpop.eup %2770 }
 0x6f8   :  { %1101 = vrot.lane.b32.xlu1 %v2771_v43, %s3099_s3  ;;  %v2773_v57 = vpop.eup %2772 }
 0x6f9   :  { %v945_v18 = vmul.f32 %v2773_v57, %v922_v55  ;;  %v2775_v60 = vpop.eup %2774 }
 0x6fa   :  { %v1002_v61 = vadd.f32 1.0, %v2775_v60  ;;  %v2777_v0 = vpop.eup %2776 }
 0x6fb   :  { %v1082_v32 = vadd.f32 1.0, %v2777_v0 }
 0x6fc   :  { %2778 = vrcp.f32 %v1002_v61  ;;  %v1014_v44 = vand.u32 2147483648, %v1002_v61  ;;  %vm1008_vm10 = vweird.f32 %v1002_v61  ;;  %v1012_v12 = vand.u32 2147483647, %v1002_v61 }
 0x6fd   :  { %2780 = vrcp.f32 %v1082_v32  ;;  %v1094_v51 = vand.u32 2147483648, %v1082_v32  ;;  %vm1088_vm3 = vweird.f32 %v1082_v32  ;;  %v1092_v54 = vand.u32 2147483647, %v1082_v32 }
 0x6fe   :  { %2782 = vpow2.f32 %v2586_v27  ;;  %v1015_v9 = vor.u32 1.1754944e-38, %v1014_v44  ;;  %vm1013_vm15 = vcmp.eq.f32.partialorder %v1012_v12, 8.507059e+37 }
 0x6ff   :  { %v1095_v57 = vor.u32 1.1754944e-38, %v1094_v51  ;;  %vm1093_vm5 = vcmp.eq.f32.partialorder %v1092_v54, 8.507059e+37 }
 0x700   :  { %947 = vrot.lane.b32.xlu1 %v945_v18, %s3099_s3 }
 0x702   :  { %v2779_v7 = vpop.eup %2778 }
 0x703   :  { %v1004_v13 = vmul.f32 %v2779_v7, %v1002_v61  ;;  %v2781_v33 = vpop.eup %2780  ;;  %vm1009_vm9 = vweird.f32 %v2779_v7 }
 0x704   :  { %v1084_v10 = vmul.f32 %v2781_v33, %v1082_v32  ;;  %v2783_v46 = vpop.eup %2782  ;;  %vm1010_vm14 = vmor %vm1008_vm10, %vm1009_vm9  ;;  %vm1089_vm0 = vweird.f32 %v2781_v33 }
 0x705   :  { %v1005_v31 = vsub.f32 1.0, %v1004_v13  ;;  %v928_v3 = vadd.f32 1.0, %v2783_v46  ;;  %vm1090_vm4 = vmor %vm1088_vm3, %vm1089_vm0 }
 0x706   :  { %v1085_v16 = vsub.f32 1.0, %v1084_v10 }
 0x707   :  { %v1006_v38 = vmul.f32 %v2779_v7, %v1005_v31  ;;  %2784 = vrcp.f32 %v928_v3  ;;  %v940_v31 = vand.u32 2147483648, %v928_v3  ;;  %vm934_vm7 = vweird.f32 %v928_v3 }
 0x708   :  { %v1086_v29 = vmul.f32 %v2781_v33, %v1085_v16 }
 0x709   :  { %v1007_v63 = vadd.f32 %v2779_v7, %v1006_v38  ;;  %v941_v10 = vor.u32 1.1754944e-38, %v940_v31 }
 0x70a   :  { %v1087_v50 = vadd.f32 %v2781_v33, %v1086_v29 }
 0x70b   :  { %v1011_v25 = vsel %vm1010_vm14, %v2779_v7, %v1007_v63  ;;  %v944_v7 = vmul.f32 %v922_v55, %v3506_v15 }
 0x70c   :  { %v3677_v48 = vsel %vm1013_vm15, %v1015_v9, %v1011_v25  ;;  %v1091_v19 = vsel %vm1090_vm4, %v2781_v33, %v1087_v50  ;;  %v938_v33 = vand.u32 2147483647, %v928_v3  ;;  %v246_v50 = vadd.f32 %v3654_v42, %v3314_v37 }
 0x70d   :  { %v2785_v43 = vpop.eup %2784  ;;  %v3681_v60 = vsel %vm1093_vm5, %v1095_v57, %v1091_v19  ;;  %v1019_v15 = vmul.f32 %v3677_v48, %v3527_v20 }
 0x70e   :  { %v930_v18 = vmul.f32 %v2785_v43, %v928_v3  ;;  %vm935_vm6 = vweird.f32 %v2785_v43  ;;  %vm939_vm9 = vcmp.eq.f32.partialorder %v938_v33, 8.507059e+37  ;;  %v1099_v3 = vmul.f32 %v3681_v60, %v3537_v11  ;;  %v3761_v33 = vld [vmem:[#allocation8 + $0x10] sm:$0xff] }
 0x70f   :  { %vm936_vm8 = vmor %vm934_vm7, %vm935_vm6 }
 0x710   :  { %v931_v61 = vsub.f32 1.0, %v930_v18 }
 0x712   :  { %v932_v0 = vmul.f32 %v2785_v43, %v931_v61 }
 0x714   :  { %v933_v32 = vadd.f32 %v2785_v43, %v932_v0 }
 0x716   :  { %v937_v38 = vsel %vm936_vm8, %v2785_v43, %v933_v32  ;;  %v3757_v32 = vld [vmem:[#allocation8 + $0x18] sm:$0x1] }
 0x717   :  { %v942_v63 = vsel %vm939_vm9, %v941_v10, %v937_v38 }
 0x760   :  { %v1022_v47 = vpop.permute.xlu0 %1021 }
 0x761   :  { %v1024_v49 = vmul.f32 %v1022_v47, %v3677_v48 }
 0x763   :  { %1026 = vrot.lane.b32.xlu2 %v1024_v49, %s3100_s20 }
 0x76a   :  { %v1102_v40 = vpop.permute.xlu1 %1101 }
 0x76b   :  { %v1104_v56 = vmul.f32 %v1102_v40, %v3681_v60 }
 0x76d   :  { %1106 = vrot.lane.b32.xlu0 %v1104_v56, %s3100_s20 }
 0x772   :  { %v948_v13 = vpop.permute.xlu1 %947 }
 0x773   :  { %v3686_v27 = vadd.f32 %v948_v13, %v944_v7 }
 0x775   :  { %2786 = vtanh.f32 %v3686_v27 }
 0x77b   :  { %v2787_v46 = vpop.eup %2786 }
 0x77c   :  { %v952_v44 = vmul.f32 %v2787_v46, %v942_v63  ;;  %v3766_v63 = vld [vmem:[#allocation8 + $0x8] sm:$0xff] }
 0x77e   :  { %1122 = vrot.lane.b32.xlu1 %v952_v44, %s3099_s3 }
 0x7bd   :  { %v1027_v55 = vpop.permute.xlu2 %1026 }
 0x7be   :  { %v3692_v12 = vadd.f32 %v1027_v55, %v1019_v15  ;;  %v3770_v15 = vld [vmem:[#allocation8] sm:$0xff] }
 0x7c0   :  { %2788 = vtanh.f32 %v3692_v12 }
 0x7c6   :  { %v2789_v16 = vpop.eup %2788 }
 0x7c7   :  { %1032 = vrot.lane.b32.xlu2 %v2789_v16, %s3099_s3 }
 0x7df   :  { %v1107_v25 = vpop.permute.xlu0 %1106 }
 0x7e0   :  { %v3698_v9 = vadd.f32 %v1107_v25, %v1099_v3  ;;  %v3781_v3 = vld [vmem:[%s4173_s6] ss:$0 sm:$0xff] }
 0x7e2   :  { %2790 = vtanh.f32 %v3698_v9 }
 0x7e8   :  { %v2791_v29 = vpop.eup %2790 }
 0x7e9   :  { %1112 = vrot.lane.b32.xlu0 %v2791_v29, %s3099_s3 }
 0x7f0   :  { %v1123_v20 = vpop.permute.xlu1 %1122 }
 0x7f1   :  { %2598 = vmatmul.msk.f32.vlgmr.msra.gmra.mxu1 %vm298_vm12, %v1123_v20  ;;  %2600 = vmatmul.msk.f32.vlgmr.msrb.gmra.mxu2 %vm298_vm12, %v1123_v20 }
 0x7f2   :  { %2604 = vmatmul.msk.f32.vlgmr.msra.gmra.mxu3 %vm298_vm12, %v1123_v20  ;;  %2624 = vmatpush.msk.msrb.mxu2 %vm523_vm11, %v3427_v21  ;;  %v3725_v21 = vld [vmem:[%s4169_s2 + $0x10] sm:$0xff] }
 0x7f3   :  { %2629 = vmatpush.msk.msra.mxu3 %vm302_vm1, %v3554_v52  ;;  %2631 = vmatpush.msk.msra.mxu1 %vm302_vm1, %v3619_v22 }
 0x7f4   :  { %1575 = vmatpush.msrb.mxu2 %v3429_v23  ;;  %v3732_v23 = vld [vmem:[%s4169_s2] sm:$0xff] }
 0x7f5   :  { %1662 = vmatpush.msra.mxu3 %v3564_v53  ;;  %1682 = vmatpush.msra.mxu1 %v3626_v1 }
 0x7f6   :  { %1576 = vmatpush.msrb.mxu2 %v3438_v26  ;;  %v3738_v26 = vld [vmem:[%s4169_s2 + $0x8] sm:$0xff] }
 0x7f7   :  { %1663 = vmatpush.msra.mxu3 %v3572_v35  ;;  %1683 = vmatpush.msra.mxu1 %v3632_v4 }
 0x7f8   :  { %1577 = vmatpush.msrb.mxu2 %v3445_v28 }
 0x7f9   :  { %1664 = vmatpush.msra.mxu3 %v3580_v39  ;;  %1684 = vmatpush.msra.mxu1 %v3638_v6 }
 0x7fb   :  { %1665 = vmatpush.msra.mxu3 %v3587_v41  ;;  %1685 = vmatpush.msra.mxu1 %v3644_v34 }
 0x7fd   :  { %1666 = vmatpush.msra.mxu3 %v3725_v21  ;;  %1686 = vmatpush.msra.mxu1 %v3650_v36 }
 0x7ff   :  { %1667 = vmatpush.msra.mxu3 %v3732_v23  ;;  %1687 = vmatpush.msra.mxu1 %v3738_v26 }
 0x821   :  { %v1033_v28 = vpop.permute.xlu2 %1032 }
 0x822   :  { %v1035_v11 = vmul.f32 %v1033_v28, %v3677_v48  ;;  %v287_v48 = vadd.f32 %v3663_v62, %v3317_v45 }
 0x824   :  { %1237 = vrot.lane.b32.xlu2 %v1035_v11, %s3100_s20 }
 0x85b   :  { %v1113_v47 = vpop.permute.xlu0 %1112 }
 0x85c   :  { %v1115_v49 = vmul.f32 %v1113_v47, %v3681_v60 }
 0x85e   :  { %1117 = vrot.lane.b32.xlu0 %v1115_v49, %s3100_s20 }
 0x86e   :  { %v1143_v51 = vpop.f32.mrf.mxu1 }
 0x86f   :  { %v1166_v43 = vadd.f32 %v1143_v51, %v246_v50 }
 0x871   :  { %v2601_v54 = vmul.f32 -1.442695, %v1166_v43 }
 0x873   :  { %2792 = vpow2.f32 %v2601_v54 }
 0x874   :  { %v1163_v40 = vpop.f32.mrf.mxu2 }
 0x875   :  { %v3752_v56 = vadd.f32 %v1163_v40, %v287_v48  ;;  %v1233_v16 = vpop.f32.mrf.mxu3 }
 0x876   :  { %v1234_v25 = vadd.f32 %v3781_v3, %v1233_v16 }
 0x879   :  { %v2793_v19 = vpop.eup %2792 }
 0x87a   :  { %v1171_v57 = vadd.f32 1.0, %v2793_v19 }
 0x87c   :  { %2794 = vrcp.f32 %v1171_v57  ;;  %v1183_v0 = vand.u32 2147483648, %v1171_v57  ;;  %v1181_v13 = vand.u32 2147483647, %v1171_v57  ;;  %vm1177_vm14 = vweird.f32 %v1171_v57 }
 0x87d   :  { %2796 = vtanh.f32 %v3752_v56 }
 0x87e   :  { %v1238_v18 = vpop.permute.xlu2 %1237  ;;  %v1184_v31 = vor.u32 1.1754944e-38, %v1183_v0  ;;  %vm1182_vm0 = vcmp.eq.f32.partialorder %v1181_v13, 8.507059e+37 }
 0x87f   :  { %2606 = vmatmul.msk.f32.vlgmr.msrb.gmra.mxu0 %vm520_vm13, %v1238_v18 }
 0x880   :  { %2610 = vmatpush.msk.msrb.mxu0 %vm302_vm1, %v3436_v24 }
 0x882   :  { %v2795_v60 = vpop.eup %2794  ;;  %1336 = vmatpush.msrb.mxu0 %v3452_v30 }
 0x883   :  { %v1173_v42 = vmul.f32 %v2795_v60, %v1171_v57  ;;  %vm1178_vm10 = vweird.f32 %v2795_v60  ;;  %v2797_v10 = vpop.eup %2796 }
 0x884   :  { %vm1179_vm15 = vmor %vm1177_vm14, %vm1178_vm10 }
 0x885   :  { %v1174_v61 = vsub.f32 1.0, %v1173_v42 }
 0x887   :  { %2609 = vmatmul.msk.f32.vlgmr.msra.gmra.mxu0 %vm520_vm13, %v1238_v18  ;;  %v1175_v7 = vmul.f32 %v2795_v60, %v1174_v61 }
 0x888   :  { %2621 = vmatpush.msk.msra.mxu0 %vm523_vm11, %v3757_v32 }
 0x889   :  { %v1176_v62 = vadd.f32 %v2795_v60, %v1175_v7 }
 0x88a   :  { %1517 = vmatpush.msra.mxu0 %v3761_v33 }
 0x88b   :  { %v1180_v38 = vsel %vm1179_vm15, %v2795_v60, %v1176_v62 }
 0x88c   :  { %v3764_v46 = vsel %vm1182_vm0, %v1184_v31, %v1180_v38  ;;  %1518 = vmatpush.msra.mxu0 %v3766_v63  ;;  %v2602_v38 = vmul.f32 -1.442695, %v3752_v56 }
 0x88d   :  { %v1208_v44 = vmul.f32 %v2797_v10, %v3764_v46 }
 0x88e   :  { %1519 = vmatpush.msra.mxu0 %v3770_v15 }
 0x8d0   :  { %v1118_v55 = vpop.permute.xlu0 %1117 }
 0x8d1   :  { %1120 = vst.msk [vmem:[#allocation2 + $0x8] sm:$0xff] %vm789_vm2, %v1118_v55  ;;  %2611 = vmatmul.msk.f32.vlgmr.msrb.gmra.mxu0 %vm789_vm2, %v1118_v55 }
 0x8d2   :  { %2626 = vmatpush.msk.msrb.mxu0 %vm302_vm1, %v3436_v24 }
 0x8d4   :  { %1599 = vmatpush.msrb.mxu0 %v3452_v30 }
 0x8fc   :  { %v1258_v29 = vpop.f32.mrf.mxu0 }
 0x8fd   :  { %v1261_v20 = vadd.f32 %v1258_v29, %v1234_v25 }
 0x8ff   :  { %2798 = vtanh.f32 %v1261_v20  ;;  %v2607_v47 = vmul.f32 -1.442695, %v1261_v20 }
 0x901   :  { %2800 = vpow2.f32 %v2607_v47 }
 0x904   :  { %v1316_v11 = vpop.f32.mrf.mxu0 }
 0x905   :  { %v2799_v28 = vpop.eup %2798  ;;  %v1317_v24 = vadd.f32 %v3490_v14, %v1316_v11 }
 0x906   :  { %1284 = vrot.lane.b32.xlu1 %v2799_v28, %s3099_s3 }
 0x907   :  { %v2801_v50 = vpop.eup %2800 }
 0x908   :  { %v1265_v43 = vadd.f32 1.0, %v2801_v50 }
 0x90a   :  { %v1277_v48 = vand.u32 2147483648, %v1265_v43  ;;  %vm1271_vm4 = vweird.f32 %v1265_v43  ;;  %v1275_v14 = vand.u32 2147483647, %v1265_v43 }
 0x90c   :  { %v1278_v42 = vor.u32 1.1754944e-38, %v1277_v48  ;;  %vm1276_vm6 = vcmp.eq.f32.partialorder %v1275_v14, 8.507059e+37 }
 0x94e   :  { %v1338_v49 = vpop.f32.mrf.mxu0 }
 0x94f   :  { %v1341_v30 = vadd.f32 %v1338_v49, %v1317_v24 }
 0x951   :  { %2802 = vtanh.f32 %v1341_v30  ;;  %v2612_v13 = vmul.f32 -1.442695, %v1341_v30 }
 0x952   :  { %2804 = vrcp.f32 %v1265_v43 }
 0x953   :  { %2806 = vpow2.f32 %v2612_v13 }
 0x957   :  { %v2803_v51 = vpop.eup %2802 }
 0x958   :  { %1364 = vrot.lane.b32.xlu2 %v2803_v51, %s3099_s3  ;;  %v2805_v54 = vpop.eup %2804 }
 0x959   :  { %v1267_v19 = vmul.f32 %v2805_v54, %v1265_v43  ;;  %vm1272_vm3 = vweird.f32 %v2805_v54  ;;  %v2807_v62 = vpop.eup %2806 }
 0x95a   :  { %vm1273_vm5 = vmor %vm1271_vm4, %vm1272_vm3  ;;  %v1345_v31 = vadd.f32 1.0, %v2807_v62 }
 0x95b   :  { %v1268_v57 = vsub.f32 1.0, %v1267_v19  ;;  %v1207_v19 = vmul.f32 %v3764_v46, %v3686_v27 }
 0x95c   :  { %2808 = vrcp.f32 %v1345_v31  ;;  %v1357_v28 = vand.u32 2147483648, %v1345_v31  ;;  %vm1351_vm8 = vweird.f32 %v1345_v31  ;;  %v1355_v47 = vand.u32 2147483647, %v1345_v31 }
 0x95d   :  { %v1269_v18 = vmul.f32 %v2805_v54, %v1268_v57  ;;  %2810 = vpow2.f32 %v2602_v38 }
 0x95e   :  { %v1358_v49 = vor.u32 1.1754944e-38, %v1357_v28  ;;  %vm1356_vm10 = vcmp.eq.f32.partialorder %v1355_v47, 8.507059e+37  ;;  %v3840_v28 = vld [vmem:[#allocation7 + $0x18] sm:$0xff] }
 0x95f   :  { %v1270_v40 = vadd.f32 %v2805_v54, %v1269_v18 }
 0x960   :  { %1210 = vrot.lane.b32.xlu2 %v1208_v44, %s3099_s3 }
 0x961   :  { %v1274_v60 = vsel %vm1273_vm5, %v2805_v54, %v1270_v40 }
 0x962   :  { %v3788_v0 = vsel %vm1276_vm6, %v1278_v42, %v1274_v60  ;;  %v2809_v10 = vpop.eup %2808 }
 0x963   :  { %v1347_v44 = vmul.f32 %v2809_v10, %v1345_v31  ;;  %v2811_v55 = vpop.eup %2810  ;;  %vm1352_vm7 = vweird.f32 %v2809_v10  ;;  %v1282_v27 = vmul.f32 %v3788_v0, %v3692_v12  ;;  %v3816_v12 = vld [vmem:[#allocation10 + $0x18] sm:$0x1] }
 0x964   :  { %v1191_v16 = vadd.f32 1.0, %v2811_v55  ;;  %vm1353_vm9 = vmor %vm1351_vm8, %vm1352_vm7  ;;  %v3825_v55 = vld [vmem:[#allocation10 + $0x10] sm:$0xff] }
 0x965   :  { %v1348_v25 = vsub.f32 1.0, %v1347_v44  ;;  %v3822_v44 = vld [vmem:[#allocation7 + $0x28] sm:$0xff] }
 0x966   :  { %2812 = vrcp.f32 %v1191_v16  ;;  %v1203_v48 = vand.u32 2147483648, %v1191_v16  ;;  %vm1197_vm15 = vweird.f32 %v1191_v16  ;;  %v1201_v14 = vand.u32 2147483647, %v1191_v16 }
 0x967   :  { %v1349_v29 = vmul.f32 %v2809_v10, %v1348_v25  ;;  %v3831_v25 = vld [vmem:[#allocation7 + $0x20] sm:$0xff] }
 0x968   :  { %v1204_v42 = vor.u32 1.1754944e-38, %v1203_v48  ;;  %vm1202_vm3 = vcmp.eq.f32.partialorder %v1201_v14, 8.507059e+37 }
 0x969   :  { %v1350_v20 = vadd.f32 %v2809_v10, %v1349_v29 }
 0x96b   :  { %v1354_v24 = vsel %vm1353_vm9, %v2809_v10, %v1350_v20  ;;  %v3812_v10 = vld [vmem:[#allocation7 + $0x30] sm:$0x3]  ;;  %v3834_v20 = vld [vmem:[#allocation10 + $0x8] sm:$0xff] }
 0x96c   :  { %v2813_v11 = vpop.eup %2812  ;;  %v3793_v50 = vsel %vm1356_vm10, %v1358_v49, %v1354_v24 }
 0x96d   :  { %v1193_v30 = vmul.f32 %v2813_v11, %v1191_v16  ;;  %vm1198_vm14 = vweird.f32 %v2813_v11  ;;  %v1362_v16 = vmul.f32 %v3793_v50, %v3698_v9  ;;  %v3848_v9 = vld [vmem:[#allocation7 + $0x10] sm:$0xff] }
 0x96e   :  { %vm1199_vm0 = vmor %vm1197_vm15, %vm1198_vm14 }
 0x96f   :  { %v1194_v43 = vsub.f32 1.0, %v1193_v30 }
 0x971   :  { %v1195_v54 = vmul.f32 %v2813_v11, %v1194_v43 }
 0x973   :  { %v1196_v40 = vadd.f32 %v2813_v11, %v1195_v54 }
 0x975   :  { %v1200_v60 = vsel %vm1199_vm0, %v2813_v11, %v1196_v40  ;;  %v3856_v11 = vld [vmem:[#allocation7] sm:$0xff] }
 0x978   :  { %v1285_v61 = vpop.permute.xlu1 %1284 }
 0x979   :  { %v1287_v7 = vmul.f32 %v1285_v61, %v3788_v0 }
 0x97b   :  { %1289 = vrot.lane.b32.xlu0 %v1287_v7, %s3100_s20  ;;  %v1205_v7 = vsel %vm1202_vm3, %v1204_v42, %v1200_v60 }
 0x9b2   :  { %v1365_v56 = vpop.permute.xlu2 %1364 }
 0x9b3   :  { %v1367_v51 = vmul.f32 %v1365_v56, %v3793_v50 }
 0x9b5   :  { %1369 = vrot.lane.b32.xlu1 %v1367_v51, %s3100_s20 }
 0x9ba   :  { %v1211_v57 = vpop.permute.xlu2 %1210 }
 0x9bb   :  { %v3799_v18 = vadd.f32 %v1211_v57, %v1207_v19 }
 0x9bd   :  { %2814 = vtanh.f32 %v3799_v18 }
 0x9c3   :  { %v2815_v61 = vpop.eup %2814 }
 0x9c4   :  { %v1215_v13 = vmul.f32 %v2815_v61, %v1205_v7 }
 0x9c6   :  { %1385 = vrot.lane.b32.xlu2 %v1215_v13, %s3099_s3 }
 0x9ed   :  { %v1290_v46 = vpop.permute.xlu0 %1289 }
 0x9ee   :  { %v3805_v62 = vadd.f32 %v1290_v46, %v1282_v27 }
 0x9f0   :  { %2816 = vtanh.f32 %v3805_v62 }
 0x9f6   :  { %v2817_v31 = vpop.eup %2816 }
 0x9f7   :  { %1295 = vrot.lane.b32.xlu0 %v2817_v31, %s3099_s3 }
 0xa20   :  { %v1386_v38 = vpop.permute.xlu2 %1385 }
 0xa21   :  { %2614 = vmatmul.msk.f32.vlgmr.msra.gmra.mxu2 %vm298_vm12, %v1386_v38  ;;  %2616 = vmatmul.msk.f32.vlgmr.msrb.gmra.mxu3 %vm298_vm12, %v1386_v38 }
 0xa22   :  { %2620 = vmatmul.msk.f32.vlgmr.msrb.gmra.mxu1 %vm298_vm12, %v1386_v38  ;;  %2635 = vmatpush.msk.msra.mxu2 %vm302_vm1, %v3812_v10 }
 0xa23   :  { %2640 = vmatpush.msk.msrb.mxu3 %vm523_vm11, %v3816_v12  ;;  %2645 = vmatpush.msk.msrb.mxu1 %vm302_vm1, %v3554_v52 }
 0xa24   :  { %1752 = vmatpush.msra.mxu2 %v3822_v44 }
 0xa25   :  { %1838 = vmatpush.msrb.mxu3 %v3825_v55  ;;  %1925 = vmatpush.msrb.mxu1 %v3564_v53  ;;  %v3843_v53 = vld [vmem:[#allocation10] sm:$0xff] }
 0xa26   :  { %1753 = vmatpush.msra.mxu2 %v3831_v25 }
 0xa27   :  { %v1370_v29 = vpop.permute.xlu1 %1369  ;;  %1839 = vmatpush.msrb.mxu3 %v3834_v20  ;;  %1926 = vmatpush.msrb.mxu1 %v3572_v35  ;;  %v3852_v35 = vld [vmem:[#allocation7 + $0x8] sm:$0xff] }
 0xa28   :  { %v3838_v52 = vadd.f32 %v1370_v29, %v1362_v16  ;;  %1754 = vmatpush.msra.mxu2 %v3840_v28  ;;  %v3910_v16 = vld [vmem:[%s4176_s9] ss:$0 sm:$0xff] }
 0xa29   :  { %1840 = vmatpush.msrb.mxu3 %v3843_v53  ;;  %1927 = vmatpush.msrb.mxu1 %v3580_v39 }
 0xa2a   :  { %2818 = vtanh.f32 %v3838_v52  ;;  %1755 = vmatpush.msra.mxu2 %v3848_v9 }
 0xa2b   :  { %1928 = vmatpush.msrb.mxu1 %v3587_v41  ;;  %v249_v41 = vadd.f32 %v3656_v5, %v3314_v37 }
 0xa2c   :  { %1756 = vmatpush.msra.mxu2 %v3852_v35 }
 0xa2d   :  { %1929 = vmatpush.msrb.mxu1 %v3725_v21 }
 0xa2e   :  { %1757 = vmatpush.msra.mxu2 %v3856_v11 }
 0xa2f   :  { %1930 = vmatpush.msrb.mxu1 %v3732_v23 }
 0xa30   :  { %v2819_v39 = vpop.eup %2818 }
 0xa31   :  { %1375 = vrot.lane.b32.xlu1 %v2819_v39, %s3099_s3 }
 0xa69   :  { %v1296_v47 = vpop.permute.xlu0 %1295 }
 0xa6a   :  { %v1298_v24 = vmul.f32 %v1296_v47, %v3788_v0  ;;  %v290_v0 = vadd.f32 %v3665_v8, %v3317_v45 }
 0xa6c   :  { %1500 = vrot.lane.b32.xlu0 %v1298_v24, %s3100_s20 }
 0xaa3   :  { %v1376_v49 = vpop.permute.xlu1 %1375 }
 0xaa4   :  { %v1378_v21 = vmul.f32 %v1376_v49, %v3793_v50  ;;  %v1406_v30 = vpop.f32.mrf.mxu2  ;;  %v1426_v54 = vpop.f32.mrf.mxu3 }
 0xaa5   :  { %v1429_v56 = vadd.f32 %v1406_v30, %v249_v41  ;;  %v3869_v57 = vadd.f32 %v1426_v54, %v290_v0 }
 0xaa6   :  { %1380 = vrot.lane.b32.xlu1 %v1378_v21, %s3100_s20 }
 0xaa7   :  { %v2617_v51 = vmul.f32 -1.442695, %v1429_v56 }
 0xaa9   :  { %2820 = vpow2.f32 %v2617_v51 }
 0xaaf   :  { %v2821_v23 = vpop.eup %2820 }
 0xab0   :  { %v1434_v43 = vadd.f32 1.0, %v2821_v23 }
 0xab2   :  { %2822 = vrcp.f32 %v1434_v43  ;;  %v1446_v50 = vand.u32 2147483648, %v1434_v43  ;;  %v1444_v14 = vand.u32 2147483647, %v1434_v43  ;;  %vm1440_vm5 = vweird.f32 %v1434_v43 }
 0xab3   :  { %2824 = vtanh.f32 %v3869_v57 }
 0xab4   :  { %v1447_v42 = vor.u32 1.1754944e-38, %v1446_v50  ;;  %vm1445_vm7 = vcmp.eq.f32.partialorder %v1444_v14, 8.507059e+37 }
 0xab8   :  { %v2823_v19 = vpop.eup %2822 }
 0xab9   :  { %v1436_v5 = vmul.f32 %v2823_v19, %v1434_v43  ;;  %vm1441_vm4 = vweird.f32 %v2823_v19  ;;  %v2825_v7 = vpop.eup %2824 }
 0xaba   :  { %vm1442_vm6 = vmor %vm1440_vm5, %vm1441_vm4 }
 0xabb   :  { %v1437_v40 = vsub.f32 1.0, %v1436_v5 }
 0xabd   :  { %v1438_v48 = vmul.f32 %v2823_v19, %v1437_v40 }
 0xabf   :  { %v1439_v60 = vadd.f32 %v2823_v19, %v1438_v48 }
 0xac1   :  { %v1443_v61 = vsel %vm1442_vm6, %v2823_v19, %v1439_v60 }
 0xac2   :  { %v3872_v13 = vsel %vm1445_vm7, %v1447_v42, %v1443_v61  ;;  %v2618_v42 = vmul.f32 -1.442695, %v3869_v57 }
 0xac3   :  { %v1471_v8 = vmul.f32 %v2825_v7, %v3872_v13 }
 0xade   :  { %v1501_v27 = vpop.permute.xlu0 %1500 }
 0xadf   :  { %2622 = vmatmul.msk.f32.vlgmr.msra.gmra.mxu0 %vm520_vm13, %v1501_v27  ;;  %2625 = vmatmul.msk.f32.vlgmr.msrb.gmra.mxu2 %vm520_vm13, %v1501_v27 }
 0xae0   :  { %2637 = vmatpush.msk.msra.mxu0 %vm523_vm11, %v3757_v32  ;;  %2647 = vmatpush.msk.msrb.mxu2 %vm302_vm1, %v3619_v22  ;;  %v3895_v22 = vld [vmem:[%s4175_s8 + $0x8] sm:$0x3] }
 0xae2   :  { %1780 = vmatpush.msra.mxu0 %v3761_v33  ;;  %1945 = vmatpush.msrb.mxu2 %v3626_v1  ;;  %v3902_v1 = vld [vmem:[%s4175_s8] sm:$0xff] }
 0xae4   :  { %1781 = vmatpush.msra.mxu0 %v3766_v63  ;;  %1946 = vmatpush.msrb.mxu2 %v3632_v4  ;;  %v1496_v4 = vpop.f32.mrf.mxu1 }
 0xae6   :  { %1782 = vmatpush.msra.mxu0 %v3770_v15  ;;  %1947 = vmatpush.msrb.mxu2 %v3638_v6  ;;  %v1497_v6 = vadd.f32 %v3781_v3, %v1496_v4 }
 0xae8   :  { %1948 = vmatpush.msrb.mxu2 %v3644_v34 }
 0xaea   :  { %1949 = vmatpush.msrb.mxu2 %v3650_v36 }
 0xaec   :  { %1950 = vmatpush.msrb.mxu2 %v3738_v26 }
 0xb18   :  { %v1381_v46 = vpop.permute.xlu1 %1380 }
 0xb19   :  { %1383 = vst.msk [vmem:[#allocation2 + $0x10] sm:$0xff] %vm789_vm2, %v1381_v46  ;;  %2627 = vmatmul.msk.f32.vlgmr.msrb.gmra.mxu0 %vm789_vm2, %v1381_v46 }
 0xb1a   :  { %2642 = vmatpush.msk.msrb.mxu0 %vm302_vm1, %v3895_v22 }
 0xb1c   :  { %1862 = vmatpush.msrb.mxu0 %v3902_v1 }
 0xb5c   :  { %v1521_v34 = vpop.f32.mrf.mxu0 }
 0xb5d   :  { %v1524_v36 = vadd.f32 %v1521_v34, %v1497_v6 }
 0xb5f   :  { %2826 = vtanh.f32 %v1524_v36  ;;  %v2623_v38 = vmul.f32 -1.442695, %v1524_v36 }
 0xb61   :  { %2828 = vpow2.f32 %v2623_v38 }
 0xb62   :  { %v1579_v31 = vpop.f32.mrf.mxu2 }
 0xb63   :  { %v1580_v29 = vadd.f32 %v3910_v16, %v1579_v31 }
 0xb65   :  { %v2827_v26 = vpop.eup %2826 }
 0xb66   :  { %1547 = vrot.lane.b32.xlu2 %v2827_v26, %s3099_s3 }
 0xb67   :  { %v2829_v24 = vpop.eup %2828 }
 0xb68   :  { %v1528_v49 = vadd.f32 1.0, %v2829_v24 }
 0xb6a   :  { %v1540_v43 = vand.u32 2147483648, %v1528_v49  ;;  %vm1534_vm9 = vweird.f32 %v1528_v49  ;;  %v1538_v54 = vand.u32 2147483647, %v1528_v49 }
 0xb6c   :  { %v1541_v19 = vor.u32 1.1754944e-38, %v1540_v43  ;;  %vm1539_vm14 = vcmp.eq.f32.partialorder %v1538_v54, 8.507059e+37 }
 0xb96   :  { %v1601_v39 = vpop.f32.mrf.mxu0 }
 0xb97   :  { %v1604_v47 = vadd.f32 %v1601_v39, %v1580_v29 }
 0xb99   :  { %2830 = vtanh.f32 %v1604_v47  ;;  %v2628_v48 = vmul.f32 -1.442695, %v1604_v47 }
 0xb9a   :  { %2832 = vrcp.f32 %v1528_v49 }
 0xb9b   :  { %2834 = vpow2.f32 %v2628_v48 }
 0xb9f   :  { %v2831_v41 = vpop.eup %2830 }
 0xba0   :  { %1627 = vrot.lane.b32.xlu0 %v2831_v41, %s3099_s3  ;;  %v2833_v21 = vpop.eup %2832 }
 0xba1   :  { %v1530_v30 = vmul.f32 %v2833_v21, %v1528_v49  ;;  %vm1535_vm8 = vweird.f32 %v2833_v21  ;;  %v2835_v14 = vpop.eup %2834  ;;  %v1470_v49 = vmul.f32 %v3872_v13, %v3799_v18 }
 0xba2   :  { %vm1536_vm10 = vmor %vm1534_vm9, %vm1535_vm8  ;;  %v1608_v60 = vadd.f32 1.0, %v2835_v14 }
 0xba3   :  { %v1531_v56 = vsub.f32 1.0, %v1530_v30 }
 0xba4   :  { %2836 = vrcp.f32 %v1608_v60  ;;  %v1620_v34 = vand.u32 2147483648, %v1608_v60  ;;  %vm1614_vm0 = vweird.f32 %v1608_v60  ;;  %v1618_v26 = vand.u32 2147483647, %v1608_v60 }
 0xba5   :  { %v1532_v51 = vmul.f32 %v2833_v21, %v1531_v56  ;;  %2838 = vpow2.f32 %v2618_v42 }
 0xba6   :  { %v1621_v38 = vor.u32 1.1754944e-38, %v1620_v34  ;;  %vm1619_vm4 = vcmp.eq.f32.partialorder %v1618_v26, 8.507059e+37 }
 0xba7   :  { %v1533_v23 = vadd.f32 %v2833_v21, %v1532_v51 }
 0xba8   :  { %1473 = vrot.lane.b32.xlu0 %v1471_v8, %s3099_s3 }
 0xba9   :  { %v1537_v0 = vsel %vm1536_vm10, %v2833_v21, %v1533_v23 }
 0xbaa   :  { %v3915_v40 = vsel %vm1539_vm14, %v1541_v19, %v1537_v0  ;;  %v2837_v61 = vpop.eup %2836 }
 0xbab   :  { %v1610_v7 = vmul.f32 %v2837_v61, %v1608_v60  ;;  %v2839_v8 = vpop.eup %2838  ;;  %vm1615_vm15 = vweird.f32 %v2837_v61  ;;  %v1545_v18 = vmul.f32 %v3915_v40, %v3805_v62 }
 0xbac   :  { %v1454_v27 = vadd.f32 1.0, %v2839_v8  ;;  %vm1616_vm3 = vmor %vm1614_vm0, %vm1615_vm15 }
 0xbad   :  { %v1611_v46 = vsub.f32 1.0, %v1610_v7 }
 0xbae   :  { %2840 = vrcp.f32 %v1454_v27  ;;  %v1466_v51 = vand.u32 2147483648, %v1454_v27  ;;  %vm1460_vm6 = vweird.f32 %v1454_v27  ;;  %v1464_v23 = vand.u32 2147483647, %v1454_v27 }
 0xbaf   :  { %v1612_v4 = vmul.f32 %v2837_v61, %v1611_v46 }
 0xbb0   :  { %v1467_v54 = vor.u32 1.1754944e-38, %v1466_v51  ;;  %vm1465_vm8 = vcmp.eq.f32.partialorder %v1464_v23, 8.507059e+37 }
 0xbb1   :  { %v1613_v6 = vadd.f32 %v2837_v61, %v1612_v4 }
 0xbb3   :  { %v1617_v31 = vsel %vm1616_vm3, %v2837_v61, %v1613_v6 }
 0xbb4   :  { %v2841_v36 = vpop.eup %2840  ;;  %v1622_v39 = vsel %vm1619_vm4, %v1621_v38, %v1617_v31 }
 0xbb5   :  { %v1456_v29 = vmul.f32 %v2841_v36, %v1454_v27  ;;  %vm1461_vm5 = vweird.f32 %v2841_v36  ;;  %v1625_v14 = vmul.f32 %v1622_v39, %v3838_v52  ;;  %v252_v52 = vadd.f32 %v3658_v58, %v3314_v37 }
 0xbb6   :  { %vm1462_vm7 = vmor %vm1460_vm6, %vm1461_vm5 }
 0xbb7   :  { %v1457_v24 = vsub.f32 1.0, %v1456_v29 }
 0xbb9   :  { %v1458_v41 = vmul.f32 %v2841_v36, %v1457_v24 }
 0xbbb   :  { %v1459_v56 = vadd.f32 %v2841_v36, %v1458_v41 }
 0xbbd   :  { %v1463_v43 = vsel %vm1462_vm7, %v2841_v36, %v1459_v56 }
 0xbbe   :  { %v1468_v19 = vsel %vm1465_vm8, %v1467_v54, %v1463_v43 }
 0xbc0   :  { %v1548_v5 = vpop.permute.xlu2 %1547 }
 0xbc1   :  { %v1550_v50 = vmul.f32 %v1548_v5, %v3915_v40 }
 0xbc3   :  { %1552 = vrot.lane.b32.xlu1 %v1550_v50, %s3100_s20 }
 0xc12   :  { %v1628_v57 = vpop.permute.xlu0 %1627 }
 0xc13   :  { %v1630_v47 = vmul.f32 %v1628_v57, %v1622_v39 }
 0xc15   :  { %1632 = vrot.lane.b32.xlu2 %v1630_v47, %s3100_s20 }
 0xc1a   :  { %v1474_v21 = vpop.permute.xlu0 %1473 }
 0xc1b   :  { %v3923_v30 = vadd.f32 %v1474_v21, %v1470_v49 }
 0xc1d   :  { %2842 = vtanh.f32 %v3923_v30 }
 0xc23   :  { %v2843_v0 = vpop.eup %2842 }
 0xc24   :  { %v1478_v5 = vmul.f32 %v2843_v0, %v1468_v19 }
 0xc26   :  { %1648 = vrot.lane.b32.xlu0 %v1478_v5, %s3099_s3 }
 0xc35   :  { %v1553_v13 = vpop.permute.xlu1 %1552 }
 0xc36   :  { %v3929_v50 = vadd.f32 %v1553_v13, %v1545_v18 }
 0xc38   :  { %2844 = vtanh.f32 %v3929_v50 }
 0xc3e   :  { %v2845_v48 = vpop.eup %2844 }
 0xc3f   :  { %1558 = vrot.lane.b32.xlu1 %v2845_v48, %s3099_s3 }
 0xc6f   :  { %v1633_v60 = vpop.permute.xlu2 %1632 }
 0xc70   :  { %v3934_v42 = vadd.f32 %v1633_v60, %v1625_v14 }
 0xc72   :  { %2846 = vtanh.f32 %v3934_v42 }
 0xc78   :  { %v2847_v61 = vpop.eup %2846 }
 0xc79   :  { %1638 = vrot.lane.b32.xlu2 %v2847_v61, %s3099_s3 }
 0xc98   :  { %v1649_v7 = vpop.permute.xlu0 %1648 }
 0xc99   :  { %2630 = vmatmul.msk.f32.vlgmr.msra.gmra.mxu3 %vm298_vm12, %v1649_v7  ;;  %2632 = vmatmul.msk.f32.vlgmr.msra.gmra.mxu1 %vm298_vm12, %v1649_v7 }
 0xc9a   :  { %2636 = vmatmul.msk.f32.vlgmr.msra.gmra.mxu2 %vm298_vm12, %v1649_v7  ;;  %2651 = vmatpush.msk.msra.mxu3 %vm302_vm1, %v3812_v10 }
 0xc9b   :  { %2658 = vmatpush.msk.msra.mxu1 %vm302_vm1, %v3895_v22  ;;  %2661 = vmatpush.msk.msra.mxu2 %vm302_vm1, %v3812_v10 }
 0xc9c   :  { %2015 = vmatpush.msra.mxu3 %v3822_v44 }
 0xc9d   :  { %2125 = vmatpush.msra.mxu1 %v3902_v1  ;;  %2188 = vmatpush.msra.mxu2 %v3822_v44 }
 0xc9e   :  { %2016 = vmatpush.msra.mxu3 %v3831_v25 }
 0xc9f   :  { %2189 = vmatpush.msra.mxu2 %v3831_v25 }
 0xca0   :  { %2017 = vmatpush.msra.mxu3 %v3840_v28 }
 0xca1   :  { %2190 = vmatpush.msra.mxu2 %v3840_v28 }
 0xca2   :  { %2018 = vmatpush.msra.mxu3 %v3848_v9 }
 0xca3   :  { %2191 = vmatpush.msra.mxu2 %v3848_v9 }
 0xca4   :  { %2019 = vmatpush.msra.mxu3 %v3852_v35 }
 0xca5   :  { %2192 = vmatpush.msra.mxu2 %v3852_v35 }
 0xca6   :  { %2020 = vmatpush.msra.mxu3 %v3856_v11 }
 0xca7   :  { %2193 = vmatpush.msra.mxu2 %v3856_v11 }
 0xcb1   :  { %v1559_v62 = vpop.permute.xlu1 %1558 }
 0xcb2   :  { %v1561_v10 = vmul.f32 %v1559_v62, %v3915_v40  ;;  %v293_v40 = vadd.f32 %v3667_v17, %v3317_v45 }
 0xcb4   :  { %1763 = vrot.lane.b32.xlu1 %v1561_v10, %s3100_s20 }
 0xcd3   :  { %v1639_v44 = vpop.permute.xlu2 %1638 }
 0xcd4   :  { %v1641_v25 = vmul.f32 %v1639_v44, %v1622_v39 }
 0xcd6   :  { %1643 = vrot.lane.b32.xlu2 %v1641_v25, %s3100_s20 }
 0xd16   :  { %v1689_v58 = vpop.f32.mrf.mxu1 }
 0xd17   :  { %v1693_v4 = vadd.f32 %v1689_v58, %v293_v40 }
 0xd19   :  { %v2634_v14 = vmul.f32 -1.442695, %v1693_v4 }
 0xd1c   :  { %v1669_v28 = vpop.f32.mrf.mxu3 }
 0xd1d   :  { %v1692_v9 = vadd.f32 %v1669_v28, %v252_v52  ;;  %v1759_v57 = vpop.f32.mrf.mxu2 }
 0xd1e   :  { %v1760_v39 = vadd.f32 %v3781_v3, %v1759_v57 }
 0xd1f   :  { %v2633_v8 = vmul.f32 -1.442695, %v1692_v9 }
 0xd21   :  { %2848 = vpow2.f32 %v2633_v8 }
 0xd26   :  { %v1764_v35 = vpop.permute.xlu1 %1763 }
 0xd27   :  { %v2849_v27 = vpop.eup %2848  ;;  %2638 = vmatmul.msk.f32.vlgmr.msra.gmra.mxu0 %vm520_vm13, %v1764_v35  ;;  %2641 = vmatmul.msk.f32.vlgmr.msrb.gmra.mxu3 %vm520_vm13, %v1764_v35 }
 0xd28   :  { %v1697_v11 = vadd.f32 1.0, %v2849_v27  ;;  %2653 = vmatpush.msk.msra.mxu0 %vm523_vm11, %v3757_v32  ;;  %2663 = vmatpush.msk.msrb.mxu3 %vm523_vm11, %v3757_v32 }
 0xd2a   :  { %2850 = vrcp.f32 %v1697_v11  ;;  %2043 = vmatpush.msra.mxu0 %v3761_v33  ;;  %2216 = vmatpush.msrb.mxu3 %v3761_v33  ;;  %v1707_v34 = vand.u32 2147483647, %v1697_v11  ;;  %vm1703_vm10 = vweird.f32 %v1697_v11 }
 0xd2b   :  { %2852 = vtanh.f32 %v1693_v4 }
 0xd2c   :  { %2044 = vmatpush.msra.mxu0 %v3766_v63  ;;  %2217 = vmatpush.msrb.mxu3 %v3766_v63  ;;  %v1709_v63 = vand.u32 2147483648, %v1697_v11  ;;  %vm1708_vm15 = vcmp.eq.f32.partialorder %v1707_v34, 8.507059e+37 }
 0xd2e   :  { %2045 = vmatpush.msra.mxu0 %v3770_v15  ;;  %2218 = vmatpush.msrb.mxu3 %v3770_v15  ;;  %v1710_v36 = vor.u32 1.1754944e-38, %v1709_v63 }
 0xd30   :  { %v2851_v46 = vpop.eup %2850  ;;  %v1644_v32 = vpop.permute.xlu2 %1643 }
 0xd31   :  { %v1699_v6 = vmul.f32 %v2851_v46, %v1697_v11  ;;  %1646 = vst.msk [vmem:[#allocation2 + $0x18] sm:$0xff] %vm789_vm2, %v1644_v32  ;;  %2643 = vmatmul.msk.f32.vlgmr.msrb.gmra.mxu0 %vm789_vm2, %v1644_v32  ;;  %vm1704_vm9 = vweird.f32 %v2851_v46  ;;  %v2853_v31 = vpop.eup %2852 }
 0xd32   :  { %2656 = vmatpush.msk.msrb.mxu0 %vm523_vm11, %v3816_v12  ;;  %vm1705_vm14 = vmor %vm1703_vm10, %vm1704_vm9 }
 0xd33   :  { %v1700_v33 = vsub.f32 1.0, %v1699_v6 }
 0xd34   :  { %2101 = vmatpush.msrb.mxu0 %v3825_v55 }
 0xd35   :  { %v1701_v17 = vmul.f32 %v2851_v46, %v1700_v33 }
 0xd36   :  { %2102 = vmatpush.msrb.mxu0 %v3834_v20 }
 0xd37   :  { %v1702_v15 = vadd.f32 %v2851_v46, %v1701_v17 }
 0xd38   :  { %2103 = vmatpush.msrb.mxu0 %v3843_v53 }
 0xd39   :  { %v1706_v26 = vsel %vm1705_vm14, %v2851_v46, %v1702_v15 }
 0xd3a   :  { %v3986_v38 = vsel %vm1708_vm15, %v1710_v36, %v1706_v26 }
 0xd3b   :  { %v1734_v29 = vmul.f32 %v2853_v31, %v3986_v38 }
 0xda4   :  { %v1784_v47 = vpop.f32.mrf.mxu0 }
 0xda5   :  { %v1787_v24 = vadd.f32 %v1784_v47, %v1760_v39 }
 0xda7   :  { %2854 = vtanh.f32 %v1787_v24  ;;  %v2639_v43 = vmul.f32 -1.442695, %v1787_v24 }
 0xdaa   :  { %v1842_v41 = vpop.f32.mrf.mxu3 }
 0xdab   :  { %v1843_v21 = vadd.f32 %v3910_v16, %v1842_v41 }
 0xdad   :  { %v2855_v49 = vpop.eup %2854 }
 0xdae   :  { %v1864_v56 = vpop.f32.mrf.mxu0  ;;  %1810 = vrot.lane.b32.xlu0 %v2855_v49, %s3099_s3 }
 0xdaf   :  { %v1867_v51 = vadd.f32 %v1864_v56, %v1843_v21 }
 0xdb1   :  { %2856 = vtanh.f32 %v1867_v51  ;;  %v2644_v0 = vmul.f32 -1.442695, %v1867_v51 }
 0xdb2   :  { %2858 = vpow2.f32 %v2639_v43 }
 0xdb3   :  { %2860 = vpow2.f32 %v2644_v0 }
 0xdb7   :  { %v2857_v23 = vpop.eup %2856 }
 0xdb8   :  { %1890 = vrot.lane.b32.xlu1 %v2857_v23, %s3099_s3  ;;  %v2859_v54 = vpop.eup %2858 }
 0xdb9   :  { %v1791_v19 = vadd.f32 1.0, %v2859_v54  ;;  %v2861_v5 = vpop.eup %2860 }
 0xdba   :  { %v1871_v13 = vadd.f32 1.0, %v2861_v5 }
 0xdbb   :  { %2862 = vrcp.f32 %v1791_v19  ;;  %v1803_v25 = vand.u32 2147483648, %v1791_v19  ;;  %vm1797_vm3 = vweird.f32 %v1791_v19  ;;  %v1801_v28 = vand.u32 2147483647, %v1791_v19 }
 0xdbc   :  { %2864 = vrcp.f32 %v1871_v13  ;;  %v1883_v4 = vand.u32 2147483648, %v1871_v13  ;;  %vm1877_vm7 = vweird.f32 %v1871_v13  ;;  %v1881_v6 = vand.u32 2147483647, %v1871_v13 }
 0xdbd   :  { %2866 = vpow2.f32 %v2634_v14  ;;  %v1804_v35 = vor.u32 1.1754944e-38, %v1803_v25  ;;  %vm1802_vm5 = vcmp.eq.f32.partialorder %v1801_v28, 8.507059e+37  ;;  %v296_v28 = vadd.f32 %v3670_v2, %v3317_v45 }
 0xdbe   :  { %v1884_v63 = vor.u32 1.1754944e-38, %v1883_v4  ;;  %vm1882_vm9 = vcmp.eq.f32.partialorder %v1881_v6, 8.507059e+37 }
 0xdc0   :  { %1736 = vrot.lane.b32.xlu1 %v1734_v29, %s3099_s3  ;;  %v1733_v29 = vmul.f32 %v3986_v38, %v3923_v30 }
 0xdc1   :  { %v2863_v18 = vpop.eup %2862 }
 0xdc2   :  { %v1793_v48 = vmul.f32 %v2863_v18, %v1791_v19  ;;  %v2865_v61 = vpop.eup %2864  ;;  %vm1798_vm0 = vweird.f32 %v2863_v18 }
 0xdc3   :  { %v1873_v62 = vmul.f32 %v2865_v61, %v1871_v13  ;;  %v2867_v10 = vpop.eup %2866  ;;  %vm1799_vm4 = vmor %vm1797_vm3, %vm1798_vm0  ;;  %vm1878_vm6 = vweird.f32 %v2865_v61 }
 0xdc4   :  { %v1794_v60 = vsub.f32 1.0, %v1793_v48  ;;  %v1717_v52 = vadd.f32 1.0, %v2867_v10  ;;  %vm1879_vm8 = vmor %vm1877_vm7, %vm1878_vm6 }
 0xdc5   :  { %v1874_v9 = vsub.f32 1.0, %v1873_v62 }
 0xdc6   :  { %v1795_v7 = vmul.f32 %v2863_v18, %v1794_v60  ;;  %2868 = vrcp.f32 %v1717_v52  ;;  %v1729_v24 = vand.u32 2147483648, %v1717_v52  ;;  %vm1723_vm14 = vweird.f32 %v1717_v52 }
 0xdc7   :  { %v1875_v27 = vmul.f32 %v2865_v61, %v1874_v9  ;;  %v1727_v41 = vand.u32 2147483647, %v1717_v52  ;;  %v255_v60 = vadd.f32 %v3660_v59, %v3314_v37 }
 0xdc8   :  { %v1796_v44 = vadd.f32 %v2863_v18, %v1795_v7  ;;  %v1730_v21 = vor.u32 1.1754944e-38, %v1729_v24 }
 0xdc9   :  { %v1876_v46 = vadd.f32 %v2865_v61, %v1875_v27  ;;  %vm1728_vm0 = vcmp.eq.f32.partialorder %v1727_v41, 8.507059e+37 }
 0xdca   :  { %v1800_v8 = vsel %vm1799_vm4, %v2863_v18, %v1796_v44 }
 0xdcb   :  { %v1805_v58 = vsel %vm1802_vm5, %v1804_v35, %v1800_v8  ;;  %v1880_v33 = vsel %vm1879_vm8, %v2865_v61, %v1876_v46 }
 0xdcc   :  { %v2869_v32 = vpop.eup %2868  ;;  %v1885_v15 = vsel %vm1882_vm9, %v1884_v63, %v1880_v33  ;;  %v1808_v30 = vmul.f32 %v1805_v58, %v3929_v50 }
 0xdcd   :  { %v1719_v17 = vmul.f32 %v2869_v32, %v1717_v52  ;;  %vm1724_vm10 = vweird.f32 %v2869_v32  ;;  %v1888_v0 = vmul.f32 %v1885_v15, %v3934_v42 }
 0xdce   :  { %vm1725_vm15 = vmor %vm1723_vm14, %vm1724_vm10 }
 0xdcf   :  { %v1720_v26 = vsub.f32 1.0, %v1719_v17 }
 0xdd1   :  { %v1721_v31 = vmul.f32 %v2869_v32, %v1720_v26 }
 0xdd3   :  { %v1722_v47 = vadd.f32 %v2869_v32, %v1721_v31 }
 0xdd5   :  { %v1726_v49 = vsel %vm1725_vm15, %v2869_v32, %v1722_v47 }
 0xdd6   :  { %v1731_v51 = vsel %vm1728_vm0, %v1730_v21, %v1726_v49 }
 0xe20   :  { %v1811_v11 = vpop.permute.xlu0 %1810 }
 0xe21   :  { %v1813_v40 = vmul.f32 %v1811_v11, %v1805_v58 }
 0xe23   :  { %1815 = vrot.lane.b32.xlu2 %v1813_v40, %s3100_s20 }
 0xe2a   :  { %v1891_v34 = vpop.permute.xlu1 %1890 }
 0xe2b   :  { %v1893_v36 = vmul.f32 %v1891_v34, %v1885_v15 }
 0xe2d   :  { %1895 = vrot.lane.b32.xlu0 %v1893_v36, %s3100_s20 }
 0xe32   :  { %v1737_v57 = vpop.permute.xlu1 %1736 }
 0xe33   :  { %v3998_v39 = vadd.f32 %v1737_v57, %v1733_v29 }
 0xe35   :  { %2870 = vtanh.f32 %v3998_v39 }
 0xe3b   :  { %v2871_v56 = vpop.eup %2870 }
 0xe3c   :  { %v1741_v23 = vmul.f32 %v2871_v56, %v1731_v51 }
 0xe3e   :  { %1911 = vrot.lane.b32.xlu1 %v1741_v23, %s3099_s3 }
 0xe7d   :  { %v1816_v38 = vpop.permute.xlu2 %1815 }
 0xe7e   :  { %v4003_v43 = vadd.f32 %v1816_v38, %v1808_v30 }
 0xe80   :  { %2872 = vtanh.f32 %v4003_v43 }
 0xe86   :  { %v2873_v54 = vpop.eup %2872 }
 0xe87   :  { %1821 = vrot.lane.b32.xlu2 %v2873_v54, %s3099_s3 }
 0xe9f   :  { %v1896_v19 = vpop.permute.xlu0 %1895 }
 0xea0   :  { %v4008_v5 = vadd.f32 %v1896_v19, %v1888_v0 }
 0xea2   :  { %2874 = vtanh.f32 %v4008_v5 }
 0xea8   :  { %v2875_v18 = vpop.eup %2874 }
 0xea9   :  { %1901 = vrot.lane.b32.xlu0 %v2875_v18, %s3099_s3 }
 0xeb0   :  { %v1912_v13 = vpop.permute.xlu1 %1911 }
 0xeb1   :  { %2646 = vmatmul.msk.f32.vlgmr.msrb.gmra.mxu1 %vm298_vm12, %v1912_v13  ;;  %2648 = vmatmul.msk.f32.vlgmr.msrb.gmra.mxu2 %vm298_vm12, %v1912_v13 }
 0xeb2   :  { %2652 = vmatmul.msk.f32.vlgmr.msra.gmra.mxu3 %vm298_vm12, %v1912_v13  ;;  %2668 = vmatpush.msk.msrb.mxu1 %vm302_vm1, %v3895_v22 }
 0xeb3   :  { %2671 = vmatpush.msk.msra.mxu3 %vm523_vm11, %v3816_v12 }
 0xeb4   :  { %2298 = vmatpush.msrb.mxu1 %v3902_v1 }
 0xeb5   :  { %2364 = vmatpush.msra.mxu3 %v3825_v55 }
 0xeb7   :  { %2365 = vmatpush.msra.mxu3 %v3834_v20 }
 0xeb9   :  { %2366 = vmatpush.msra.mxu3 %v3843_v53 }
 0xee1   :  { %v1822_v50 = vpop.permute.xlu2 %1821 }
 0xee2   :  { %v1824_v42 = vmul.f32 %v1822_v50, %v1805_v58 }
 0xee4   :  { %2026 = vrot.lane.b32.xlu2 %v1824_v42, %s3100_s20 }
 0xf1b   :  { %v1902_v48 = vpop.permute.xlu0 %1901 }
 0xf1c   :  { %v1904_v14 = vmul.f32 %v1902_v48, %v1885_v15 }
 0xf1e   :  { %1906 = vrot.lane.b32.xlu0 %v1904_v14, %s3100_s20 }
 0xf2e   :  { %v1932_v61 = vpop.f32.mrf.mxu1 }
 0xf2f   :  { %v1955_v7 = vadd.f32 %v1932_v61, %v255_v60 }
 0xf31   :  { %v2649_v62 = vmul.f32 -1.442695, %v1955_v7 }
 0xf33   :  { %2876 = vpow2.f32 %v2649_v62 }
 0xf34   :  { %v1952_v52 = vpop.f32.mrf.mxu2 }
 0xf35   :  { %v4032_v8 = vadd.f32 %v1952_v52, %v296_v28  ;;  %v2022_v40 = vpop.f32.mrf.mxu3 }
 0xf37   :  { %v2650_v54 = vmul.f32 -1.442695, %v4032_v8 }
 0xf39   :  { %v2877_v10 = vpop.eup %2876 }
 0xf3a   :  { %v1960_v44 = vadd.f32 1.0, %v2877_v10 }
 0xf3c   :  { %2878 = vrcp.f32 %v1960_v44  ;;  %v1972_v35 = vand.u32 2147483648, %v1960_v44  ;;  %v1970_v2 = vand.u32 2147483647, %v1960_v44 }
 0xf3d   :  { %2880 = vtanh.f32 %v4032_v8 }
 0xf3e   :  { %v2027_v25 = vpop.permute.xlu2 %2026  ;;  %vm1971_vm5 = vcmp.eq.f32.partialorder %v1970_v2, 8.507059e+37 }
 0xf3f   :  { %2654 = vmatmul.msk.f32.vlgmr.msra.gmra.mxu0 %vm520_vm13, %v2027_v25 }
 0xf40   :  { %2666 = vmatpush.msk.msra.mxu0 %vm523_vm11, %v3816_v12  ;;  %vm1966_vm11 = vweird.f32 %v1960_v44 }
 0xf42   :  { %v2879_v9 = vpop.eup %2878  ;;  %2274 = vmatpush.msra.mxu0 %v3825_v55  ;;  %v1973_v55 = vor.u32 1.1754944e-38, %v1972_v35 }
 0xf43   :  { %v1962_v37 = vmul.f32 %v2879_v9, %v1960_v44  ;;  %vm1967_vm3 = vweird.f32 %v2879_v9  ;;  %v2881_v27 = vpop.eup %2880 }
 0xf44   :  { %2275 = vmatpush.msra.mxu0 %v3834_v20  ;;  %vm1968_vm4 = vmor %vm1966_vm11, %vm1967_vm3 }
 0xf45   :  { %v1963_v59 = vsub.f32 1.0, %v1962_v37 }
 0xf46   :  { %2276 = vmatpush.msra.mxu0 %v3843_v53 }
 0xf47   :  { %2657 = vmatmul.msk.f32.vlgmr.msrb.gmra.mxu0 %vm520_vm13, %v2027_v25  ;;  %v1964_v45 = vmul.f32 %v2879_v9, %v1963_v59 }
 0xf48   :  { %2673 = vmatpush.msk.msrb.mxu0 %vm302_vm1, %v3895_v22  ;;  %v2023_v22 = vadd.f32 %v3781_v3, %v2022_v40 }
 0xf49   :  { %v1965_v12 = vadd.f32 %v2879_v9, %v1964_v45 }
 0xf4a   :  { %2388 = vmatpush.msrb.mxu0 %v3902_v1 }
 0xf4b   :  { %v1969_v20 = vsel %vm1968_vm4, %v2879_v9, %v1965_v12 }
 0xf4c   :  { %v4042_v11 = vsel %vm1971_vm5, %v1973_v55, %v1969_v20 }
 0xf4d   :  { %v1997_v53 = vmul.f32 %v2881_v27, %v4042_v11  ;;  %v1996_v8 = vmul.f32 %v4042_v11, %v3998_v39 }
 0xf90   :  { %v1907_v58 = vpop.permute.xlu0 %1906 }
 0xf91   :  { %1909 = vst.msk [vmem:[#allocation2 + $0x20] sm:$0xff] %vm789_vm2, %v1907_v58  ;;  %2659 = vmatmul.msk.f32.vlgmr.msra.gmra.mxu1 %vm789_vm2, %v1907_v58 }
 0xfbc   :  { %v2047_v46 = vpop.f32.mrf.mxu0 }
 0xfbd   :  { %v2050_v4 = vadd.f32 %v2047_v46, %v2023_v22  ;;  %v2445_v22 = vld [vmem:[%s4177_s10 + $0x8] sm:$0x3] }
 0xfbe   :  { %2685 = vmatpush.msk.msrb.mxu2 %vm302_vm1, %v2445_v22  ;;  %2676 = vmatpush.msk.msra.mxu1 %vm302_vm1, %v2445_v22 }
 0xfbf   :  { %2882 = vtanh.f32 %v2050_v4  ;;  %v2655_v6 = vmul.f32 -1.442695, %v2050_v4 }
 0xfc1   :  { %2884 = vpow2.f32 %v2655_v6  ;;  %v2439_v6 = vld [vmem:[#allocation2 + $0x18] sm:$0xff] }
 0xfc4   :  { %v2105_v1 = vpop.f32.mrf.mxu0 }
 0xfc5   :  { %v2883_v32 = vpop.eup %2882  ;;  %v2106_v33 = vadd.f32 %v3910_v16, %v2105_v1 }
 0xfc6   :  { %2073 = vrot.lane.b32.xlu1 %v2883_v32, %s3099_s3 }
 0xfc7   :  { %v2885_v34 = vpop.eup %2884 }
 0xfc8   :  { %v2054_v36 = vadd.f32 1.0, %v2885_v34 }
 0xfca   :  { %v2066_v47 = vand.u32 2147483648, %v2054_v36  ;;  %vm2060_vm7 = vweird.f32 %v2054_v36  ;;  %v2064_v24 = vand.u32 2147483647, %v2054_v36 }
 0xfcc   :  { %v2067_v49 = vor.u32 1.1754944e-38, %v2066_v47  ;;  %vm2065_vm9 = vcmp.eq.f32.partialorder %v2064_v24, 8.507059e+37 }
0x100e   :  { %v2127_v63 = vpop.f32.mrf.mxu1 }
0x100f   :  { %v2130_v17 = vadd.f32 %v2127_v63, %v2106_v33  ;;  %v2440_v63 = vld [vmem:[#allocation2 + $0x20] sm:$0xff] }
0x1011   :  { %2886 = vtanh.f32 %v2130_v17  ;;  %v2660_v23 = vmul.f32 -1.442695, %v2130_v17 }
0x1012   :  { %2888 = vrcp.f32 %v2054_v36 }
0x1013   :  { %2890 = vpow2.f32 %v2660_v23 }
0x1017   :  { %v2887_v15 = vpop.eup %2886 }
0x1018   :  { %2153 = vrot.lane.b32.xlu2 %v2887_v15, %s3099_s3  ;;  %v2889_v3 = vpop.eup %2888 }
0x1019   :  { %v2056_v26 = vmul.f32 %v2889_v3, %v2054_v36  ;;  %vm2061_vm6 = vweird.f32 %v2889_v3  ;;  %v2891_v30 = vpop.eup %2890 }
0x101a   :  { %vm2062_vm8 = vmor %vm2060_vm7, %vm2061_vm6  ;;  %v2134_v38 = vadd.f32 1.0, %v2891_v30 }
0x101b   :  { %v2057_v31 = vsub.f32 1.0, %v2056_v26 }
0x101c   :  { %2892 = vrcp.f32 %v2134_v38  ;;  %v2146_v14 = vand.u32 2147483648, %v2134_v38  ;;  %vm2140_vm14 = vweird.f32 %v2134_v38  ;;  %v2144_v61 = vand.u32 2147483647, %v2134_v38 }
0x101d   :  { %v2058_v29 = vmul.f32 %v2889_v3, %v2057_v31  ;;  %2894 = vpow2.f32 %v2650_v54 }
0x101e   :  { %v2147_v62 = vor.u32 1.1754944e-38, %v2146_v14  ;;  %vm2145_vm0 = vcmp.eq.f32.partialorder %v2144_v61, 8.507059e+37 }
0x101f   :  { %v2059_v57 = vadd.f32 %v2889_v3, %v2058_v29 }
0x1020   :  { %1999 = vrot.lane.b32.xlu2 %v1997_v53, %s3099_s3 }
0x1021   :  { %v2063_v41 = vsel %vm2062_vm8, %v2889_v3, %v2059_v57  ;;  %v4089_v3 = vld [vmem:[%s4178_s11] ss:$0 sm:$0xff] }
0x1022   :  { %v4052_v56 = vsel %vm2065_vm9, %v2067_v49, %v2063_v41  ;;  %v2893_v0 = vpop.eup %2892  ;;  %v2436_v41 = vld [vmem:[#allocation2] sm:$0xff] }
0x1023   :  { %v2136_v19 = vmul.f32 %v2893_v0, %v2134_v38  ;;  %v2895_v18 = vpop.eup %2894  ;;  %vm2141_vm10 = vweird.f32 %v2893_v0  ;;  %v2071_v39 = vmul.f32 %v4052_v56, %v4003_v43  ;;  %v2444_v43 = vld [vmem:[%s4177_s10] sm:$0xff] }
0x1024   :  { %v1980_v13 = vadd.f32 1.0, %v2895_v18  ;;  %vm2142_vm15 = vmor %vm2140_vm14, %vm2141_vm10  ;;  %2687 = vmatpush.msrb.mxu2 %v2444_v43  ;;  %2492 = vmatpush.msra.mxu1 %v2444_v43 }
0x1025   :  { %v2137_v50 = vsub.f32 1.0, %v2136_v19 }
0x1026   :  { %2896 = vrcp.f32 %v1980_v13  ;;  %v1992_v45 = vand.u32 2147483648, %v1980_v13  ;;  %vm1986_vm11 = vweird.f32 %v1980_v13  ;;  %v1990_v2 = vand.u32 2147483647, %v1980_v13 }
0x1027   :  { %v2138_v42 = vmul.f32 %v2893_v0, %v2137_v50 }
0x1028   :  { %v1993_v55 = vor.u32 1.1754944e-38, %v1992_v45  ;;  %vm1991_vm5 = vcmp.eq.f32.partialorder %v1990_v2, 8.507059e+37 }
0x1029   :  { %v2139_v48 = vadd.f32 %v2893_v0, %v2138_v42 }
0x102b   :  { %v2143_v7 = vsel %vm2142_vm15, %v2893_v0, %v2139_v48 }
0x102c   :  { %v2897_v60 = vpop.eup %2896  ;;  %v2148_v25 = vsel %vm2145_vm0, %v2147_v62, %v2143_v7 }
0x102d   :  { %v1982_v10 = vmul.f32 %v2897_v60, %v1980_v13  ;;  %vm1987_vm3 = vweird.f32 %v2897_v60  ;;  %v2151_v4 = vmul.f32 %v2148_v25, %v4008_v5 }
0x102e   :  { %vm1988_vm4 = vmor %vm1986_vm11, %vm1987_vm3 }
0x102f   :  { %v1983_v28 = vsub.f32 1.0, %v1982_v10 }
0x1031   :  { %v1984_v9 = vmul.f32 %v2897_v60, %v1983_v28 }
0x1033   :  { %v1985_v35 = vadd.f32 %v2897_v60, %v1984_v9 }
0x1035   :  { %v1989_v12 = vsel %vm1988_vm4, %v2897_v60, %v1985_v35 }
0x1036   :  { %v1994_v27 = vsel %vm1991_vm5, %v1993_v55, %v1989_v12 }
0x1038   :  { %v2074_v21 = vpop.permute.xlu1 %2073 }
0x1039   :  { %v2076_v51 = vmul.f32 %v2074_v21, %v4052_v56  ;;  %v2437_v21 = vld [vmem:[#allocation2 + $0x8] sm:$0xff] }
0x103b   :  { %2078 = vrot.lane.b32.xlu0 %v2076_v51, %s3100_s20  ;;  %v2961_v51 = vld [vmem:[%s4173_s6] ss:$0 sm:$0xff] }
0x1072   :  { %v2154_v44 = vpop.permute.xlu2 %2153 }
0x1073   :  { %v2156_v52 = vmul.f32 %v2154_v44, %v2148_v25 }
0x1075   :  { %2158 = vrot.lane.b32.xlu1 %v2156_v52, %s3100_s20 }
0x107a   :  { %v2000_v37 = vpop.permute.xlu2 %1999 }
0x107b   :  { %v2002_v59 = vadd.f32 %v2000_v37, %v1996_v8 }
0x107d   :  { %2898 = vtanh.f32 %v2002_v59 }
0x1083   :  { %v2899_v20 = vpop.eup %2898 }
0x1084   :  { %v2004_v53 = vmul.f32 %v2899_v20, %v1994_v27 }
0x1086   :  { %2174 = vrot.lane.b32.xlu2 %v2004_v53, %s3099_s3 }
0x10ad   :  { %v2079_v11 = vpop.permute.xlu0 %2078 }
0x10ae   :  { %v4063_v58 = vadd.f32 %v2079_v11, %v2071_v39 }
0x10b0   :  { %2900 = vtanh.f32 %v4063_v58 }
0x10b6   :  { %v2901_v40 = vpop.eup %2900 }
0x10b7   :  { %2084 = vrot.lane.b32.xlu0 %v2901_v40, %s3099_s3 }
0x10e0   :  { %v2175_v46 = vpop.permute.xlu2 %2174 }
0x10e1   :  { %2662 = vmatmul.msk.f32.vlgmr.msra.gmra.mxu2 %vm298_vm12, %v2175_v46  ;;  %vm2518_vm12 = vcmask 23552  }
0x10e7   :  { %v2159_v32 = vpop.permute.xlu1 %2158 }
0x10e8   :  { %v4077_v1 = vadd.f32 %v2159_v32, %v2151_v4 }
0x10e9   :  { %2680 = vmatmul.msk.f32.vlgmr.msrb.gmra.mxu2 %vm789_vm2, %v2439_v6 }
0x10ea   :  { %2902 = vtanh.f32 %v4077_v1 }
0x10f0   :  { %v2903_v33 = vpop.eup %2902 }
0x10f1   :  { %2164 = vrot.lane.b32.xlu1 %v2903_v33, %s3099_s3  ;;  %2681 = vmatmul.msk.f32.gmra.mxu2 %vm789_vm2, %v2440_v63 }
0x1129   :  { %v2085_v17 = vpop.permute.xlu0 %2084 }
0x112a   :  { %v2087_v34 = vmul.f32 %v2085_v17, %v4052_v56  ;;  %v2438_v56 = vld [vmem:[#allocation2 + $0x10] sm:$0xff] }
0x112c   :  { %2199 = vrot.lane.b32.xlu0 %v2087_v34, %s3100_s20 }
0x1163   :  { %v2165_v5 = vpop.permute.xlu1 %2164 }
0x1164   :  { %v2167_v15 = vmul.f32 %v2165_v5, %v2148_v25  ;;  %v2195_v36 = vpop.f32.mrf.mxu2 }
0x1165   :  { %v2196_v23 = vadd.f32 %v2961_v51, %v2195_v36 }
0x1166   :  { %2169 = vrot.lane.b32.xlu1 %v2167_v15, %s3100_s20 }
0x116c   :  { %v2503_v26 = vpop.f32.mrf.mxu2 }
0x116d   :  { %v2504_v31 = vadd.f32 %v4089_v3, %v2503_v26 }
0x116f   :  { %2522 = vst.msk [vmem:[%s4179_s12 + $0x18] sm:$0xff] %vm2518_vm12, %v2504_v31 }
0x1174   :  { %v2506_v29 = vpop.f32.mrf.mxu2 }
0x1175   :  { %v2507_v57 = vadd.f32 %v4089_v3, %v2506_v29 }
0x1177   :  { %2523 = vst.msk [vmem:[%s4179_s12 + $0x20] sm:$0xff] %vm2518_vm12, %v2507_v57 }
0x119e   :  { %v2200_v47 = vpop.permute.xlu0 %2199 }
0x119f   :  { %2664 = vmatmul.msk.f32.vlgmr.msrb.gmra.mxu3 %vm520_vm13, %v2200_v47  ;;  %2667 = vmatmul.msk.f32.vlgmr.msra.gmra.mxu0 %vm520_vm13, %v2200_v47 }
0x11a0   :  { %2686 = vmatpush.msk.msrb.mxu3 %vm302_vm1, %v2445_v22 }
0x11a2   :  { %2688 = vmatpush.msrb.mxu3 %v2444_v43 }
0x11d8   :  { %v2170_v24 = vpop.permute.xlu1 %2169 }
0x11d9   :  { %2172 = vst.msk [vmem:[#allocation2 + $0x28] sm:$0xff] %vm789_vm2, %v2170_v24  ;;  %2669 = vmatmul.msk.f32.vlgmr.msrb.gmra.mxu1 %vm789_vm2, %v2170_v24 }
0x11e0   :  { %v2441_v49 = vld [vmem:[#allocation2 + $0x28] sm:$0xff] }
0x11e1   :  { %2677 = vmatmul.msk.f32.vlgmr.msra.gmra.mxu1 %vm789_vm2, %v2436_v41  ;;  %2682 = vmatmul.msk.f32.gmra.mxu2 %vm789_vm2, %v2441_v49 }
0x11e9   :  { %2678 = vmatmul.msk.f32.gmra.mxu1 %vm789_vm2, %v2437_v21 }
0x11f1   :  { %2679 = vmatmul.msk.f32.gmra.mxu1 %vm789_vm2, %v2438_v56 }
0x121c   :  { %v2278_v0 = vpop.f32.mrf.mxu0 }
0x121d   :  { %v2279_v19 = vadd.f32 %v3910_v16, %v2278_v0 }
0x1222   :  { %v2220_v30 = vpop.f32.mrf.mxu3 }
0x1223   :  { %v2223_v38 = vadd.f32 %v2220_v30, %v2196_v23  ;;  %v2962_v23 = vld [vmem:[%s4176_s9] ss:$0 sm:$0xff] }
0x1225   :  { %2904 = vtanh.f32 %v2223_v38  ;;  %v2665_v50 = vmul.f32 -1.442695, %v2223_v38 }
0x122b   :  { %v2905_v54 = vpop.eup %2904 }
0x122c   :  { %2246 = vrot.lane.b32.xlu2 %v2905_v54, %s3099_s3 }
0x1256   :  { %v2300_v18 = vpop.f32.mrf.mxu1 }
0x1257   :  { %v2303_v13 = vadd.f32 %v2300_v18, %v2279_v19 }
0x1259   :  { %2906 = vtanh.f32 %v2303_v13  ;;  %v2670_v27 = vmul.f32 -1.442695, %v2303_v13 }
0x125a   :  { %2908 = vpow2.f32 %v2665_v50 }
0x125e   :  { %v2494_v42 = vpop.f32.mrf.mxu1 }
0x125f   :  { %v2907_v48 = vpop.eup %2906  ;;  %v2495_v14 = vadd.f32 %v4089_v3, %v2494_v42 }
0x1260   :  { %2326 = vrot.lane.b32.xlu0 %v2907_v48, %s3099_s3  ;;  %v2909_v60 = vpop.eup %2908 }
0x1261   :  { %2519 = vst.msk [vmem:[%s4179_s12] sm:$0xff] %vm2518_vm12, %v2495_v14  ;;  %v2227_v7 = vadd.f32 1.0, %v2909_v60 }
0x1263   :  { %2910 = vrcp.f32 %v2227_v7  ;;  %v2239_v59 = vand.u32 2147483648, %v2227_v7  ;;  %vm2233_vm6 = vweird.f32 %v2227_v7  ;;  %v2237_v35 = vand.u32 2147483647, %v2227_v7 }
0x1264   :  { %v2509_v61 = vpop.f32.mrf.mxu2  ;;  %2912 = vpow2.f32 %v2670_v27 }
0x1265   :  { %v2510_v16 = vadd.f32 %v4089_v3, %v2509_v61  ;;  %v2240_v2 = vor.u32 1.1754944e-38, %v2239_v59  ;;  %vm2238_vm8 = vcmp.eq.f32.partialorder %v2237_v35, 8.507059e+37 }
0x1266   :  { %v2497_v62 = vpop.f32.mrf.mxu1 }
0x1267   :  { %2524 = vst.msk [vmem:[%s4179_s12 + $0x28] sm:$0xff] %vm2518_vm12, %v2510_v16  ;;  %v2498_v10 = vadd.f32 %v4089_v3, %v2497_v62 }
0x1269   :  { %2520 = vst.msk [vmem:[%s4179_s12 + $0x8] sm:$0xff] %vm2518_vm12, %v2498_v10  ;;  %v2911_v52 = vpop.eup %2910 }
0x126a   :  { %v2229_v28 = vmul.f32 %v2911_v52, %v2227_v7  ;;  %vm2234_vm1 = vweird.f32 %v2911_v52  ;;  %v2913_v53 = vpop.eup %2912 }
0x126b   :  { %vm2235_vm7 = vmor %vm2233_vm6, %vm2234_vm1  ;;  %v2307_v39 = vadd.f32 1.0, %v2913_v53 }
0x126c   :  { %v2230_v9 = vsub.f32 1.0, %v2229_v28 }
0x126d   :  { %2914 = vrcp.f32 %v2307_v39  ;;  %v2319_v4 = vand.u32 2147483648, %v2307_v39  ;;  %vm2313_vm10 = vweird.f32 %v2307_v39  ;;  %v2317_v32 = vand.u32 2147483647, %v2307_v39 }
0x126e   :  { %v2500_v44 = vpop.f32.mrf.mxu1  ;;  %v2231_v8 = vmul.f32 %v2911_v52, %v2230_v9 }
0x126f   :  { %v2501_v25 = vadd.f32 %v4089_v3, %v2500_v44  ;;  %v2320_v33 = vor.u32 1.1754944e-38, %v2319_v4  ;;  %vm2318_vm15 = vcmp.eq.f32.partialorder %v2317_v32, 8.507059e+37 }
0x1270   :  { %v2232_v37 = vadd.f32 %v2911_v52, %v2231_v8 }
0x1271   :  { %2521 = vst.msk [vmem:[%s4179_s12 + $0x10] sm:$0xff] %vm2518_vm12, %v2501_v25 }
0x1272   :  { %v2236_v45 = vsel %vm2235_vm7, %v2911_v52, %v2232_v37 }
0x1273   :  { %v2241_v55 = vsel %vm2238_vm8, %v2240_v2, %v2236_v45  ;;  %v2915_v11 = vpop.eup %2914 }
0x1274   :  { %v2309_v40 = vmul.f32 %v2915_v11, %v2307_v39  ;;  %vm2314_vm9 = vweird.f32 %v2915_v11  ;;  %v2244_v5 = vmul.f32 %v2241_v55, %v4063_v58 }
0x1275   :  { %vm2315_vm14 = vmor %vm2313_vm10, %vm2314_vm9 }
0x1276   :  { %v2310_v22 = vsub.f32 1.0, %v2309_v40 }
0x1278   :  { %v2311_v43 = vmul.f32 %v2915_v11, %v2310_v22 }
0x127a   :  { %v2312_v46 = vadd.f32 %v2915_v11, %v2311_v43 }
0x127c   :  { %v2316_v6 = vsel %vm2315_vm14, %v2915_v11, %v2312_v46 }
0x127d   :  { %v2321_v17 = vsel %vm2318_vm15, %v2320_v33, %v2316_v6 }
0x127e   :  { %v2324_v31 = vmul.f32 %v2321_v17, %v4077_v1 }
0x1286   :  { %v2247_v12 = vpop.permute.xlu2 %2246 }
0x1287   :  { %v2249_v20 = vmul.f32 %v2247_v12, %v2241_v55 }
0x1289   :  { %2251 = vrot.lane.b32.xlu1 %v2249_v20, %s3100_s20 }
0x12d2   :  { %v2327_v63 = vpop.permute.xlu0 %2326 }
0x12d3   :  { %v2329_v34 = vmul.f32 %v2327_v63, %v2321_v17 }
0x12d5   :  { %2331 = vrot.lane.b32.xlu2 %v2329_v34, %s3100_s20 }
0x12fb   :  { %v2252_v15 = vpop.permute.xlu1 %2251 }
0x12fc   :  { %v2254_v36 = vadd.f32 %v2252_v15, %v2244_v5 }
0x12fe   :  { %2916 = vtanh.f32 %v2254_v36 }
0x1304   :  { %v2917_v26 = vpop.eup %2916 }
0x1305   :  { %2257 = vrot.lane.b32.xlu0 %v2917_v26, %s3099_s3 }
0x132f   :  { %v2332_v29 = vpop.permute.xlu2 %2331 }
0x1330   :  { %v2334_v57 = vadd.f32 %v2332_v29, %v2324_v31 }
0x1332   :  { %2918 = vtanh.f32 %v2334_v57 }
0x1338   :  { %v2919_v47 = vpop.eup %2918 }
0x1339   :  { %2337 = vrot.lane.b32.xlu1 %v2919_v47, %s3099_s3 }
0x1377   :  { %v2258_v24 = vpop.permute.xlu0 %2257 }
0x1378   :  { %v2260_v41 = vmul.f32 %v2258_v24, %v2241_v55 }
0x137a   :  { %2347 = vrot.lane.b32.xlu2 %v2260_v41, %s3100_s20 }
0x13ab   :  { %v2338_v49 = vpop.permute.xlu1 %2337 }
0x13ac   :  { %v2340_v58 = vmul.f32 %v2338_v49, %v2321_v17 }
0x13ae   :  { %2342 = vrot.lane.b32.xlu0 %v2340_v58, %s3100_s20 }
0x13d4   :  { %v2348_v21 = vpop.permute.xlu2 %2347 }
0x13d5   :  { %2672 = vmatmul.msk.f32.vlgmr.msra.gmra.mxu3 %vm520_vm13, %v2348_v21 }
0x1420   :  { %v2343_v56 = vpop.permute.xlu0 %2342 }
0x1421   :  { %2345 = vst.msk [vmem:[#allocation2 + $0x30] sm:$0xff] %vm789_vm2, %v2343_v56  ;;  %2674 = vmatmul.msk.f32.vlgmr.msrb.gmra.mxu0 %vm789_vm2, %v2343_v56 }
0x1428   :  { %v2442_v1 = vld [vmem:[#allocation2 + $0x30] sm:$0xff] }
0x1429   :  { %2683 = vmatmul.msk.f32.vlgmr.msrb.gmra.mxu3 %vm789_vm2, %v2442_v1 }
0x1458   :  { %v2368_v51 = vpop.f32.mrf.mxu3 }
0x1459   :  { %v2369_v30 = vadd.f32 %v2962_v23, %v2368_v51 }
0x149e   :  { %v2390_v38 = vpop.f32.mrf.mxu0 }
0x149f   :  { %v2393_v54 = vadd.f32 %v2390_v38, %v2369_v30 }
0x14a1   :  { %2920 = vtanh.f32 %v2393_v54  ;;  %v2675_v13 = vmul.f32 -1.442695, %v2393_v54 }
0x14a3   :  { %2922 = vpow2.f32 %v2675_v13 }
0x14a7   :  { %v2921_v0 = vpop.eup %2920 }
0x14a8   :  { %2416 = vrot.lane.b32.xlu1 %v2921_v0, %s3099_s3 }
0x14a9   :  { %v2923_v50 = vpop.eup %2922 }
0x14aa   :  { %v2397_v42 = vadd.f32 1.0, %v2923_v50 }
0x14ac   :  { %v2512_v19 = vpop.f32.mrf.mxu3  ;;  %2924 = vrcp.f32 %v2397_v42  ;;  %v2409_v7 = vand.u32 2147483648, %v2397_v42  ;;  %vm2403_vm0 = vweird.f32 %v2397_v42  ;;  %v2407_v62 = vand.u32 2147483647, %v2397_v42 }
0x14ad   :  { %v2513_v18 = vadd.f32 %v4089_v3, %v2512_v19 }
0x14ae   :  { %v2410_v44 = vor.u32 1.1754944e-38, %v2409_v7  ;;  %vm2408_vm11 = vcmp.eq.f32.partialorder %v2407_v62, 8.507059e+37 }
0x14af   :  { %2525 = vst.msk [vmem:[%s4179_s12 + $0x30] sm:$0xff] %vm2518_vm12, %v2513_v18 }
0x14b2   :  { %v2925_v48 = vpop.eup %2924 }
0x14b3   :  { %v2399_v14 = vmul.f32 %v2925_v48, %v2397_v42  ;;  %vm2404_vm13 = vweird.f32 %v2925_v48 }
0x14b4   :  { %vm2405_vm3 = vmor %vm2403_vm0, %vm2404_vm13 }
0x14b5   :  { %v2400_v60 = vsub.f32 1.0, %v2399_v14 }
0x14b7   :  { %v2401_v61 = vmul.f32 %v2925_v48, %v2400_v60 }
0x14b9   :  { %v2402_v16 = vadd.f32 %v2925_v48, %v2401_v61 }
0x14bb   :  { %v2406_v10 = vsel %vm2405_vm3, %v2925_v48, %v2402_v16 }
0x14bc   :  { %v2411_v52 = vsel %vm2408_vm11, %v2410_v44, %v2406_v10 }
0x14bd   :  { %v2414_v9 = vmul.f32 %v2411_v52, %v2334_v57 }
0x151a   :  { %v2417_v25 = vpop.permute.xlu1 %2416 }
0x151b   :  { %v2419_v28 = vmul.f32 %v2417_v25, %v2411_v52 }
0x151d   :  { %2421 = vrot.lane.b32.xlu2 %v2419_v28, %s3100_s20 }
0x1577   :  { %v2422_v8 = vpop.permute.xlu2 %2421 }
0x1578   :  { %v2424_v37 = vadd.f32 %v2422_v8, %v2414_v9 }
0x157a   :  { %2926 = vtanh.f32 %v2424_v37 }
0x1580   :  { %v2927_v59 = vpop.eup %2926 }
0x1581   :  { %2427 = vrot.lane.b32.xlu0 %v2927_v59, %s3099_s3 }
0x15f3   :  { %v2428_v35 = vpop.permute.xlu0 %2427 }
0x15f4   :  { %v2430_v45 = vmul.f32 %v2428_v35, %v2411_v52 }
0x15f6   :  { %2432 = vrot.lane.b32.xlu1 %v2430_v45, %s3100_s20 }
0x1668   :  { %v2433_v2 = vpop.permute.xlu1 %2432 }
0x1669   :  { %2435 = vst.msk [vmem:[#allocation2 + $0x38] sm:$0xff] %vm789_vm2, %v2433_v2 }
0x1670   :  { %v2443_v12 = vld [vmem:[#allocation2 + $0x38] sm:$0xff] }
0x1671   :  { %2684 = vmatmul.msk.f32.gmra.mxu3 %vm789_vm2, %v2443_v12 }
0x16f4   :  { %v2515_v55 = vpop.f32.mrf.mxu3 }
0x16f5   :  { %v2516_v20 = vadd.f32 %v4089_v3, %v2515_v55 }
0x16f7   :  { %2526 = vst.msk [vmem:[%s4179_s12 + $0x38] sm:$0xff] %vm2518_vm12, %v2516_v20 }
0x16f8   :  { %2531 = vsyncpa [#allocation4], 1 }
0x16f9   :  { %2532 = vsyncpa [#allocation6], 1 }
0x16fa   :  { %2533 = vsyncpa [#allocation9], 1 }

</bundles_post_ra>
